<compile_context>
chip_gen: v7x
topology: tpu7x:2x2x1
jax: 0.10.0
libtpu: 0.0.40
codegen_flags: <defaults>
</compile_context>

<pallas_src>
import math

import jax
import jax.numpy as jnp
from jax.experimental import pallas as pl
from jax.experimental.pallas import tpu as pltpu

NUM_TIME_EMB = 16
NUM_CHANNELS = 32
NUM_HID = 64
NUM_LAYERS = 4          # layers 0..2 use cond+LN+SiLU, layer 3 is plain Linear
NUM_TIME_LAYERS = 2
SKIP_LAYERS = (1, 2)    # skip_type = 0 (concat x)
CONDITION_BIAS = 1.0
LN_EPS = 1e-5

BATCH = 256
TILE_B = 128            # rows per grid step (sublane/MXU aligned)

MATMUL_DTYPE = jnp.bfloat16   # MXU-native on v6e/v7x; f32 accumulation


def get_timestep_embedding(timesteps, dim):
    """Standard sinusoidal timestep embedding (tiny glue, stays in plain JAX)."""
    half = dim // 2
    freqs = jnp.exp(
        -math.log(10000.0) * jnp.arange(half, dtype=jnp.float32) / (half - 1)
    )
    args = timesteps.astype(jnp.float32)[:, None] * freqs[None, :]
    return jnp.concatenate([jnp.sin(args), jnp.cos(args)], axis=1)


def mlp_skipnet_kernel(
    x_ref, temb_ref,
    # time_embed: Linear -> SiLU -> Linear
    wt0_ref, bt0_ref, wt1_ref, bt1_ref,
    # fused cond projections for layers 0..2: (C, 3H), (1, 3H)
    we_ref, be_ref,
    # fused x-side projections for layers 0..2: (C, 3H)
    wxa_ref,
    # layer 0: bias + LayerNorm params
    b0_ref, g0_ref, bb0_ref,
    # layer 1 (skip): h-side weight + bias + LayerNorm params
    w1h_ref, b1_ref, g1_ref, bb1_ref,
    # layer 2 (skip): h-side weight + bias + LayerNorm params
    w2h_ref, b2_ref, g2_ref, bb2_ref,
    # layer 3: plain Linear (act='none', no norm, no cond)
    w3_ref, b3_ref,
    out_ref,
):
    f32 = jnp.float32
    H = NUM_HID

    def mm(a, w_ref):
        # bf16 x bf16 -> f32 on the MXU; elementwise math stays in f32.
        return jnp.dot(a.astype(w_ref.dtype), w_ref[...],
                       preferred_element_type=f32)

    def silu(v):
        # sigmoid via EUP exp + approx reciprocal (keeps the divide off the VALU)
        return v * pl.reciprocal(1.0 + jnp.exp(-v), approx=True)

    # --- time embedding MLP (num_time_layers = 2) ---
    t = silu(mm(temb_ref[...], wt0_ref) + bt0_ref[...])
    cond = mm(t, wt1_ref) + bt1_ref[...]
    # MLPLNAct.cond_layers = Sequential(act, linear_emb): act applied to cond first.
    cond_act = silu(cond)

    # --- fused cond projections: one dot instead of three ---
    c_all = mm(cond_act, we_ref) + be_ref[...]          # (TILE_B, 3*NUM_HID)
    c0 = c_all[:, 0 * H:1 * H]
    c1 = c_all[:, 1 * H:2 * H]
    c2 = c_all[:, 2 * H:3 * H]

    # --- fused x-side projections (layer0 W, layer1 W_x, layer2 W_x) ---
    x = x_ref[...]
    xp = mm(x, wxa_ref)                                 # (TILE_B, 3*NUM_HID)
    xp0 = xp[:, 0 * H:1 * H]
    xp1 = xp[:, 1 * H:2 * H]
    xp2 = xp[:, 2 * H:3 * H]

    def cond_ln_act(hx, c, g_ref, bb_ref):
        hx = hx * (CONDITION_BIAS + c)
        # single-pass LayerNorm over the feature axis (f32)
        inv_n = 1.0 / hx.shape[-1]
        mu = jnp.sum(hx, axis=-1, keepdims=True) * inv_n
        var = jnp.sum(hx * hx, axis=-1, keepdims=True) * inv_n - mu * mu
        hx = (hx - mu) * jax.lax.rsqrt(var + LN_EPS)
        hx = hx * g_ref[...] + bb_ref[...]
        return silu(hx)

    # TODO(synk): nn.Dropout is identity here (dropout=0 / eval), so it is omitted.
    h = cond_ln_act(xp0 + b0_ref[...], c0, g0_ref, bb0_ref)
    # skip layers (skip_type=0): concat([h, x]) @ W == h @ W_h + x @ W_x
    h = cond_ln_act(mm(h, w1h_ref) + xp1 + b1_ref[...], c1, g1_ref, bb1_ref)
    h = cond_ln_act(mm(h, w2h_ref) + xp2 + b2_ref[...], c2, g2_ref, bb2_ref)
    out_ref[...] = mm(h, w3_ref) + b3_ref[...]          # last layer: act='none'


def init_params(key):
    keys = iter(jax.random.split(key, 32))

    def lin(a, b):
        # kaiming-normal-like init (nonlinearity='relu' for silu), deterministic.
        w = math.sqrt(2.0 / a) * jax.random.normal(next(keys), (a, b), jnp.float32)
        bias = 0.01 * jax.random.normal(next(keys), (1, b), jnp.float32)
        return [w, bias]

    params = []
    # time_embed MLP
    params += lin(NUM_TIME_EMB, NUM_CHANNELS)
    params += lin(NUM_CHANNELS, NUM_CHANNELS)
    # main layers 0..2 (cond + LayerNorm + SiLU); layers 1,2 take concat([h, x])
    in_dims = [NUM_CHANNELS, NUM_HID + NUM_CHANNELS, NUM_HID + NUM_CHANNELS]
    for a in in_dims:
        params += lin(a, NUM_HID)                     # self.linear
        params += lin(NUM_CHANNELS, NUM_HID)          # self.linear_emb (cond)
        params += [jnp.ones((1, NUM_HID), jnp.float32),   # LayerNorm gamma
                   jnp.zeros((1, NUM_HID), jnp.float32)]  # LayerNorm beta
    # last layer: plain Linear
    params += lin(NUM_HID, NUM_CHANNELS)
    return params


def pack_params(params, matmul_dtype=MATMUL_DTYPE):
    """Repack the module params into kernel layout:
    split skip-concat weights, fuse cond + x-side projections, cast to bf16."""
    (wt0, bt0, wt1, bt1,
     w0, b0, we0, be0, g0, bb0,
     w1, b1, we1, be1, g1, bb1,
     w2, b2, we2, be2, g2, bb2,
     w3, b3) = params

    cast = lambda w: w.astype(matmul_dtype)
    # concat order in forward is [h, x] -> first NUM_HID rows multiply h.
    w1h, w1x = w1[:NUM_HID], w1[NUM_HID:]
    w2h, w2x = w2[:NUM_HID], w2[NUM_HID:]
    we = jnp.concatenate([we0, we1, we2], axis=1)     # (C, 3H) cond projections
    be = jnp.concatenate([be0, be1, be2], axis=1)     # (1, 3H)
    wxa = jnp.concatenate([w0, w1x, w2x], axis=1)     # (C, 3H) x-side projections

    return (
        cast(wt0), bt0, cast(wt1), bt1,
        cast(we), be,
        cast(wxa),
        b0, g0, bb0,
        cast(w1h), b1, g1, bb1,
        cast(w2h), b2, g2, bb2,
        cast(w3), b3,
    )


def mlp_skipnet_forward(x, t, params, *, tile_b=TILE_B):
    temb = get_timestep_embedding(t, NUM_TIME_EMB)

    batch = x.shape[0]
    pad = (-batch) % tile_b
    if pad:
        x = jnp.pad(x, ((0, pad), (0, 0)))
        temb = jnp.pad(temb, ((0, pad), (0, 0)))
    padded = batch + pad

    weights = pack_params(params)

    def row_spec(feat):
        return pl.BlockSpec((tile_b, feat), lambda i: (i, 0))

    # Weights/biases/LN params: full-array block with a constant index_map ->
    # DMA'd once, stay resident in VMEM across grid steps.
    in_specs = ([row_spec(NUM_CHANNELS), row_spec(NUM_TIME_EMB)]
                + [pl.BlockSpec(w.shape, lambda i: (0, 0)) for w in weights])

    out = pl.pallas_call(
        mlp_skipnet_kernel,
        out_shape=jax.ShapeDtypeStruct((padded, NUM_CHANNELS), jnp.float32),
        grid=(padded // tile_b,),
        in_specs=in_specs,
        out_specs=pl.BlockSpec((tile_b, NUM_CHANNELS), lambda i: (i, 0)),
        compiler_params=pltpu.CompilerParams(
            dimension_semantics=("parallel",)),
    )(x, temb, *weights)
    return out[:batch]


def mlp_skipnet_ref(x, t, params):
    """Pure-JAX f32 reference for correctness checking."""
    (wt0, bt0, wt1, bt1,
     w0, b0, we0, be0, g0, bb0,
     w1, b1, we1, be1, g1, bb1,
     w2, b2, we2, be2, g2, bb2,
     w3, b3) = params

    def silu(v):
        return v * (1.0 / (1.0 + jnp.exp(-v)))

    temb = get_timestep_embedding(t, NUM_TIME_EMB)
    cond = silu(temb @ wt0 + bt0) @ wt1 + bt1
    cond_act = silu(cond)

    def layer(h, w, b, we, be, g, bb):
        hx = h @ w + b
        c = cond_act @ we + be
        hx = hx * (CONDITION_BIAS + c)
        mu = hx.mean(-1, keepdims=True)
        var = ((hx - mu) ** 2).mean(-1, keepdims=True)
        hx = (hx - mu) * jax.lax.rsqrt(var + LN_EPS) * g + bb
        return silu(hx)

    h = layer(x, w0, b0, we0, be0, g0, bb0)
    h = jnp.concatenate([h, x], axis=-1)
    h = layer(h, w1, b1, we1, be1, g1, bb1)
    h = jnp.concatenate([h, x], axis=-1)
    h = layer(h, w2, b2, we2, be2, g2, bb2)
    return h @ w3 + b3


if __name__ == "__main__":
    key = jax.random.PRNGKey(0)
    kx, kt, kp = jax.random.split(key, 3)
    x = jax.random.normal(kx, (BATCH, NUM_CHANNELS), dtype=jnp.float32)
    t = jax.random.randint(kt, (BATCH,), 0, 1000).astype(jnp.float32)
    params = init_params(kp)

    out = jax.block_until_ready(mlp_skipnet_forward(x, t, params))
    ref = mlp_skipnet_ref(x, t, params)

    assert out.shape == (BATCH, NUM_CHANNELS), out.shape
    max_err = float(jnp.max(jnp.abs(out - ref)))
    rel_err = float(jnp.linalg.norm(out - ref) / jnp.linalg.norm(ref))
    # tolerance accounts for bf16 matmul weights + approx-reciprocal sigmoid
    # versus the exact-f32 reference
    assert max_err < 0.15 and rel_err < 0.05, ("mismatch", max_err, rel_err)
    print("KERNEL_OK")
</pallas_src>

<mosaic_0001>
module attributes {stable_mosaic.version = 11 : i64} {
  func.func @mlp_skipnet_kernel(%arg0: i32, %arg1: memref<128x32xf32, #tpu.memory_space<vmem>>, %arg2: memref<128x16xf32, #tpu.memory_space<vmem>>, %arg3: memref<16x32xbf16, #tpu.memory_space<vmem>>, %arg4: memref<1x32xf32, #tpu.memory_space<vmem>>, %arg5: memref<32x32xbf16, #tpu.memory_space<vmem>>, %arg6: memref<1x32xf32, #tpu.memory_space<vmem>>, %arg7: memref<32x192xbf16, #tpu.memory_space<vmem>>, %arg8: memref<1x192xf32, #tpu.memory_space<vmem>>, %arg9: memref<32x192xbf16, #tpu.memory_space<vmem>>, %arg10: memref<1x64xf32, #tpu.memory_space<vmem>>, %arg11: memref<1x64xf32, #tpu.memory_space<vmem>>, %arg12: memref<1x64xf32, #tpu.memory_space<vmem>>, %arg13: memref<64x64xbf16, #tpu.memory_space<vmem>>, %arg14: memref<1x64xf32, #tpu.memory_space<vmem>>, %arg15: memref<1x64xf32, #tpu.memory_space<vmem>>, %arg16: memref<1x64xf32, #tpu.memory_space<vmem>>, %arg17: memref<64x64xbf16, #tpu.memory_space<vmem>>, %arg18: memref<1x64xf32, #tpu.memory_space<vmem>>, %arg19: memref<1x64xf32, #tpu.memory_space<vmem>>, %arg20: memref<1x64xf32, #tpu.memory_space<vmem>>, %arg21: memref<64x32xbf16, #tpu.memory_space<vmem>>, %arg22: memref<1x32xf32, #tpu.memory_space<vmem>>, %arg23: memref<128x32xf32, #tpu.memory_space<vmem>>) attributes {dimension_semantics = [#tpu.dimension_semantics<parallel>], iteration_bounds = array<i64: 2>, scalar_prefetch = 0 : i64, scratch_operands = 0 : i64, tpu.core_type = #tpu.core_type<tc>, window_params = [{transform_indices = @transform_0, window_bounds = array<i64: 128, 32>}, {transform_indices = @transform_1, window_bounds = array<i64: 128, 16>}, {pipeline_mode = #tpu.pipeline_mode<synchronous>, transform_indices = @transform_2, window_bounds = array<i64: 16, 32>}, {pipeline_mode = #tpu.pipeline_mode<synchronous>, transform_indices = @transform_3, window_bounds = array<i64: 1, 32>}, {pipeline_mode = #tpu.pipeline_mode<synchronous>, transform_indices = @transform_4, window_bounds = array<i64: 32, 32>}, {pipeline_mode = #tpu.pipeline_mode<synchronous>, transform_indices = @transform_5, window_bounds = array<i64: 1, 32>}, {pipeline_mode = #tpu.pipeline_mode<synchronous>, transform_indices = @transform_6, window_bounds = array<i64: 32, 192>}, {pipeline_mode = #tpu.pipeline_mode<synchronous>, transform_indices = @transform_7, window_bounds = array<i64: 1, 192>}, {pipeline_mode = #tpu.pipeline_mode<synchronous>, transform_indices = @transform_8, window_bounds = array<i64: 32, 192>}, {pipeline_mode = #tpu.pipeline_mode<synchronous>, transform_indices = @transform_9, window_bounds = array<i64: 1, 64>}, {pipeline_mode = #tpu.pipeline_mode<synchronous>, transform_indices = @transform_10, window_bounds = array<i64: 1, 64>}, {pipeline_mode = #tpu.pipeline_mode<synchronous>, transform_indices = @transform_11, window_bounds = array<i64: 1, 64>}, {pipeline_mode = #tpu.pipeline_mode<synchronous>, transform_indices = @transform_12, window_bounds = array<i64: 64, 64>}, {pipeline_mode = #tpu.pipeline_mode<synchronous>, transform_indices = @transform_13, window_bounds = array<i64: 1, 64>}, {pipeline_mode = #tpu.pipeline_mode<synchronous>, transform_indices = @transform_14, window_bounds = array<i64: 1, 64>}, {pipeline_mode = #tpu.pipeline_mode<synchronous>, transform_indices = @transform_15, window_bounds = array<i64: 1, 64>}, {pipeline_mode = #tpu.pipeline_mode<synchronous>, transform_indices = @transform_16, window_bounds = array<i64: 64, 64>}, {pipeline_mode = #tpu.pipeline_mode<synchronous>, transform_indices = @transform_17, window_bounds = array<i64: 1, 64>}, {pipeline_mode = #tpu.pipeline_mode<synchronous>, transform_indices = @transform_18, window_bounds = array<i64: 1, 64>}, {pipeline_mode = #tpu.pipeline_mode<synchronous>, transform_indices = @transform_19, window_bounds = array<i64: 1, 64>}, {pipeline_mode = #tpu.pipeline_mode<synchronous>, transform_indices = @transform_20, window_bounds = array<i64: 64, 32>}, {pipeline_mode = #tpu.pipeline_mode<synchronous>, transform_indices = @transform_21, window_bounds = array<i64: 1, 32>}, {transform_indices = @transform_22, window_bounds = array<i64: 128, 32>}]} {
    %c0 = arith.constant 0 : index
    %c0_0 = arith.constant 0 : index
    %0 = vector.load %arg2[%c0, %c0_0] : memref<128x16xf32, #tpu.memory_space<vmem>>, vector<128x16xf32>
    %1 = arith.truncf %0 : vector<128x16xf32> to vector<128x16xbf16>
    %c0_1 = arith.constant 0 : index
    %c0_2 = arith.constant 0 : index
    %2 = vector.load %arg3[%c0_1, %c0_2] : memref<16x32xbf16, #tpu.memory_space<vmem>>, vector<16x32xbf16>
    %cst = arith.constant dense<0.000000e+00> : vector<128x32xf32>
    %3 = tpu.matmul %1, %2, %cst {dimension_numbers = #tpu.dot_dimension_numbers<[1], [0], [0], [1], [0, 0, 1, 1], [], []>} : vector<128x16xbf16>, vector<16x32xbf16>, vector<128x32xf32> -> vector<128x32xf32>
    %c0_3 = arith.constant 0 : index
    %c0_4 = arith.constant 0 : index
    %4 = vector.load %arg4[%c0_3, %c0_4] : memref<1x32xf32, #tpu.memory_space<vmem>>, vector<1x32xf32>
    %5 = vector.broadcast %4 : vector<1x32xf32> to vector<128x32xf32>
    %6 = arith.addf %3, %5 : vector<128x32xf32>
    %cst_5 = arith.constant 0.000000e+00 : f32
    %7 = vector.broadcast %cst_5 : f32 to vector<128x32xf32>
    %8 = arith.subf %7, %6 : vector<128x32xf32>
    %9 = math.exp %8 : vector<128x32xf32>
    %cst_6 = arith.constant 1.000000e+00 : f32
    %10 = vector.broadcast %cst_6 : f32 to vector<128x32xf32>
    %11 = arith.addf %10, %9 : vector<128x32xf32>
    %12 = tpu.reciprocal %11 {approx = true} : vector<128x32xf32> -> vector<128x32xf32>
    %13 = arith.mulf %6, %12 : vector<128x32xf32>
    %14 = arith.truncf %13 : vector<128x32xf32> to vector<128x32xbf16>
    %c0_7 = arith.constant 0 : index
    %c0_8 = arith.constant 0 : index
    %15 = vector.load %arg5[%c0_7, %c0_8] : memref<32x32xbf16, #tpu.memory_space<vmem>>, vector<32x32xbf16>
    %cst_9 = arith.constant dense<0.000000e+00> : vector<128x32xf32>
    %16 = tpu.matmul %14, %15, %cst_9 {dimension_numbers = #tpu.dot_dimension_numbers<[1], [0], [0], [1], [0, 0, 1, 1], [], []>} : vector<128x32xbf16>, vector<32x32xbf16>, vector<128x32xf32> -> vector<128x32xf32>
    %c0_10 = arith.constant 0 : index
    %c0_11 = arith.constant 0 : index
    %17 = vector.load %arg6[%c0_10, %c0_11] : memref<1x32xf32, #tpu.memory_space<vmem>>, vector<1x32xf32>
    %18 = vector.broadcast %17 : vector<1x32xf32> to vector<128x32xf32>
    %19 = arith.addf %16, %18 : vector<128x32xf32>
    %cst_12 = arith.constant 0.000000e+00 : f32
    %20 = vector.broadcast %cst_12 : f32 to vector<128x32xf32>
    %21 = arith.subf %20, %19 : vector<128x32xf32>
    %22 = math.exp %21 : vector<128x32xf32>
    %cst_13 = arith.constant 1.000000e+00 : f32
    %23 = vector.broadcast %cst_13 : f32 to vector<128x32xf32>
    %24 = arith.addf %23, %22 : vector<128x32xf32>
    %25 = tpu.reciprocal %24 {approx = true} : vector<128x32xf32> -> vector<128x32xf32>
    %26 = arith.mulf %19, %25 : vector<128x32xf32>
    %27 = arith.truncf %26 : vector<128x32xf32> to vector<128x32xbf16>
    %c0_14 = arith.constant 0 : index
    %c0_15 = arith.constant 0 : index
    %28 = vector.load %arg7[%c0_14, %c0_15] : memref<32x192xbf16, #tpu.memory_space<vmem>>, vector<32x192xbf16>
    %cst_16 = arith.constant dense<0.000000e+00> : vector<128x192xf32>
    %29 = tpu.matmul %27, %28, %cst_16 {dimension_numbers = #tpu.dot_dimension_numbers<[1], [0], [0], [1], [0, 0, 1, 1], [], []>} : vector<128x32xbf16>, vector<32x192xbf16>, vector<128x192xf32> -> vector<128x192xf32>
    %c0_17 = arith.constant 0 : index
    %c0_18 = arith.constant 0 : index
    %30 = vector.load %arg8[%c0_17, %c0_18] : memref<1x192xf32, #tpu.memory_space<vmem>>, vector<1x192xf32>
    %31 = vector.broadcast %30 : vector<1x192xf32> to vector<128x192xf32>
    %32 = arith.addf %29, %31 : vector<128x192xf32>
    %33 = vector.extract_strided_slice %32 {offsets = [0, 0], sizes = [128, 64], strides = [1, 1]} : vector<128x192xf32> to vector<128x64xf32>
    %34 = vector.extract_strided_slice %32 {offsets = [0, 64], sizes = [128, 64], strides = [1, 1]} : vector<128x192xf32> to vector<128x64xf32>
    %35 = vector.extract_strided_slice %32 {offsets = [0, 128], sizes = [128, 64], strides = [1, 1]} : vector<128x192xf32> to vector<128x64xf32>
    %c0_19 = arith.constant 0 : index
    %c0_20 = arith.constant 0 : index
    %36 = vector.load %arg1[%c0_19, %c0_20] : memref<128x32xf32, #tpu.memory_space<vmem>>, vector<128x32xf32>
    %37 = arith.truncf %36 : vector<128x32xf32> to vector<128x32xbf16>
    %c0_21 = arith.constant 0 : index
    %c0_22 = arith.constant 0 : index
    %38 = vector.load %arg9[%c0_21, %c0_22] : memref<32x192xbf16, #tpu.memory_space<vmem>>, vector<32x192xbf16>
    %cst_23 = arith.constant dense<0.000000e+00> : vector<128x192xf32>
    %39 = tpu.matmul %37, %38, %cst_23 {dimension_numbers = #tpu.dot_dimension_numbers<[1], [0], [0], [1], [0, 0, 1, 1], [], []>} : vector<128x32xbf16>, vector<32x192xbf16>, vector<128x192xf32> -> vector<128x192xf32>
    %40 = vector.extract_strided_slice %39 {offsets = [0, 0], sizes = [128, 64], strides = [1, 1]} : vector<128x192xf32> to vector<128x64xf32>
    %41 = vector.extract_strided_slice %39 {offsets = [0, 64], sizes = [128, 64], strides = [1, 1]} : vector<128x192xf32> to vector<128x64xf32>
    %42 = vector.extract_strided_slice %39 {offsets = [0, 128], sizes = [128, 64], strides = [1, 1]} : vector<128x192xf32> to vector<128x64xf32>
    %c0_24 = arith.constant 0 : index
    %c0_25 = arith.constant 0 : index
    %43 = vector.load %arg10[%c0_24, %c0_25] : memref<1x64xf32, #tpu.memory_space<vmem>>, vector<1x64xf32>
    %44 = vector.broadcast %43 : vector<1x64xf32> to vector<128x64xf32>
    %45 = arith.addf %40, %44 : vector<128x64xf32>
    %cst_26 = arith.constant 1.000000e+00 : f32
    %46 = vector.broadcast %cst_26 : f32 to vector<128x64xf32>
    %47 = arith.addf %46, %33 : vector<128x64xf32>
    %48 = arith.mulf %45, %47 : vector<128x64xf32>
    %cst_27 = arith.constant dense<0.000000e+00> : vector<128xf32>
    %49 = vector.multi_reduction <add>, %48, %cst_27 [1] : vector<128x64xf32> to vector<128xf32>
    %50 = vector.shape_cast %49 : vector<128xf32> to vector<128x1xf32>
    %cst_28 = arith.constant 1.562500e-02 : f32
    %51 = vector.broadcast %cst_28 : f32 to vector<128x1xf32>
    %52 = arith.mulf %50, %51 : vector<128x1xf32>
    %53 = arith.mulf %48, %48 : vector<128x64xf32>
    %cst_29 = arith.constant dense<0.000000e+00> : vector<128xf32>
    %54 = vector.multi_reduction <add>, %53, %cst_29 [1] : vector<128x64xf32> to vector<128xf32>
    %55 = vector.shape_cast %54 : vector<128xf32> to vector<128x1xf32>
    %cst_30 = arith.constant 1.562500e-02 : f32
    %56 = vector.broadcast %cst_30 : f32 to vector<128x1xf32>
    %57 = arith.mulf %55, %56 : vector<128x1xf32>
    %58 = arith.mulf %52, %52 : vector<128x1xf32>
    %59 = arith.subf %57, %58 : vector<128x1xf32>
    %60 = vector.broadcast %52 : vector<128x1xf32> to vector<128x64xf32>
    %61 = arith.subf %48, %60 : vector<128x64xf32>
    %cst_31 = arith.constant 9.99999974E-6 : f32
    %62 = vector.broadcast %cst_31 : f32 to vector<128x1xf32>
    %63 = arith.addf %59, %62 : vector<128x1xf32>
    %64 = math.rsqrt %63 : vector<128x1xf32>
    %65 = vector.broadcast %64 : vector<128x1xf32> to vector<128x64xf32>
    %66 = arith.mulf %61, %65 : vector<128x64xf32>
    %c0_32 = arith.constant 0 : index
    %c0_33 = arith.constant 0 : index
    %67 = vector.load %arg11[%c0_32, %c0_33] : memref<1x64xf32, #tpu.memory_space<vmem>>, vector<1x64xf32>
    %68 = vector.broadcast %67 : vector<1x64xf32> to vector<128x64xf32>
    %69 = arith.mulf %66, %68 : vector<128x64xf32>
    %c0_34 = arith.constant 0 : index
    %c0_35 = arith.constant 0 : index
    %70 = vector.load %arg12[%c0_34, %c0_35] : memref<1x64xf32, #tpu.memory_space<vmem>>, vector<1x64xf32>
    %71 = vector.broadcast %70 : vector<1x64xf32> to vector<128x64xf32>
    %72 = arith.addf %69, %71 : vector<128x64xf32>
    %cst_36 = arith.constant 0.000000e+00 : f32
    %73 = vector.broadcast %cst_36 : f32 to vector<128x64xf32>
    %74 = arith.subf %73, %72 : vector<128x64xf32>
    %75 = math.exp %74 : vector<128x64xf32>
    %cst_37 = arith.constant 1.000000e+00 : f32
    %76 = vector.broadcast %cst_37 : f32 to vector<128x64xf32>
    %77 = arith.addf %76, %75 : vector<128x64xf32>
    %78 = tpu.reciprocal %77 {approx = true} : vector<128x64xf32> -> vector<128x64xf32>
    %79 = arith.mulf %72, %78 : vector<128x64xf32>
    %80 = arith.truncf %79 : vector<128x64xf32> to vector<128x64xbf16>
    %c0_38 = arith.constant 0 : index
    %c0_39 = arith.constant 0 : index
    %81 = vector.load %arg13[%c0_38, %c0_39] : memref<64x64xbf16, #tpu.memory_space<vmem>>, vector<64x64xbf16>
    %cst_40 = arith.constant dense<0.000000e+00> : vector<128x64xf32>
    %82 = tpu.matmul %80, %81, %cst_40 {dimension_numbers = #tpu.dot_dimension_numbers<[1], [0], [0], [1], [0, 0, 1, 1], [], []>} : vector<128x64xbf16>, vector<64x64xbf16>, vector<128x64xf32> -> vector<128x64xf32>
    %83 = arith.addf %82, %41 : vector<128x64xf32>
    %c0_41 = arith.constant 0 : index
    %c0_42 = arith.constant 0 : index
    %84 = vector.load %arg14[%c0_41, %c0_42] : memref<1x64xf32, #tpu.memory_space<vmem>>, vector<1x64xf32>
    %85 = vector.broadcast %84 : vector<1x64xf32> to vector<128x64xf32>
    %86 = arith.addf %83, %85 : vector<128x64xf32>
    %cst_43 = arith.constant 1.000000e+00 : f32
    %87 = vector.broadcast %cst_43 : f32 to vector<128x64xf32>
    %88 = arith.addf %87, %34 : vector<128x64xf32>
    %89 = arith.mulf %86, %88 : vector<128x64xf32>
    %cst_44 = arith.constant dense<0.000000e+00> : vector<128xf32>
    %90 = vector.multi_reduction <add>, %89, %cst_44 [1] : vector<128x64xf32> to vector<128xf32>
    %91 = vector.shape_cast %90 : vector<128xf32> to vector<128x1xf32>
    %cst_45 = arith.constant 1.562500e-02 : f32
    %92 = vector.broadcast %cst_45 : f32 to vector<128x1xf32>
    %93 = arith.mulf %91, %92 : vector<128x1xf32>
    %94 = arith.mulf %89, %89 : vector<128x64xf32>
    %cst_46 = arith.constant dense<0.000000e+00> : vector<128xf32>
    %95 = vector.multi_reduction <add>, %94, %cst_46 [1] : vector<128x64xf32> to vector<128xf32>
    %96 = vector.shape_cast %95 : vector<128xf32> to vector<128x1xf32>
    %cst_47 = arith.constant 1.562500e-02 : f32
    %97 = vector.broadcast %cst_47 : f32 to vector<128x1xf32>
    %98 = arith.mulf %96, %97 : vector<128x1xf32>
    %99 = arith.mulf %93, %93 : vector<128x1xf32>
    %100 = arith.subf %98, %99 : vector<128x1xf32>
    %101 = vector.broadcast %93 : vector<128x1xf32> to vector<128x64xf32>
    %102 = arith.subf %89, %101 : vector<128x64xf32>
    %cst_48 = arith.constant 9.99999974E-6 : f32
    %103 = vector.broadcast %cst_48 : f32 to vector<128x1xf32>
    %104 = arith.addf %100, %103 : vector<128x1xf32>
    %105 = math.rsqrt %104 : vector<128x1xf32>
    %106 = vector.broadcast %105 : vector<128x1xf32> to vector<128x64xf32>
    %107 = arith.mulf %102, %106 : vector<128x64xf32>
    %c0_49 = arith.constant 0 : index
    %c0_50 = arith.constant 0 : index
    %108 = vector.load %arg15[%c0_49, %c0_50] : memref<1x64xf32, #tpu.memory_space<vmem>>, vector<1x64xf32>
    %109 = vector.broadcast %108 : vector<1x64xf32> to vector<128x64xf32>
    %110 = arith.mulf %107, %109 : vector<128x64xf32>
    %c0_51 = arith.constant 0 : index
    %c0_52 = arith.constant 0 : index
    %111 = vector.load %arg16[%c0_51, %c0_52] : memref<1x64xf32, #tpu.memory_space<vmem>>, vector<1x64xf32>
    %112 = vector.broadcast %111 : vector<1x64xf32> to vector<128x64xf32>
    %113 = arith.addf %110, %112 : vector<128x64xf32>
    %cst_53 = arith.constant 0.000000e+00 : f32
    %114 = vector.broadcast %cst_53 : f32 to vector<128x64xf32>
    %115 = arith.subf %114, %113 : vector<128x64xf32>
    %116 = math.exp %115 : vector<128x64xf32>
    %cst_54 = arith.constant 1.000000e+00 : f32
    %117 = vector.broadcast %cst_54 : f32 to vector<128x64xf32>
    %118 = arith.addf %117, %116 : vector<128x64xf32>
    %119 = tpu.reciprocal %118 {approx = true} : vector<128x64xf32> -> vector<128x64xf32>
    %120 = arith.mulf %113, %119 : vector<128x64xf32>
    %121 = arith.truncf %120 : vector<128x64xf32> to vector<128x64xbf16>
    %c0_55 = arith.constant 0 : index
    %c0_56 = arith.constant 0 : index
    %122 = vector.load %arg17[%c0_55, %c0_56] : memref<64x64xbf16, #tpu.memory_space<vmem>>, vector<64x64xbf16>
    %cst_57 = arith.constant dense<0.000000e+00> : vector<128x64xf32>
    %123 = tpu.matmul %121, %122, %cst_57 {dimension_numbers = #tpu.dot_dimension_numbers<[1], [0], [0], [1], [0, 0, 1, 1], [], []>} : vector<128x64xbf16>, vector<64x64xbf16>, vector<128x64xf32> -> vector<128x64xf32>
    %124 = arith.addf %123, %42 : vector<128x64xf32>
    %c0_58 = arith.constant 0 : index
    %c0_59 = arith.constant 0 : index
    %125 = vector.load %arg18[%c0_58, %c0_59] : memref<1x64xf32, #tpu.memory_space<vmem>>, vector<1x64xf32>
    %126 = vector.broadcast %125 : vector<1x64xf32> to vector<128x64xf32>
    %127 = arith.addf %124, %126 : vector<128x64xf32>
    %cst_60 = arith.constant 1.000000e+00 : f32
    %128 = vector.broadcast %cst_60 : f32 to vector<128x64xf32>
    %129 = arith.addf %128, %35 : vector<128x64xf32>
    %130 = arith.mulf %127, %129 : vector<128x64xf32>
    %cst_61 = arith.constant dense<0.000000e+00> : vector<128xf32>
    %131 = vector.multi_reduction <add>, %130, %cst_61 [1] : vector<128x64xf32> to vector<128xf32>
    %132 = vector.shape_cast %131 : vector<128xf32> to vector<128x1xf32>
    %cst_62 = arith.constant 1.562500e-02 : f32
    %133 = vector.broadcast %cst_62 : f32 to vector<128x1xf32>
    %134 = arith.mulf %132, %133 : vector<128x1xf32>
    %135 = arith.mulf %130, %130 : vector<128x64xf32>
    %cst_63 = arith.constant dense<0.000000e+00> : vector<128xf32>
    %136 = vector.multi_reduction <add>, %135, %cst_63 [1] : vector<128x64xf32> to vector<128xf32>
    %137 = vector.shape_cast %136 : vector<128xf32> to vector<128x1xf32>
    %cst_64 = arith.constant 1.562500e-02 : f32
    %138 = vector.broadcast %cst_64 : f32 to vector<128x1xf32>
    %139 = arith.mulf %137, %138 : vector<128x1xf32>
    %140 = arith.mulf %134, %134 : vector<128x1xf32>
    %141 = arith.subf %139, %140 : vector<128x1xf32>
    %142 = vector.broadcast %134 : vector<128x1xf32> to vector<128x64xf32>
    %143 = arith.subf %130, %142 : vector<128x64xf32>
    %cst_65 = arith.constant 9.99999974E-6 : f32
    %144 = vector.broadcast %cst_65 : f32 to vector<128x1xf32>
    %145 = arith.addf %141, %144 : vector<128x1xf32>
    %146 = math.rsqrt %145 : vector<128x1xf32>
    %147 = vector.broadcast %146 : vector<128x1xf32> to vector<128x64xf32>
    %148 = arith.mulf %143, %147 : vector<128x64xf32>
    %c0_66 = arith.constant 0 : index
    %c0_67 = arith.constant 0 : index
    %149 = vector.load %arg19[%c0_66, %c0_67] : memref<1x64xf32, #tpu.memory_space<vmem>>, vector<1x64xf32>
    %150 = vector.broadcast %149 : vector<1x64xf32> to vector<128x64xf32>
    %151 = arith.mulf %148, %150 : vector<128x64xf32>
    %c0_68 = arith.constant 0 : index
    %c0_69 = arith.constant 0 : index
    %152 = vector.load %arg20[%c0_68, %c0_69] : memref<1x64xf32, #tpu.memory_space<vmem>>, vector<1x64xf32>
    %153 = vector.broadcast %152 : vector<1x64xf32> to vector<128x64xf32>
    %154 = arith.addf %151, %153 : vector<128x64xf32>
    %cst_70 = arith.constant 0.000000e+00 : f32
    %155 = vector.broadcast %cst_70 : f32 to vector<128x64xf32>
    %156 = arith.subf %155, %154 : vector<128x64xf32>
    %157 = math.exp %156 : vector<128x64xf32>
    %cst_71 = arith.constant 1.000000e+00 : f32
    %158 = vector.broadcast %cst_71 : f32 to vector<128x64xf32>
    %159 = arith.addf %158, %157 : vector<128x64xf32>
    %160 = tpu.reciprocal %159 {approx = true} : vector<128x64xf32> -> vector<128x64xf32>
    %161 = arith.mulf %154, %160 : vector<128x64xf32>
    %162 = arith.truncf %161 : vector<128x64xf32> to vector<128x64xbf16>
    %c0_72 = arith.constant 0 : index
    %c0_73 = arith.constant 0 : index
    %163 = vector.load %arg21[%c0_72, %c0_73] : memref<64x32xbf16, #tpu.memory_space<vmem>>, vector<64x32xbf16>
    %cst_74 = arith.constant dense<0.000000e+00> : vector<128x32xf32>
    %164 = tpu.matmul %162, %163, %cst_74 {dimension_numbers = #tpu.dot_dimension_numbers<[1], [0], [0], [1], [0, 0, 1, 1], [], []>} : vector<128x64xbf16>, vector<64x32xbf16>, vector<128x32xf32> -> vector<128x32xf32>
    %c0_75 = arith.constant 0 : index
    %c0_76 = arith.constant 0 : index
    %165 = vector.load %arg22[%c0_75, %c0_76] : memref<1x32xf32, #tpu.memory_space<vmem>>, vector<1x32xf32>
    %166 = vector.broadcast %165 : vector<1x32xf32> to vector<128x32xf32>
    %167 = arith.addf %164, %166 : vector<128x32xf32>
    %c0_77 = arith.constant 0 : index
    %c0_78 = arith.constant 0 : index
    %168 = vector.load %arg23[%c0_77, %c0_78] : memref<128x32xf32, #tpu.memory_space<vmem>>, vector<128x32xf32>
    tpu.vector_store %arg23[%c0_77, %c0_78], %167 {strides = array<i32>} : memref<128x32xf32, #tpu.memory_space<vmem>>, vector<128x32xf32>,
    return
  }
  func.func @transform_0(%arg0: i32) -> (i32, i32) {
    %c0_i32 = arith.constant 0 : i32
    %c0_i32_0 = arith.constant 0 : i32
    return %arg0, %c0_i32 : i32, i32
  }
  func.func @transform_1(%arg0: i32) -> (i32, i32) {
    %c0_i32 = arith.constant 0 : i32
    %c0_i32_0 = arith.constant 0 : i32
    return %arg0, %c0_i32 : i32, i32
  }
  func.func @transform_2(%arg0: i32) -> (i32, i32) {
    %c0_i32 = arith.constant 0 : i32
    %c0_i32_0 = arith.constant 0 : i32
    %c0_i32_1 = arith.constant 0 : i32
    return %c0_i32, %c0_i32_0 : i32, i32
  }
  func.func @transform_3(%arg0: i32) -> (i32, i32) {
    %c0_i32 = arith.constant 0 : i32
    %c0_i32_0 = arith.constant 0 : i32
    %c0_i32_1 = arith.constant 0 : i32
    return %c0_i32, %c0_i32_0 : i32, i32
  }
  func.func @transform_4(%arg0: i32) -> (i32, i32) {
    %c0_i32 = arith.constant 0 : i32
    %c0_i32_0 = arith.constant 0 : i32
    %c0_i32_1 = arith.constant 0 : i32
    return %c0_i32, %c0_i32_0 : i32, i32
  }
  func.func @transform_5(%arg0: i32) -> (i32, i32) {
    %c0_i32 = arith.constant 0 : i32
    %c0_i32_0 = arith.constant 0 : i32
    %c0_i32_1 = arith.constant 0 : i32
    return %c0_i32, %c0_i32_0 : i32, i32
  }
  func.func @transform_6(%arg0: i32) -> (i32, i32) {
    %c0_i32 = arith.constant 0 : i32
    %c0_i32_0 = arith.constant 0 : i32
    %c0_i32_1 = arith.constant 0 : i32
    return %c0_i32, %c0_i32_0 : i32, i32
  }
  func.func @transform_7(%arg0: i32) -> (i32, i32) {
    %c0_i32 = arith.constant 0 : i32
    %c0_i32_0 = arith.constant 0 : i32
    %c0_i32_1 = arith.constant 0 : i32
    return %c0_i32, %c0_i32_0 : i32, i32
  }
  func.func @transform_8(%arg0: i32) -> (i32, i32) {
    %c0_i32 = arith.constant 0 : i32
    %c0_i32_0 = arith.constant 0 : i32
    %c0_i32_1 = arith.constant 0 : i32
    return %c0_i32, %c0_i32_0 : i32, i32
  }
  func.func @transform_9(%arg0: i32) -> (i32, i32) {
    %c0_i32 = arith.constant 0 : i32
    %c0_i32_0 = arith.constant 0 : i32
    %c0_i32_1 = arith.constant 0 : i32
    return %c0_i32, %c0_i32_0 : i32, i32
  }
  func.func @transform_10(%arg0: i32) -> (i32, i32) {
    %c0_i32 = arith.constant 0 : i32
    %c0_i32_0 = arith.constant 0 : i32
    %c0_i32_1 = arith.constant 0 : i32
    return %c0_i32, %c0_i32_0 : i32, i32
  }
  func.func @transform_11(%arg0: i32) -> (i32, i32) {
    %c0_i32 = arith.constant 0 : i32
    %c0_i32_0 = arith.constant 0 : i32
    %c0_i32_1 = arith.constant 0 : i32
    return %c0_i32, %c0_i32_0 : i32, i32
  }
  func.func @transform_12(%arg0: i32) -> (i32, i32) {
    %c0_i32 = arith.constant 0 : i32
    %c0_i32_0 = arith.constant 0 : i32
    %c0_i32_1 = arith.constant 0 : i32
    return %c0_i32, %c0_i32_0 : i32, i32
  }
  func.func @transform_13(%arg0: i32) -> (i32, i32) {
    %c0_i32 = arith.constant 0 : i32
    %c0_i32_0 = arith.constant 0 : i32
    %c0_i32_1 = arith.constant 0 : i32
    return %c0_i32, %c0_i32_0 : i32, i32
  }
  func.func @transform_14(%arg0: i32) -> (i32, i32) {
    %c0_i32 = arith.constant 0 : i32
    %c0_i32_0 = arith.constant 0 : i32
    %c0_i32_1 = arith.constant 0 : i32
    return %c0_i32, %c0_i32_0 : i32, i32
  }
  func.func @transform_15(%arg0: i32) -> (i32, i32) {
    %c0_i32 = arith.constant 0 : i32
    %c0_i32_0 = arith.constant 0 : i32
    %c0_i32_1 = arith.constant 0 : i32
    return %c0_i32, %c0_i32_0 : i32, i32
  }
  func.func @transform_16(%arg0: i32) -> (i32, i32) {
    %c0_i32 = arith.constant 0 : i32
    %c0_i32_0 = arith.constant 0 : i32
    %c0_i32_1 = arith.constant 0 : i32
    return %c0_i32, %c0_i32_0 : i32, i32
  }
  func.func @transform_17(%arg0: i32) -> (i32, i32) {
    %c0_i32 = arith.constant 0 : i32
    %c0_i32_0 = arith.constant 0 : i32
    %c0_i32_1 = arith.constant 0 : i32
    return %c0_i32, %c0_i32_0 : i32, i32
  }
  func.func @transform_18(%arg0: i32) -> (i32, i32) {
    %c0_i32 = arith.constant 0 : i32
    %c0_i32_0 = arith.constant 0 : i32
    %c0_i32_1 = arith.constant 0 : i32
    return %c0_i32, %c0_i32_0 : i32, i32
  }
  func.func @transform_19(%arg0: i32) -> (i32, i32) {
    %c0_i32 = arith.constant 0 : i32
    %c0_i32_0 = arith.constant 0 : i32
    %c0_i32_1 = arith.constant 0 : i32
    return %c0_i32, %c0_i32_0 : i32, i32
  }
  func.func @transform_20(%arg0: i32) -> (i32, i32) {
    %c0_i32 = arith.constant 0 : i32
    %c0_i32_0 = arith.constant 0 : i32
    %c0_i32_1 = arith.constant 0 : i32
    return %c0_i32, %c0_i32_0 : i32, i32
  }
  func.func @transform_21(%arg0: i32) -> (i32, i32) {
    %c0_i32 = arith.constant 0 : i32
    %c0_i32_0 = arith.constant 0 : i32
    %c0_i32_1 = arith.constant 0 : i32
    return %c0_i32, %c0_i32_0 : i32, i32
  }
  func.func @transform_22(%arg0: i32) -> (i32, i32) {
    %c0_i32 = arith.constant 0 : i32
    %c0_i32_0 = arith.constant 0 : i32
    return %arg0, %c0_i32 : i32, i32
  }
}

</mosaic_0001>

<bundles_post_ra>
// kernel: tpu_custom_call.1
= control target key start
LH: loop header
LB: loop body
LE: loop exit
PB: predicated region body
PF: predicated region fallthrough
CT: control target
= control target key end

     0   :  { %s6063_s0 = inlined_call_operand.vmem [shape: f32[256,32], index: 0, kind: input, shape index: {}]   ;;  %s6064_s1 = inlined_call_operand.vmem [shape: f32[256,16], index: 1, kind: input, shape index: {}]   ;;  %s6065_s2 = inlined_call_operand.vmem [shape: bf16[16,32], index: 2, kind: input, shape index: {}]   ;;  %s6066_s3 = inlined_call_operand.vmem [shape: f32[1,32], index: 3, kind: input, shape index: {}]   ;;  %s6067_s4 = inlined_call_operand.vmem [shape: bf16[32,32], index: 4, kind: input, shape index: {}]   ;;  %s6068_s5 = inlined_call_operand.vmem [shape: f32[1,32], index: 5, kind: input, shape index: {}]   ;;  %s6069_s6 = inlined_call_operand.vmem [shape: bf16[32,192], index: 6, kind: input, shape index: {}]   ;;  %s6070_s7 = inlined_call_operand.vmem [shape: f32[1,192], index: 7, kind: input, shape index: {}]   ;;  %s6071_s8 = inlined_call_operand.vmem [shape: bf16[32,192], index: 8, kind: input, shape index: {}]   ;;  %s6072_s9 = inlined_call_operand.vmem [shape: f32[1,64], index: 9, kind: input, shape index: {}]   ;;  %s6073_s10 = inlined_call_operand.vmem [shape: f32[1,64], index: 10, kind: input, shape index: {}]   ;;  %s6074_s11 = inlined_call_operand.vmem [shape: f32[1,64], index: 11, kind: input, shape index: {}]   ;;  %s6075_s12 = inlined_call_operand.vmem [shape: bf16[64,64], index: 12, kind: input, shape index: {}]   ;;  %s6076_s13 = inlined_call_operand.vmem [shape: f32[1,64], index: 13, kind: input, shape index: {}]   ;;  %s6077_s14 = inlined_call_operand.vmem [shape: f32[1,64], index: 14, kind: input, shape index: {}]   ;;  %s6078_s15 = inlined_call_operand.vmem [shape: f32[1,64], index: 15, kind: input, shape index: {}]   ;;  %s6079_s16 = inlined_call_operand.vmem [shape: bf16[64,64], index: 16, kind: input, shape index: {}]   ;;  %s6080_s17 = inlined_call_operand.vmem [shape: f32[1,64], index: 17, kind: input, shape index: {}]   ;;  %s6081_s18 = inlined_call_operand.vmem [shape: f32[1,64], index: 18, kind: input, shape index: {}]   ;;  %s6082_s19 = inlined_call_operand.vmem [shape: f32[1,64], index: 19, kind: input, shape index: {}]   ;;  %s6083_s20 = inlined_call_operand.vmem [shape: bf16[64,32], index: 20, kind: input, shape index: {}]   ;;  %s6084_s21 = inlined_call_operand.vmem [shape: f32[1,32], index: 21, kind: input, shape index: {}]   ;;  %s6085_s22 = inlined_call_operand.vmem [shape: f32[256,32], index: 22, kind: output, shape index: {}]  }
   0x1   :  { %6088 = sst [smem:[#allocation29_spill]] %s6063_s0 }
   0x2   :  { %6089 = sst [smem:[#allocation30_spill]] %s6064_s1 }
   0x3   :  { %6090 = sst [smem:[#allocation31_spill]] %s6065_s2 }
   0x4   :  { %6091 = sst [smem:[#allocation32_spill]] %s6066_s3  ;;  %s4430_s3 = smov 0  }
   0x5   :  { %6092 = sst [smem:[#allocation33_spill]] %s6067_s4 }
   0x6   :  { %6093 = sst [smem:[#allocation34_spill]] %s6068_s5 }
   0x7   :  { %6094 = sst [smem:[#allocation35_spill]] %s6069_s6 }
   0x8 LB: > { %s3580_s28 = sadd.s32 4294967295, %s4311_s3   ;;  %p3584_p0 = scmp.ge.s32.totalorder %s4311_s3, 1  ;;  %s4311_s3 = sphi %s4430_s3, %s32_s3  }
   0x9   : > { %p624_p1 = scmp.lt.s32.totalorder %s4311_s3, 3 }
   0xb   : > { %p625_p2 = pnand %p3584_p0, %p624_p1 }
   0xd   : > { %628 = sbr.rel (%p625_p2) target bundleno = 2098 (0x832), region = 108 }
  0x14   : > { %s6095_s4 = sld [smem:[#allocation31_spill]]  ;;  %s3585_s0 = sshll.u32 %s3580_s28, 4  ;;  %vm749_vm0 = vcmask 130048   ;;  %vm998_vm1 = vcmask 261120   ;;  %vm1637_vm2 = vcmask 523264  }
  0x15   : > { %p692_p3 = scmp.lt.s32.totalorder %s3585_s0, 31  ;;  %s6096_s24 = sld [smem:[#allocation30_spill]] }
  0x16   : > { %s6097_s2 = sld [smem:[#allocation33_spill]]  ;;  %s6099_s26 = sld [smem:[#allocation35_spill]] }
  0x17   : > { %s6157_s0 = smov (!%p692_p3, %s3585_s0), 31  ;;  %s6101_s1 = sld [smem:[#allocation34_spill]] }
  0x18   : > { %s4441_s23 = sshll.u32 %s6157_s0, 3  ;;  %s4314_s5 = smov 64  }
  0x19   : > { %s6026_s29 = scalar_lea.vmem %s6085_s22, %s4441_s23 }
  0x1a   : > { %v3861_v0 = vld [vmem:[%s6095_s4] sm:$0xff]   ;;  %s6098_s4 = sld [smem:[#allocation32_spill]] }
  0x1b   : > { %3739 = vmatprep.subr.bf16.mxu0 %v3861_v0  ;;  %3849 = vmatprep.subr.bf16.mxu1 %v3861_v0  ;;  %s701_s6 = scalar_lea.vmem %s6096_s24, %s4441_s23 }
  0x1c   : > { %3740 = vmatpush3.bf16.msra.mxu0 %v3861_v0  ;;  %3850 = vmatpush3.bf16.msra.mxu1 %v3861_v0  ;;  %v710_v1 = vld [vmem:[%s701_s6] sm:$0xff]  ;;  %v711_v2 = vld [vmem:[%s701_s6 + $0x8] sm:$0xff]  ;;  %v712_v3 = vld [vmem:[%s701_s6 + $0x10] sm:$0xff] }
  0x1d   : > { %v726_v4 = vpack.c.bf16 %v711_v2, %v710_v1  ;;  %v713_v5 = vld [vmem:[%s701_s6 + $0x18] sm:$0xff]  ;;  %v718_v6 = vld [vmem:[%s701_s6 + $0x40] sm:$0xff]  ;;  %v719_v7 = vld [vmem:[%s701_s6 + $0x48] sm:$0xff] }
  0x1e   : > { %v727_v8 = vpack.c.bf16 %v713_v5, %v712_v3  ;;  %v730_v9 = vpack.c.bf16 %v719_v7, %v718_v6  ;;  %v720_v10 = vld [vmem:[%s701_s6 + $0x50] sm:$0xff]  ;;  %v721_v11 = vld [vmem:[%s701_s6 + $0x58] sm:$0xff]  ;;  %v714_v12 = vld [vmem:[%s701_s6 + $0x20] sm:$0xff] }
  0x1f   : > { %3741 = vmatprep.mubr.msk.bf16.mxu0 %vm749_vm0, %v726_v4  ;;  %v731_v13 = vpack.c.bf16 %v721_v11, %v720_v10  ;;  %v715_v14 = vld [vmem:[%s701_s6 + $0x28] sm:$0xff]  ;;  %v716_v15 = vld [vmem:[%s701_s6 + $0x30] sm:$0xff]  ;;  %v717_v16 = vld [vmem:[%s701_s6 + $0x38] sm:$0xff] }
  0x20   : > { %3742 = vmatmul.mubr.msk.bf16.vlgmr.msra.gmra.mrb[0].mxu0 %vm749_vm0, %v727_v8  ;;  %3749 = vmatprep.mubr.msk.bf16.mxu1 %vm749_vm0, %v730_v9  ;;  %v728_v17 = vpack.c.bf16 %v715_v14, %v714_v12  ;;  %v722_v18 = vld [vmem:[%s701_s6 + $0x60] sm:$0xff]  ;;  %v723_v19 = vld [vmem:[%s701_s6 + $0x68] sm:$0xff]  ;;  %v724_v20 = vld [vmem:[%s701_s6 + $0x70] sm:$0xff]  ;;  %v729_v23 = vpack.c.bf16 %v717_v16, %v716_v15 }
  0x21   : > { %3750 = vmatmul.mubr.msk.bf16.vlgmr.msra.gmra.mrb[0].mxu1 %vm749_vm0, %v731_v13  ;;  %v732_v21 = vpack.c.bf16 %v723_v19, %v722_v18  ;;  %v725_v22 = vld [vmem:[%s701_s6 + $0x78] sm:$0xff]  ;;  %v3862_v25 = vld [vmem:[%s6097_s2] sm:$0xff]   ;;  %v3863_v26 = vld [vmem:[%s6097_s2 + $0x8] sm:$0xff]  }
  0x22   : > { %3745 = vmatprep.mubr.msk.bf16.mxu0 %vm749_vm0, %v728_v17  ;;  %v733_v24 = vpack.c.bf16 %v725_v22, %v724_v20  ;;  %3757 = vmatprep.subr.bf16.mxu1 %v3862_v25  ;;  %v4464_v27 = vld [vmem:[%s6098_s4] ss:$0 sm:$0xff]  ;;  %s6100_s4 = sld [smem:[#allocation29_spill]] }
  0x23   : > { %3753 = vmatprep.mubr.msk.bf16.mxu1 %vm749_vm0, %v732_v21  ;;  %3758 = vmatpush3.bf16.msra.mxu1 %v3862_v25 }
  0x24   : > { %3759 = vmatprep.subr.bf16.mxu1 %v3863_v26 }
  0x27   : > { %3760 = vmatpush3.bf16.msra.mxu1 %v3863_v26 }
  0x28   : > { %3746 = vmatmul.mubr.msk.bf16.gmra.mrb[4].mxu0 %vm749_vm0, %v729_v23  ;;  %s4570_s0 = scalar_lea.vmem %s6100_s4, %s4441_s23 }
  0x29   : > { %3754 = vmatmul.mubr.msk.bf16.gmra.mrb[4].mxu1 %vm749_vm0, %v733_v24 }
  0xf3   : > { %v3743_v28 = vpop.f32.mrb[0].mxu0 }
  0xf4   : > { %v4467_v29 = vadd.f32 %v3743_v28, %v4464_v27  ;;  %v808_v30 = vpop.f32.mrb[1].mxu0  ;;  %v3751_v31 = vpop.f32.mrb[0].mxu1 }
  0xf5   : > { %v4470_v32 = vadd.f32 %v4464_v27, %v808_v30  ;;  %v3744_v33 = vpop.f32.mrb[2].mxu0  ;;  %v4473_v34 = vadd.f32 %v3751_v31, %v4464_v27  ;;  %v840_v35 = vpop.f32.mrb[1].mxu1 }
  0xf6   : > { %v873_v36 = vsub.f32 0.0, %v4467_v29  ;;  %v4477_v37 = vadd.f32 %v3744_v33, %v4464_v27  ;;  %v811_v38 = vpop.f32.mrb[3].mxu0  ;;  %v4480_v39 = vadd.f32 %v4464_v27, %v840_v35  ;;  %v3752_v40 = vpop.f32.mrb[2].mxu1 }
  0xf7   : > { %v871_v41 = vsub.f32 0.0, %v4470_v32  ;;  %v4484_v42 = vadd.f32 %v4464_v27, %v811_v38  ;;  %v881_v43 = vsub.f32 0.0, %v4473_v34  ;;  %v4488_v44 = vadd.f32 %v3752_v40, %v4464_v27  ;;  %v843_v45 = vpop.f32.mrb[3].mxu1 }
  0xf8   : > { %v891_v46 = vmul.f32 1.442695, %v873_v36  ;;  %v874_v47 = vsub.f32 0.0, %v4477_v37  ;;  %v879_v48 = vsub.f32 0.0, %v4480_v39  ;;  %v4493_v49 = vadd.f32 %v4464_v27, %v843_v45 }
  0xf9   : > { %v887_v50 = vmul.f32 1.442695, %v871_v41  ;;  %v872_v51 = vsub.f32 0.0, %v4484_v42  ;;  %v882_v52 = vsub.f32 0.0, %v4488_v44  ;;  %v907_v54 = vmul.f32 1.442695, %v881_v43 }
  0xfa   : > { %3888 = vpow2.f32 %v891_v46  ;;  %v893_v53 = vmul.f32 1.442695, %v874_v47  ;;  %v880_v55 = vsub.f32 0.0, %v4493_v49  ;;  %v903_v57 = vmul.f32 1.442695, %v879_v48 }
  0xfb   : > { %3890 = vpow2.f32 %v887_v50  ;;  %v889_v56 = vmul.f32 1.442695, %v872_v51  ;;  %v3747_v58 = vpop.f32.mrb[4].mxu0  ;;  %v909_v59 = vmul.f32 1.442695, %v882_v52 }
  0xfc   : > { %3892 = vpow2.f32 %v893_v53  ;;  %v4499_v60 = vadd.f32 %v3747_v58, %v4464_v27  ;;  %v824_v61 = vpop.f32.mrb[5].mxu0  ;;  %v3755_v62 = vpop.f32.mrb[4].mxu1  ;;  %v905_v63 = vmul.f32 1.442695, %v880_v55 }
  0xfd   : > { %3894 = vpow2.f32 %v889_v56  ;;  %v4502_v0 = vadd.f32 %v4464_v27, %v824_v61  ;;  %v3748_v1 = vpop.f32.mrb[6].mxu0  ;;  %v4505_v2 = vadd.f32 %v3755_v62, %v4464_v27  ;;  %v856_v3 = vpop.f32.mrb[5].mxu1 }
  0xfe   : > { %3896 = vpow2.f32 %v907_v54  ;;  %v877_v4 = vsub.f32 0.0, %v4499_v60  ;;  %v4509_v5 = vadd.f32 %v3748_v1, %v4464_v27  ;;  %v827_v6 = vpop.f32.mrb[7].mxu0  ;;  %v3756_v7 = vpop.f32.mrb[6].mxu1  ;;  %v4519_v30 = vadd.f32 %v4464_v27, %v856_v3 }
  0xff   : > { %3898 = vpow2.f32 %v903_v57  ;;  %v875_v8 = vsub.f32 0.0, %v4502_v0  ;;  %v4513_v9 = vadd.f32 %v4464_v27, %v827_v6  ;;  %v885_v10 = vsub.f32 0.0, %v4505_v2  ;;  %v859_v11 = vpop.f32.mrb[7].mxu1 }
 0x100   : > { %3900 = vpow2.f32 %v909_v59  ;;  %v899_v12 = vmul.f32 1.442695, %v877_v4  ;;  %v878_v13 = vsub.f32 0.0, %v4509_v5  ;;  %v4522_v35 = vadd.f32 %v3756_v7, %v4464_v27 }
 0x101   : > { %3902 = vpow2.f32 %v905_v63  ;;  %v895_v14 = vmul.f32 1.442695, %v875_v8  ;;  %v876_v15 = vsub.f32 0.0, %v4513_v9  ;;  %v915_v17 = vmul.f32 1.442695, %v885_v10 }
 0x102   : > { %3904 = vpow2.f32 %v899_v12  ;;  %v901_v16 = vmul.f32 1.442695, %v878_v13  ;;  %v4525_v40 = vadd.f32 %v4464_v27, %v859_v11  ;;  %v883_v47 = vsub.f32 0.0, %v4519_v30 }
 0x103   : > { %3906 = vpow2.f32 %v895_v14  ;;  %v897_v18 = vmul.f32 1.442695, %v876_v15  ;;  %v886_v51 = vsub.f32 0.0, %v4522_v35 }
 0x104   : > { %v3889_v19 = vpop.eup %3888  ;;  %3908 = vpow2.f32 %v901_v16  ;;  %v884_v54 = vsub.f32 0.0, %v4525_v40  ;;  %v911_v58 = vmul.f32 1.442695, %v883_v47 }
 0x105   : > { %v3891_v20 = vpop.eup %3890  ;;  %v921_v21 = vadd.f32 1.0, %v3889_v19  ;;  %3910 = vpow2.f32 %v897_v18  ;;  %v917_v61 = vmul.f32 1.442695, %v886_v51  ;;  %v3875_v51 = vld [vmem:[%s6099_s26 + $0x14] ss:$8 sps:$4 sm:$0xff]  }
 0x106   : > { %v3893_v22 = vpop.eup %3892  ;;  %v919_v23 = vadd.f32 1.0, %v3891_v20  ;;  %3912 = vpow2.f32 %v915_v17  ;;  %v913_v63 = vmul.f32 1.442695, %v884_v54  ;;  %v1398_v54 = vld [vmem:[%s4570_s0 + $0x8] sm:$0xff] }
 0x107   : > { %v3895_v24 = vpop.eup %3894  ;;  %3914 = vrcp.f32 %v921_v21  ;;  %v922_v25 = vadd.f32 1.0, %v3893_v22 }
 0x108   : > { %v3897_v26 = vpop.eup %3896  ;;  %3916 = vrcp.f32 %v919_v23  ;;  %v920_v28 = vadd.f32 1.0, %v3895_v24 }
 0x109   : > { %v3899_v31 = vpop.eup %3898  ;;  %3918 = vrcp.f32 %v922_v25  ;;  %v929_v33 = vadd.f32 1.0, %v3897_v26 }
 0x10a   : > { %v3901_v36 = vpop.eup %3900  ;;  %3920 = vrcp.f32 %v920_v28  ;;  %v927_v38 = vadd.f32 1.0, %v3899_v31 }
 0x10b   : > { %v3903_v41 = vpop.eup %3902  ;;  %3922 = vrcp.f32 %v929_v33  ;;  %v930_v43 = vadd.f32 1.0, %v3901_v36 }
 0x10c   : > { %v3905_v45 = vpop.eup %3904  ;;  %3924 = vrcp.f32 %v927_v38  ;;  %v928_v46 = vadd.f32 1.0, %v3903_v41 }
 0x10d   : > { %v3907_v48 = vpop.eup %3906  ;;  %3926 = vrcp.f32 %v930_v43  ;;  %v925_v50 = vadd.f32 1.0, %v3905_v45 }
 0x10e   : > { %v3909_v52 = vpop.eup %3908  ;;  %3928 = vrcp.f32 %v928_v46  ;;  %v923_v53 = vadd.f32 1.0, %v3907_v48  ;;  %v3866_v48 = vld [vmem:[%s6071_s8 + $0x4] ss:$8 sps:$4 sm:$0xff]  }
 0x10f   : > { %v3911_v27 = vpop.eup %3910  ;;  %3930 = vrcp.f32 %v925_v50  ;;  %v926_v55 = vadd.f32 1.0, %v3909_v52  ;;  %1469 = vmatprep.subr.bf16.mxu1 %v3866_v48  ;;  %v3870_v50 = vld [vmem:[%s6071_s8 + $0x10] ss:$8 sps:$4 sm:$0xff]  }
 0x110   : > { %v3913_v56 = vpop.eup %3912  ;;  %3932 = vrcp.f32 %v923_v53  ;;  %v924_v57 = vadd.f32 1.0, %v3911_v27  ;;  %v3873_v52 = vld [vmem:[%s6099_s26 + $0x10] ss:$8 sps:$4 sm:$0xff]   ;;  %v1397_v53 = vld [vmem:[%s4570_s0] sm:$0xff] }
 0x111   : > { %v3915_v59 = vpop.eup %3914  ;;  %3934 = vrcp.f32 %v926_v55  ;;  %v933_v19 = vadd.f32 1.0, %v3913_v56  ;;  %v1413_v27 = vpack.c.bf16 %v1398_v54, %v1397_v53  ;;  %v4313_v55 = vmov 0   ;;  %v1399_v56 = vld [vmem:[%s4570_s0 + $0x10] sm:$0xff] }
 0x112   : > { %v3917_v62 = vpop.eup %3916  ;;  %3936 = vrcp.f32 %v924_v57  ;;  %v953_v4 = vmul.f32 %v3915_v59, %v4467_v29  ;;  %1316 = vmatprep.mubr.bf16.mxu0 %v4313_v55  ;;  %v1400_v57 = vld [vmem:[%s4570_s0 + $0x18] sm:$0xff]  ;;  %v1401_v59 = vld [vmem:[%s4570_s0 + $0x20] sm:$0xff] }
 0x113   : > { %v3919_v1 = vpop.eup %3918  ;;  %3938 = vpow2.f32 %v911_v58  ;;  %v951_v8 = vmul.f32 %v3917_v62, %v4470_v32  ;;  %v1414_v58 = vpack.c.bf16 %v1400_v57, %v1399_v56 }
 0x114   : > { %v3921_v3 = vpop.eup %3920  ;;  %v954_v6 = vmul.f32 %v3919_v1, %v4477_v37  ;;  %3940 = vpow2.f32 %v917_v61  ;;  %v1402_v61 = vld [vmem:[%s4570_s0 + $0x28] sm:$0xff]  ;;  %v1404_v1 = vld [vmem:[%s4570_s0 + $0x38] sm:$0xff] }
 0x115   : > { %v3923_v7 = vpop.eup %3922  ;;  %v952_v10 = vmul.f32 %v3921_v3, %v4484_v42  ;;  %3942 = vpow2.f32 %v913_v63  ;;  %v1415_v62 = vpack.c.bf16 %v1402_v61, %v1401_v59  ;;  %v1403_v63 = vld [vmem:[%s4570_s0 + $0x30] sm:$0xff] }
 0x116   : > { %v3925_v11 = vpop.eup %3924  ;;  %v968_v12 = vpack.c.bf16 %v954_v6, %v953_v4  ;;  %v961_v13 = vmul.f32 %v3923_v7, %v4473_v34  ;;  %3944 = vrcp.f32 %v933_v19  ;;  %v1416_v3 = vpack.c.bf16 %v1404_v1, %v1403_v63  ;;  %v1405_v4 = vld [vmem:[%s4570_s0 + $0x40] sm:$0xff]  ;;  %v1406_v6 = vld [vmem:[%s4570_s0 + $0x48] sm:$0xff] }
 0x117   : > { %v3927_v14 = vpop.eup %3926  ;;  %v967_v15 = vpack.c.bf16 %v952_v10, %v951_v8  ;;  %v959_v16 = vmul.f32 %v3925_v11, %v4480_v39  ;;  %v1417_v7 = vpack.c.bf16 %v1406_v6, %v1405_v4  ;;  %v1407_v8 = vld [vmem:[%s4570_s0 + $0x50] sm:$0xff]  ;;  %v1408_v10 = vld [vmem:[%s4570_s0 + $0x58] sm:$0xff] }
 0x118   : > { %v3929_v29 = vpop.eup %3928  ;;  %v962_v37 = vmul.f32 %v3927_v14, %v4488_v44  ;;  %v1418_v11 = vpack.c.bf16 %v1408_v10, %v1407_v8 }
 0x119   : > { %v3931_v17 = vpop.eup %3930  ;;  %v960_v18 = vmul.f32 %v3929_v29, %v4493_v49  ;;  %3761 = vmatprep.mubr.msk.bf16.mxu1 %vm998_vm1, %v967_v15  ;;  %v1411_v15 = vld [vmem:[%s4570_s0 + $0x70] sm:$0xff] }
 0x11a   : > { %v3933_v32 = vpop.eup %3932  ;;  %v972_v42 = vpack.c.bf16 %v962_v37, %v961_v13  ;;  %3762 = vmatmul.mubr.msk.bf16.vlgmr.msra.gmra.mrb[8].mxu1 %vm998_vm1, %v968_v12  ;;  %v957_v22 = vmul.f32 %v3931_v17, %v4499_v60  ;;  %v1409_v12 = vld [vmem:[%s4570_s0 + $0x60] sm:$0xff]  ;;  %v1410_v13 = vld [vmem:[%s4570_s0 + $0x68] sm:$0xff] }
 0x11b   : > { %v3935_v34 = vpop.eup %3934  ;;  %v971_v20 = vpack.c.bf16 %v960_v18, %v959_v16  ;;  %v955_v23 = vmul.f32 %v3933_v32, %v4502_v0  ;;  %v1419_v14 = vpack.c.bf16 %v1410_v13, %v1409_v12  ;;  %v1412_v16 = vld [vmem:[%s4570_s0 + $0x78] sm:$0xff]  ;;  %v4620_v37 = vld [vmem:[%s6101_s1] ss:$0 sm:$0xff] }
 0x11c   : > { %v3937_v21 = vpop.eup %3936  ;;  %v958_v39 = vmul.f32 %v3935_v34, %v4509_v5  ;;  %v1420_v29 = vpack.c.bf16 %v1412_v16, %v1411_v15 }
 0x11d   : > { %v956_v44 = vmul.f32 %v3937_v21, %v4513_v9  ;;  %v3939_v24 = vpop.eup %3938 }
 0x11e   : > { %v970_v49 = vpack.c.bf16 %v958_v39, %v957_v22  ;;  %v3941_v25 = vpop.eup %3940  ;;  %v931_v28 = vadd.f32 1.0, %v3939_v24 }
 0x11f   : > { %v969_v26 = vpack.c.bf16 %v956_v44, %v955_v23  ;;  %v3943_v31 = vpop.eup %3942  ;;  %v934_v33 = vadd.f32 1.0, %v3941_v25 }
 0x120   : > { %3946 = vrcp.f32 %v931_v28  ;;  %v932_v36 = vadd.f32 1.0, %v3943_v31  ;;  %v3945_v60 = vpop.eup %3944 }
 0x121   : > { %3765 = vmatprep.mubr.msk.bf16.mxu1 %vm998_vm1, %v969_v26  ;;  %3948 = vrcp.f32 %v934_v33  ;;  %v965_v5 = vmul.f32 %v3945_v60, %v4505_v2  ;;  %v3864_v2 = vld [vmem:[%s6071_s8] ss:$8 sps:$4 sm:$0xff]  }
 0x122   : > { %3766 = vmatmul.mubr.msk.bf16.gmra.mrb[12].mxu1 %vm998_vm1, %v970_v49  ;;  %3950 = vrcp.f32 %v932_v36 }
 0x123   : > { %3769 = vmatprep.mubr.msk.bf16.mxu1 %vm998_vm1, %v971_v20  ;;  %1470 = vmatpush1.bf16.msra.mxu1 %v3864_v2 }
 0x12a   : > { %3770 = vmatmul.mubr.msk.bf16.gmra.mrb[16].mxu1 %vm998_vm1, %v972_v42  ;;  %v3947_v0 = vpop.eup %3946 }
 0x12b   : > { %v3949_v9 = vpop.eup %3948  ;;  %v963_v38 = vmul.f32 %v3947_v0, %v4519_v30  ;;  %v3869_v30 = vld [vmem:[%s6099_s26 + $0x4] ss:$8 sps:$4 sm:$0xff]  }
 0x12c   : > { %v3951_v41 = vpop.eup %3950  ;;  %v966_v43 = vmul.f32 %v3949_v9, %v4522_v35  ;;  %v3867_v35 = vld [vmem:[%s6099_s26] ss:$8 sps:$4 sm:$0xff]   ;;  %1284 = vmatprep.subr.bf16.mxu0 %v3869_v30 }
 0x12d   : > { %v964_v45 = vmul.f32 %v3951_v41, %v4525_v40  ;;  %1285 = vmatpush1.bf16.msra.mxu0 %v3867_v35  ;;  %v3872_v40 = vld [vmem:[%s6071_s8 + $0x14] ss:$8 sps:$4 sm:$0xff]  }
 0x12e   : > { %v974_v46 = vpack.c.bf16 %v966_v43, %v965_v5  ;;  %1471 = vmatprep.subr.bf16.mxu1 %v3872_v40  ;;  %1286 = vmatprep.subr.bf16.mxu0 %v3875_v51 }
 0x12f   : > { %v973_v47 = vpack.c.bf16 %v964_v45, %v963_v38  ;;  %1472 = vmatpush1.bf16.msra.mxu1 %v3870_v50 }
 0x131   : > { %3773 = vmatprep.mubr.msk.bf16.mxu1 %vm998_vm1, %v973_v47  ;;  %1287 = vmatpush1.bf16.msra.mxu0 %v3873_v52 }
 0x132   : > { %3774 = vmatmul.mubr.msk.bf16.gmra.mrb[20].mxu1 %vm998_vm1, %v974_v46 }
 0x133   : > { %1501 = vmatprep.mubr.bf16.mxu1 %v4313_v55 }
 0x13a   : > { %3628 = vmatmul.mubr.msk.bf16.vlgmr.msra.gmra.mrb[24].mxu1 %vm998_vm1, %v1413_v27 }
 0x13b   : > { %1511 = vmatprep.mubr.bf16.mxu1 %v4313_v55 }
 0x142   : > { %3629 = vmatmul.mubr.msk.bf16.gmra.mrb[28].mxu1 %vm998_vm1, %v1414_v58 }
 0x143   : > { %1521 = vmatprep.mubr.bf16.mxu1 %v4313_v55 }
 0x14a   : > { %3630 = vmatmul.mubr.msk.bf16.gmra.mrb[32].mxu1 %vm998_vm1, %v1415_v62 }
 0x14b   : > { %1531 = vmatprep.mubr.bf16.mxu1 %v4313_v55 }
 0x152   : > { %3631 = vmatmul.mubr.msk.bf16.gmra.mrb[36].mxu1 %vm998_vm1, %v1416_v3 }
 0x153   : > { %1541 = vmatprep.mubr.bf16.mxu1 %v4313_v55 }
 0x15a   : > { %3632 = vmatmul.mubr.msk.bf16.gmra.mrb[40].mxu1 %vm998_vm1, %v1417_v7 }
 0x15b   : > { %1551 = vmatprep.mubr.bf16.mxu1 %v4313_v55 }
 0x162   : > { %3633 = vmatmul.mubr.msk.bf16.gmra.mrb[44].mxu1 %vm998_vm1, %v1418_v11 }
 0x163   : > { %1561 = vmatprep.mubr.bf16.mxu1 %v4313_v55 }
 0x16a   : > { %3634 = vmatmul.mubr.msk.bf16.gmra.mrb[48].mxu1 %vm998_vm1, %v1419_v14 }
 0x16b   : > { %1571 = vmatprep.mubr.bf16.mxu1 %v4313_v55 }
 0x172   : > { %3635 = vmatmul.mubr.msk.bf16.gmra.mrb[52].mxu1 %vm998_vm1, %v1420_v29 }
 0x1ed   : > { %v3763_v17 = vpop.f32.mrb[8].mxu1 }
 0x1ee   : > { %v4623_v18 = vadd.f32 %v3763_v17, %v4620_v37  ;;  %v1057_v32 = vpop.f32.mrb[9].mxu1 }
 0x1ef   : > { %v4626_v42 = vadd.f32 %v4620_v37, %v1057_v32  ;;  %v3764_v19 = vpop.f32.mrb[10].mxu1 }
 0x1f0   : > { %v1122_v34 = vsub.f32 0.0, %v4623_v18  ;;  %v4630_v20 = vadd.f32 %v3764_v19, %v4620_v37  ;;  %v1060_v21 = vpop.f32.mrb[11].mxu1 }
 0x1f1   : > { %v1120_v22 = vsub.f32 0.0, %v4626_v42  ;;  %v4634_v39 = vadd.f32 %v4620_v37, %v1060_v21 }
 0x1f2   : > { %v1140_v23 = vmul.f32 1.442695, %v1122_v34  ;;  %v1123_v44 = vsub.f32 0.0, %v4630_v20 }
 0x1f3   : > { %v1136_v24 = vmul.f32 1.442695, %v1120_v22  ;;  %v1121_v49 = vsub.f32 0.0, %v4634_v39 }
 0x1f4   : > { %3952 = vpow2.f32 %v1140_v23  ;;  %v1142_v25 = vmul.f32 1.442695, %v1123_v44 }
 0x1f5   : > { %3954 = vpow2.f32 %v1136_v24  ;;  %v1138_v26 = vmul.f32 1.442695, %v1121_v49  ;;  %v3767_v28 = vpop.f32.mrb[12].mxu1 }
 0x1f6   : > { %3956 = vpow2.f32 %v1142_v25  ;;  %v4639_v31 = vadd.f32 %v3767_v28, %v4620_v37  ;;  %v1073_v33 = vpop.f32.mrb[13].mxu1 }
 0x1f7   : > { %3958 = vpow2.f32 %v1138_v26  ;;  %v4642_v36 = vadd.f32 %v4620_v37, %v1073_v33  ;;  %v3768_v60 = vpop.f32.mrb[14].mxu1 }
 0x1f8   : > { %v1126_v0 = vsub.f32 0.0, %v4639_v31  ;;  %v4646_v5 = vadd.f32 %v3768_v60, %v4620_v37  ;;  %v1076_v9 = vpop.f32.mrb[15].mxu1 }
 0x1f9   : > { %v1124_v38 = vsub.f32 0.0, %v4642_v36  ;;  %v4650_v41 = vadd.f32 %v4620_v37, %v1076_v9 }
 0x1fa   : > { %v1148_v43 = vmul.f32 1.442695, %v1126_v0  ;;  %v1127_v45 = vsub.f32 0.0, %v4646_v5 }
 0x1fb   : > { %v1144_v46 = vmul.f32 1.442695, %v1124_v38  ;;  %v1125_v47 = vsub.f32 0.0, %v4650_v41 }
 0x1fc   : > { %3960 = vpow2.f32 %v1148_v43  ;;  %v1150_v48 = vmul.f32 1.442695, %v1127_v45 }
 0x1fd   : > { %3962 = vpow2.f32 %v1144_v46  ;;  %v1146_v2 = vmul.f32 1.442695, %v1125_v47  ;;  %v3771_v30 = vpop.f32.mrb[16].mxu1 }
 0x1fe   : > { %v3953_v35 = vpop.eup %3952  ;;  %3964 = vpow2.f32 %v1150_v48  ;;  %v4655_v40 = vadd.f32 %v3771_v30, %v4620_v37  ;;  %v1089_v50 = vpop.f32.mrb[17].mxu1 }
 0x1ff   : > { %v3955_v51 = vpop.eup %3954  ;;  %v1170_v52 = vadd.f32 1.0, %v3953_v35  ;;  %3966 = vpow2.f32 %v1146_v2  ;;  %v4658_v53 = vadd.f32 %v4620_v37, %v1089_v50  ;;  %v3772_v54 = vpop.f32.mrb[18].mxu1 }
 0x200   : > { %v3957_v27 = vpop.eup %3956  ;;  %v1168_v56 = vadd.f32 1.0, %v3955_v51  ;;  %v1130_v57 = vsub.f32 0.0, %v4655_v40  ;;  %v4662_v58 = vadd.f32 %v3772_v54, %v4620_v37  ;;  %v1092_v59 = vpop.f32.mrb[19].mxu1 }
 0x201   : > { %v3959_v61 = vpop.eup %3958  ;;  %3968 = vrcp.f32 %v1170_v52  ;;  %v1171_v62 = vadd.f32 1.0, %v3957_v27  ;;  %v1128_v63 = vsub.f32 0.0, %v4658_v53  ;;  %v4666_v1 = vadd.f32 %v4620_v37, %v1092_v59 }
 0x202   : > { %3970 = vrcp.f32 %v1168_v56  ;;  %v1169_v3 = vadd.f32 1.0, %v3959_v61  ;;  %v1156_v4 = vmul.f32 1.442695, %v1130_v57  ;;  %v1131_v6 = vsub.f32 0.0, %v4662_v58 }
 0x203   : > { %3972 = vrcp.f32 %v1171_v62  ;;  %v1152_v7 = vmul.f32 1.442695, %v1128_v63  ;;  %v1129_v8 = vsub.f32 0.0, %v4666_v1 }
 0x204   : > { %3974 = vrcp.f32 %v1169_v3  ;;  %v1158_v10 = vmul.f32 1.442695, %v1131_v6 }
 0x205   : > { %3976 = vpow2.f32 %v1156_v4  ;;  %v1154_v11 = vmul.f32 1.442695, %v1129_v8  ;;  %v3775_v13 = vpop.f32.mrb[20].mxu1 }
 0x206   : > { %v3961_v12 = vpop.eup %3960  ;;  %3978 = vpow2.f32 %v1152_v7  ;;  %v4671_v16 = vadd.f32 %v3775_v13, %v4620_v37  ;;  %v1105_v29 = vpop.f32.mrb[21].mxu1 }
 0x207   : > { %v3963_v14 = vpop.eup %3962  ;;  %v1174_v15 = vadd.f32 1.0, %v3961_v12  ;;  %3980 = vpow2.f32 %v1158_v10  ;;  %v4674_v19 = vadd.f32 %v4620_v37, %v1105_v29  ;;  %v3776_v34 = vpop.f32.mrb[22].mxu1 }
 0x208   : > { %v3965_v17 = vpop.eup %3964  ;;  %v1172_v32 = vadd.f32 1.0, %v3963_v14  ;;  %3982 = vpow2.f32 %v1154_v11  ;;  %v1134_v23 = vsub.f32 0.0, %v4671_v16  ;;  %v4678_v44 = vadd.f32 %v3776_v34, %v4620_v37  ;;  %v1108_v24 = vpop.f32.mrb[23].mxu1 }
 0x209   : > { %v3967_v21 = vpop.eup %3966  ;;  %3984 = vrcp.f32 %v1174_v15  ;;  %v1175_v22 = vadd.f32 1.0, %v3965_v17  ;;  %v1132_v25 = vsub.f32 0.0, %v4674_v19  ;;  %v4682_v26 = vadd.f32 %v4620_v37, %v1108_v24 }
 0x20a   : > { %3986 = vrcp.f32 %v1172_v32  ;;  %v1173_v49 = vadd.f32 1.0, %v3967_v21  ;;  %v1164_v33 = vmul.f32 1.442695, %v1134_v23  ;;  %v1135_v60 = vsub.f32 0.0, %v4678_v44 }
 0x20b   : > { %v3969_v28 = vpop.eup %3968  ;;  %3988 = vrcp.f32 %v1175_v22  ;;  %v1160_v9 = vmul.f32 1.442695, %v1132_v25  ;;  %v1133_v38 = vsub.f32 0.0, %v4682_v26 }
 0x20c   : > { %v3971_v0 = vpop.eup %3970  ;;  %3990 = vrcp.f32 %v1173_v49  ;;  %v1166_v45 = vmul.f32 1.442695, %v1135_v60  ;;  %v1202_v47 = vmul.f32 %v3969_v28, %v4623_v18 }
 0x20d   : > { %v3973_v43 = vpop.eup %3972  ;;  %3992 = vpow2.f32 %v1164_v33  ;;  %v1162_v37 = vmul.f32 1.442695, %v1133_v38  ;;  %v1200_v30 = vmul.f32 %v3971_v0, %v4626_v42 }
 0x20e   : > { %v3975_v46 = vpop.eup %3974  ;;  %v1203_v48 = vmul.f32 %v3973_v43, %v4630_v20  ;;  %3994 = vpow2.f32 %v1160_v9 }
 0x20f   : > { %v3977_v2 = vpop.eup %3976  ;;  %v1201_v35 = vmul.f32 %v3975_v46, %v4634_v39  ;;  %3996 = vpow2.f32 %v1166_v45 }
 0x210   : > { %v3979_v50 = vpop.eup %3978  ;;  %v1217_v51 = vpack.c.bf16 %v1203_v48, %v1202_v47  ;;  %v1178_v52 = vadd.f32 1.0, %v3977_v2  ;;  %3998 = vpow2.f32 %v1162_v37 }
 0x211   : > { %v3981_v54 = vpop.eup %3980  ;;  %v1216_v27 = vpack.c.bf16 %v1201_v35, %v1200_v30  ;;  %v1176_v56 = vadd.f32 1.0, %v3979_v50 }
 0x212   : > { %v3983_v57 = vpop.eup %3982  ;;  %4000 = vrcp.f32 %v1178_v52  ;;  %v1179_v18 = vadd.f32 1.0, %v3981_v54 }
 0x213   : > { %v3985_v59 = vpop.eup %3984  ;;  %4002 = vrcp.f32 %v1176_v56  ;;  %v1177_v20 = vadd.f32 1.0, %v3983_v57  ;;  %3616 = vmatmul.mubr.msk.bf16.vlgmr.msra.gmra.mrb[8].mxu0 %vm998_vm1, %v1216_v27 }
 0x214   : > { %v3987_v61 = vpop.eup %3986  ;;  %4004 = vrcp.f32 %v1179_v18  ;;  %1326 = vmatprep.mubr.bf16.mxu0 %v4313_v55  ;;  %v1206_v62 = vmul.f32 %v3985_v59, %v4639_v31 }
 0x215   : > { %v3989_v42 = vpop.eup %3988  ;;  %4006 = vrcp.f32 %v1177_v20  ;;  %v1204_v4 = vmul.f32 %v3987_v61, %v4642_v36 }
 0x216   : > { %v3991_v39 = vpop.eup %3990  ;;  %v1207_v63 = vmul.f32 %v3989_v42, %v4646_v5 }
 0x217   : > { %v3993_v3 = vpop.eup %3992  ;;  %v1205_v6 = vmul.f32 %v3991_v39, %v4650_v41 }
 0x218   : > { %v3995_v7 = vpop.eup %3994  ;;  %v1219_v8 = vpack.c.bf16 %v1207_v63, %v1206_v62  ;;  %v1182_v10 = vadd.f32 1.0, %v3993_v3  ;;  %v1230_v3 = vlaneseq }
 0x219   : > { %v3997_v11 = vpop.eup %3996  ;;  %v1218_v12 = vpack.c.bf16 %v1205_v6, %v1204_v4  ;;  %v1180_v13 = vadd.f32 1.0, %v3995_v7  ;;  %v1228_v7 = vld [vmem:[%s6070_s7] sm:$0x3] }
 0x21a   : > { %v3999_v14 = vpop.eup %3998  ;;  %4008 = vrcp.f32 %v1182_v10  ;;  %v1183_v15 = vadd.f32 1.0, %v3997_v11  ;;  %v4781_v4 = vshrl.u32 %v1230_v3, 7  ;;  %v4792_v10 = vld [vmem:[%s6072_s9] ss:$0 sm:$0xff] }
 0x21b   : > { %4010 = vrcp.f32 %v1180_v13  ;;  %v1181_v29 = vadd.f32 1.0, %v3999_v14  ;;  %3617 = vmatmul.mubr.msk.bf16.gmra.mrb[12].mxu0 %vm998_vm1, %v1217_v51 }
 0x21c   : > { %v4001_v31 = vpop.eup %4000  ;;  %4012 = vrcp.f32 %v1183_v15  ;;  %1336 = vmatprep.mubr.bf16.mxu0 %v4313_v55  ;;  %v1232_v6 = vsub.s32 0, %v4781_v4 }
 0x21d   : > { %v4003_v36 = vpop.eup %4002  ;;  %4014 = vrcp.f32 %v1181_v29  ;;  %v1210_v17 = vmul.f32 %v4001_v31, %v4655_v40 }
 0x21e   : > { %v4005_v5 = vpop.eup %4004  ;;  %v1208_v34 = vmul.f32 %v4003_v36, %v4658_v53 }
 0x21f   : > { %v4007_v41 = vpop.eup %4006  ;;  %v1211_v32 = vmul.f32 %v4005_v5, %v4662_v58 }
 0x220   : > { %v1209_v21 = vmul.f32 %v4007_v41, %v4666_v1 }
 0x221   : > { %v1221_v22 = vpack.c.bf16 %v1211_v32, %v1210_v17 }
 0x222   : > { %v1220_v23 = vpack.c.bf16 %v1209_v21, %v1208_v34 }
 0x223   : > { %3618 = vmatmul.mubr.msk.bf16.gmra.mrb[16].mxu0 %vm998_vm1, %v1218_v12 }
 0x224   : > { %v4009_v24 = vpop.eup %4008  ;;  %1346 = vmatprep.mubr.bf16.mxu0 %v4313_v55 }
 0x225   : > { %v4011_v49 = vpop.eup %4010  ;;  %v1214_v33 = vmul.f32 %v4009_v24, %v4671_v16  ;;  %v4717_v16 = vpop.f32.mrb[24].mxu1 }
 0x226   : > { %v4013_v25 = vpop.eup %4012  ;;  %v1212_v58 = vmul.f32 %v4011_v49, %v4674_v19  ;;  %v4719_v19 = vpop.f32.mrb[25].mxu1  ;;  %v1589_v12 = vadd.f32 %v4792_v10, %v4717_v16 }
 0x227   : > { %v4015_v28 = vpop.eup %4014  ;;  %v1215_v40 = vmul.f32 %v4013_v25, %v4678_v44  ;;  %6102 = vst [vmem:[#allocation2_spill] sm:$0xff] %v4719_v19  ;;  %v4721_v44 = vpop.f32.mrb[26].mxu1 }
 0x228   : > { %v1213_v53 = vmul.f32 %v4015_v28, %v4682_v26  ;;  %v4723_v26 = vpop.f32.mrb[27].mxu1  ;;  %v1590_v41 = vadd.f32 %v4792_v10, %v4721_v44 }
 0x229   : > { %v1223_v60 = vpack.c.bf16 %v1215_v40, %v1214_v33  ;;  %6103 = vst [vmem:[#allocation3_spill] sm:$0xff] %v4723_v26  ;;  %v4725_v0 = vpop.f32.mrb[28].mxu1 }
 0x22a   : > { %v1222_v1 = vpack.c.bf16 %v1213_v53, %v1212_v58  ;;  %v4727_v9 = vpop.f32.mrb[29].mxu1 }
 0x22b   : > { %3619 = vmatmul.mubr.msk.bf16.gmra.mrb[20].mxu0 %vm998_vm1, %v1219_v8  ;;  %v4729_v38 = vpop.f32.mrb[30].mxu1  ;;  %v4787_v8 = vrot.slane %v1228_v7, %v1232_v6 }
 0x22c   : > { %1356 = vmatprep.mubr.bf16.mxu0 %v4313_v55  ;;  %v4731_v43 = vpop.f32.mrb[31].mxu1  ;;  %v1592_v3 = vadd.f32 %v4792_v10, %v4729_v38 }
 0x22d   : > { %6104 = vst [vmem:[#allocation4_spill] sm:$0xff] %v4731_v43  ;;  %v4733_v45 = vpop.f32.mrb[32].mxu1 }
 0x233   : > { %3620 = vmatmul.mubr.msk.bf16.gmra.mrb[24].mxu0 %vm998_vm1, %v1220_v23 }
 0x234   : > { %1366 = vmatprep.mubr.bf16.mxu0 %v4313_v55 }
 0x23b   : > { %3621 = vmatmul.mubr.msk.bf16.gmra.mrb[28].mxu0 %vm998_vm1, %v1221_v22  ;;  %v1591_v22 = vadd.f32 %v4792_v10, %v4725_v0 }
 0x23c   : > { %1376 = vmatprep.mubr.bf16.mxu0 %v4313_v55 }
 0x243   : > { %3622 = vmatmul.mubr.msk.bf16.gmra.mrb[32].mxu0 %vm998_vm1, %v1222_v1 }
 0x244   : > { %1386 = vmatprep.mubr.bf16.mxu0 %v4313_v55  ;;  %v4735_v55 = vpop.f32.mrb[33].mxu1 }
 0x245   : > { %6105 = vst [vmem:[#allocation5_spill] sm:$0xff] %v4735_v55  ;;  %v4737_v46 = vpop.f32.mrb[34].mxu1 }
 0x246   : > { %v4739_v47 = vpop.f32.mrb[35].mxu1 }
 0x247   : > { %6106 = vst [vmem:[#allocation6_spill] sm:$0xff] %v4739_v47  ;;  %v4741_v48 = vpop.f32.mrb[36].mxu1 }
 0x248   : > { %v4743_v37 = vpop.f32.mrb[37].mxu1 }
 0x249   : > { %6107 = vst [vmem:[#allocation7_spill] sm:$0xff] %v4743_v37  ;;  %v4745_v2 = vpop.f32.mrb[38].mxu1 }
 0x24a   : > { %v4747_v30 = vpop.f32.mrb[39].mxu1 }
 0x24b   : > { %3623 = vmatmul.mubr.msk.bf16.gmra.mrb[36].mxu0 %vm998_vm1, %v1223_v60  ;;  %6108 = vst [vmem:[#allocation8_spill] sm:$0xff] %v4747_v30  ;;  %v4749_v35 = vpop.f32.mrb[40].mxu1 }
 0x24c   : > { %v4751_v50 = vpop.f32.mrb[41].mxu1 }
 0x24d   : > { %6109 = vst [vmem:[#allocation9_spill] sm:$0xff] %v4751_v50  ;;  %v4753_v51 = vpop.f32.mrb[42].mxu1 }
 0x24e   : > { %v4755_v52 = vpop.f32.mrb[43].mxu1 }
 0x24f   : > { %6110 = vst [vmem:[#allocation10_spill] sm:$0xff] %v4755_v52  ;;  %v4757_v54 = vpop.f32.mrb[44].mxu1 }
 0x250   : > { %v4759_v27 = vpop.f32.mrb[45].mxu1 }
 0x251   : > { %6111 = vst [vmem:[#allocation11_spill] sm:$0xff] %v4759_v27  ;;  %v4761_v56 = vpop.f32.mrb[46].mxu1 }
 0x252   : > { %v4763_v57 = vpop.f32.mrb[47].mxu1 }
 0x253   : > { %6112 = vst [vmem:[#allocation12_spill] sm:$0xff] %v4763_v57  ;;  %v4765_v18 = vpop.f32.mrb[48].mxu1 }
 0x254   : > { %v4767_v59 = vpop.f32.mrb[49].mxu1 }
 0x255   : > { %6113 = vst [vmem:[#allocation13_spill] sm:$0xff] %v4767_v59  ;;  %v4769_v20 = vpop.f32.mrb[50].mxu1 }
 0x256   : > { %v4771_v61 = vpop.f32.mrb[51].mxu1 }
 0x257   : > { %6114 = vst [vmem:[#allocation14_spill] sm:$0xff] %v4771_v61  ;;  %v4773_v42 = vpop.f32.mrb[52].mxu1 }
 0x258   : > { %v4775_v39 = vpop.f32.mrb[53].mxu1 }
 0x259   : > { %6115 = vst [vmem:[#allocation15_spill] sm:$0xff] %v4775_v39  ;;  %v4777_v62 = vpop.f32.mrb[54].mxu1 }
 0x25a   : > { %v4779_v63 = vpop.f32.mrb[55].mxu1 }
 0x25b   : > { %6116 = vst [vmem:[#allocation16_spill] sm:$0xff] %v4779_v63 }
 0x2e6   : > { %v1318_v11 = vpop.f32.mrb[8].mxu0 }
 0x2e7   : > { %v1319_v13 = vadd.f32 %v1318_v11, %v4787_v8  ;;  %v4797_v14 = vpop.f32.mrb[9].mxu0 }
 0x2e8   : > { %v1322_v15 = vpop.f32.mrb[10].mxu0 }
 0x2e9   : > { %v4799_v29 = vadd.f32 1.0, %v1319_v13  ;;  %v1323_v31 = vadd.f32 %v1322_v15, %v4787_v8  ;;  %v4802_v36 = vpop.f32.mrb[11].mxu0 }
 0x2ea   : > { %6117 = vst [vmem:[#allocation17_spill] sm:$0xff] %v4802_v36 }
 0x2eb   : > { %v4805_v5 = vmul.f32 %v4799_v29, %v1589_v12  ;;  %v4809_v17 = vadd.f32 1.0, %v1323_v31 }
 0x2ed   : > { %v4812_v32 = vmul.f32 %v4809_v17, %v1590_v41  ;;  %v1638_v34 = vsel %vm1637_vm2, %v4805_v5, 0.0  ;;  %v1702_v28 = vmul.f32 %v4805_v5, %v4805_v5 }
 0x2ee   : > { %v1328_v21 = vpop.f32.mrb[12].mxu0  ;;  %1639 = vadd.xlane.f32.xlu0 %v1638_v34  ;;  %v1593_v34 = vadd.f32 %v4792_v10, %v4733_v45 }
 0x2ef   : > { %v1329_v23 = vadd.f32 %v1328_v21, %v4787_v8  ;;  %v4819_v24 = vpop.f32.mrb[13].mxu0  ;;  %v1703_v49 = vmul.f32 %v4812_v32, %v4812_v32  ;;  %v1641_v60 = vsel %vm1637_vm2, %v4812_v32, 0.0  ;;  %v1718_v11 = vsel %vm1637_vm2, %v1702_v28, 0.0 }
 0x2f0   : > { %v1332_v25 = vpop.f32.mrb[14].mxu0 }
 0x2f1   : > { %v4825_v33 = vadd.f32 1.0, %v1329_v23  ;;  %v1333_v40 = vadd.f32 %v1332_v25, %v4787_v8  ;;  %v4828_v58 = vpop.f32.mrb[15].mxu0  ;;  %v1721_v53 = vsel %vm1637_vm2, %v1703_v49, 0.0  ;;  %v1594_v23 = vadd.f32 %v4792_v10, %v4737_v46 }
 0x2f2   : > { %1722 = vadd.xlane.f32.xlu1 %v1721_v53  ;;  %1642 = vadd.xlane.f32.xlu0 %v1641_v60 }
 0x2f3   : > { %v4834_v1 = vmul.f32 %v4825_v33, %v1591_v22  ;;  %v4838_v6 = vadd.f32 1.0, %v1333_v40 }
 0x2f5   : > { %v4841_v7 = vmul.f32 %v4838_v6, %v1592_v3  ;;  %v1644_v12 = vsel %vm1637_vm2, %v4834_v1, 0.0  ;;  %v1704_v13 = vmul.f32 %v4834_v1, %v4834_v1 }
 0x2f6   : > { %v1338_v15 = vpop.f32.mrb[16].mxu0  ;;  %1719 = vadd.xlane.f32.xlu0 %v1718_v11  ;;  %1645 = vadd.xlane.f32.xlu1 %v1644_v12 }
 0x2f7   : > { %v1339_v31 = vadd.f32 %v1338_v15, %v4787_v8  ;;  %v4849_v41 = vpop.f32.mrb[17].mxu0  ;;  %v1724_v22 = vsel %vm1637_vm2, %v1704_v13, 0.0  ;;  %v1647_v40 = vsel %vm1637_vm2, %v4841_v7, 0.0  ;;  %v1705_v53 = vmul.f32 %v4841_v7, %v4841_v7 }
 0x2f8   : > { %6118 = vst [vmem:[#allocation18_spill] sm:$0xff] %v4849_v41  ;;  %v1342_v21 = vpop.f32.mrb[18].mxu0 }
 0x2f9   : > { %v4856_v49 = vadd.f32 1.0, %v1339_v31  ;;  %v1343_v25 = vadd.f32 %v1342_v21, %v4787_v8  ;;  %v4859_v28 = vpop.f32.mrb[19].mxu0  ;;  %v1727_v12 = vsel %vm1637_vm2, %v1705_v53, 0.0 }
 0x2fa   : > { %6119 = vst [vmem:[#allocation19_spill] sm:$0xff] %v4859_v28  ;;  %1725 = vadd.xlane.f32.xlu0 %v1724_v22  ;;  %1648 = vadd.xlane.f32.xlu1 %v1647_v40  ;;  %v1596_v40 = vadd.f32 %v4792_v10, %v4745_v2 }
 0x2fb   : > { %v4865_v60 = vadd.f32 1.0, %v1343_v25  ;;  %v4868_v3 = vmul.f32 %v4856_v49, %v1593_v34  ;;  %v1595_v34 = vadd.f32 %v4792_v10, %v4741_v48 }
 0x2fd   : > { %v4871_v11 = vmul.f32 %v4865_v60, %v1594_v23  ;;  %v1650_v13 = vsel %vm1637_vm2, %v4868_v3, 0.0  ;;  %v1706_v15 = vmul.f32 %v4868_v3, %v4868_v3 }
 0x2fe   : > { %v1348_v31 = vpop.f32.mrb[20].mxu0  ;;  %1728 = vadd.xlane.f32.xlu1 %v1727_v12  ;;  %1651 = vadd.xlane.f32.xlu0 %v1650_v13 }
 0x2ff   : > { %v1349_v21 = vadd.f32 %v1348_v31, %v4787_v8  ;;  %v4879_v22 = vpop.f32.mrb[21].mxu0  ;;  %v1730_v25 = vsel %vm1637_vm2, %v1706_v15, 0.0  ;;  %v1653_v12 = vsel %vm1637_vm2, %v4871_v11, 0.0  ;;  %v1707_v13 = vmul.f32 %v4871_v11, %v4871_v11 }
 0x300   : > { %6120 = vst [vmem:[#allocation20_spill] sm:$0xff] %v4879_v22  ;;  %v1352_v23 = vpop.f32.mrb[22].mxu0 }
 0x301   : > { %v4886_v53 = vadd.f32 1.0, %v1349_v21  ;;  %v1353_v61 = vadd.f32 %v1352_v23, %v4787_v8  ;;  %v4889_v63 = vpop.f32.mrb[23].mxu0  ;;  %v1733_v23 = vsel %vm1637_vm2, %v1707_v13, 0.0  ;;  %v1598_v13 = vadd.f32 %v4792_v10, %v4753_v51 }
 0x302   : > { %6121 = vst [vmem:[#allocation21_spill] sm:$0xff] %v4889_v63  ;;  %1731 = vadd.xlane.f32.xlu0 %v1730_v25  ;;  %1654 = vadd.xlane.f32.xlu1 %v1653_v12 }
 0x303   : > { %v4895_v31 = vadd.f32 1.0, %v1353_v61  ;;  %v4898_v15 = vmul.f32 %v4886_v53, %v1595_v34  ;;  %v1597_v34 = vadd.f32 %v4792_v10, %v4749_v35 }
 0x305   : > { %v4901_v21 = vmul.f32 %v4895_v31, %v1596_v40  ;;  %v1656_v59 = vsel %vm1637_vm2, %v4898_v15, 0.0  ;;  %v1708_v39 = vmul.f32 %v4898_v15, %v4898_v15 }
 0x306   : > { %v1358_v52 = vpop.f32.mrb[24].mxu0  ;;  %1734 = vadd.xlane.f32.xlu1 %v1733_v23  ;;  %1657 = vadd.xlane.f32.xlu0 %v1656_v59 }
 0x307   : > { %v1359_v61 = vadd.f32 %v1358_v52, %v4787_v8  ;;  %v4909_v25 = vpop.f32.mrb[25].mxu0  ;;  %v1736_v12 = vsel %vm1637_vm2, %v1708_v39, 0.0  ;;  %v1659_v52 = vsel %vm1637_vm2, %v4901_v21, 0.0  ;;  %v1709_v59 = vmul.f32 %v4901_v21, %v4901_v21 }
 0x308   : > { %6122 = vst [vmem:[#allocation22_spill] sm:$0xff] %v4909_v25  ;;  %v1362_v40 = vpop.f32.mrb[26].mxu0 }
 0x309   : > { %v4916_v57 = vadd.f32 1.0, %v1359_v61  ;;  %v1363_v50 = vadd.f32 %v1362_v40, %v4787_v8  ;;  %v4919_v27 = vpop.f32.mrb[27].mxu0  ;;  %v1739_v40 = vsel %vm1637_vm2, %v1709_v59, 0.0  ;;  %v1600_v59 = vadd.f32 %v4792_v10, %v4761_v56 }
 0x30a   : > { %6123 = vst [vmem:[#allocation23_spill] sm:$0xff] %v4919_v27  ;;  %1737 = vadd.xlane.f32.xlu0 %v1736_v12  ;;  %1660 = vadd.xlane.f32.xlu1 %v1659_v52 }
 0x30b   : > { %v4925_v23 = vadd.f32 1.0, %v1363_v50  ;;  %v4928_v39 = vmul.f32 %v4916_v57, %v1597_v34  ;;  %v1599_v34 = vadd.f32 %v4792_v10, %v4757_v54 }
 0x30d   : > { %v4931_v61 = vmul.f32 %v4925_v23, %v1598_v13  ;;  %v1662_v27 = vsel %vm1637_vm2, %v4928_v39, 0.0  ;;  %v1710_v25 = vmul.f32 %v4928_v39, %v4928_v39 }
 0x30e   : > { %v1368_v47 = vpop.f32.mrb[28].mxu0  ;;  %1740 = vadd.xlane.f32.xlu1 %v1739_v40  ;;  %1663 = vadd.xlane.f32.xlu0 %v1662_v27 }
 0x30f   : > { %v1369_v50 = vadd.f32 %v1368_v47, %v4787_v8  ;;  %v4939_v12 = vpop.f32.mrb[29].mxu0  ;;  %v1742_v52 = vsel %vm1637_vm2, %v1710_v25, 0.0  ;;  %v1665_v47 = vsel %vm1637_vm2, %v4931_v61, 0.0  ;;  %v1711_v27 = vmul.f32 %v4931_v61, %v4931_v61 }
 0x310   : > { %6124 = vst [vmem:[#allocation24_spill] sm:$0xff] %v4939_v12  ;;  %v1372_v13 = vpop.f32.mrb[30].mxu0 }
 0x311   : > { %v4946_v30 = vadd.f32 1.0, %v1369_v50  ;;  %v1373_v55 = vadd.f32 %v1372_v13, %v4787_v8  ;;  %v4949_v28 = vpop.f32.mrb[31].mxu0  ;;  %v1745_v13 = vsel %vm1637_vm2, %v1711_v27, 0.0  ;;  %v1602_v27 = vadd.f32 %v4792_v10, %v4769_v20 }
 0x312   : > { %6125 = vst [vmem:[#allocation25_spill] sm:$0xff] %v4949_v28  ;;  %1743 = vadd.xlane.f32.xlu0 %v1742_v52  ;;  %1666 = vadd.xlane.f32.xlu1 %v1665_v47 }
 0x313   : > { %v4955_v40 = vadd.f32 1.0, %v1373_v55  ;;  %v4958_v25 = vmul.f32 %v4946_v30, %v1599_v34  ;;  %v1601_v34 = vadd.f32 %v4792_v10, %v4765_v18 }
 0x315   : > { %v4961_v50 = vmul.f32 %v4955_v40, %v1600_v59  ;;  %v1668_v28 = vsel %vm1637_vm2, %v4958_v25, 0.0  ;;  %v1712_v12 = vmul.f32 %v4958_v25, %v4958_v25 }
 0x316   : > { %v1378_v37 = vpop.f32.mrb[32].mxu0  ;;  %1746 = vadd.xlane.f32.xlu1 %v1745_v13  ;;  %1669 = vadd.xlane.f32.xlu0 %v1668_v28 }
 0x317   : > { %v1379_v55 = vadd.f32 %v1378_v37, %v4787_v8  ;;  %v4969_v52 = vpop.f32.mrb[33].mxu0  ;;  %v1748_v47 = vsel %vm1637_vm2, %v1712_v12, 0.0  ;;  %v1671_v37 = vsel %vm1637_vm2, %v4961_v50, 0.0  ;;  %v1713_v28 = vmul.f32 %v4961_v50, %v4961_v50 }
 0x318   : > { %6126 = vst [vmem:[#allocation26_spill] sm:$0xff] %v4969_v52  ;;  %v1382_v59 = vpop.f32.mrb[34].mxu0 }
 0x319   : > { %v4976_v63 = vadd.f32 1.0, %v1379_v55  ;;  %v1383_v41 = vadd.f32 %v1382_v59, %v4787_v8  ;;  %v4979_v22 = vpop.f32.mrb[35].mxu0  ;;  %v1751_v59 = vsel %vm1637_vm2, %v1713_v28, 0.0  ;;  %v1604_v28 = vadd.f32 %v4792_v10, %v4777_v62 }
 0x31a   : > { %6127 = vst [vmem:[#allocation27_spill] sm:$0xff] %v4979_v22  ;;  %1749 = vadd.xlane.f32.xlu0 %v1748_v47  ;;  %1672 = vadd.xlane.f32.xlu1 %v1671_v37 }
 0x31b   : > { %v4985_v13 = vadd.f32 1.0, %v1383_v41  ;;  %v4988_v12 = vmul.f32 %v4976_v63, %v1601_v34  ;;  %v1603_v34 = vadd.f32 %v4792_v10, %v4773_v42 }
 0x31d   : > { %v4991_v55 = vmul.f32 %v4985_v13, %v1602_v27  ;;  %v1674_v22 = vsel %vm1637_vm2, %v4988_v12, 0.0  ;;  %v1714_v52 = vmul.f32 %v4988_v12, %v4988_v12 }
 0x31e   : > { %v1388_v26 = vpop.f32.mrb[36].mxu0  ;;  %1752 = vadd.xlane.f32.xlu1 %v1751_v59  ;;  %1675 = vadd.xlane.f32.xlu0 %v1674_v22 }
 0x31f   : > { %v1389_v41 = vadd.f32 %v1388_v26, %v4787_v8  ;;  %v4999_v47 = vpop.f32.mrb[37].mxu0  ;;  %v1754_v37 = vsel %vm1637_vm2, %v1714_v52, 0.0  ;;  %v1677_v26 = vsel %vm1637_vm2, %v4991_v55, 0.0  ;;  %v1715_v22 = vmul.f32 %v4991_v55, %v4991_v55 }
 0x320   : > { %6128 = vst [vmem:[#allocation28_spill] sm:$0xff] %v4999_v47  ;;  %v1392_v27 = vpop.f32.mrb[38].mxu0 }
 0x321   : > { %v5006_v43 = vadd.f32 1.0, %v1389_v41  ;;  %v1393_v19 = vadd.f32 %v1392_v27, %v4787_v8  ;;  %v5009_v36 = vpop.f32.mrb[39].mxu0  ;;  %v1757_v10 = vsel %vm1637_vm2, %v1715_v22, 0.0  ;;  %v3878_v22 = vld [vmem:[%s6075_s12 + $0x10] sm:$0xff]  }
 0x322   : > { %1755 = vadd.xlane.f32.xlu0 %v1754_v37  ;;  %1678 = vadd.xlane.f32.xlu1 %v1677_v26  ;;  %v3876_v37 = vld [vmem:[%s6075_s12] sm:$0xff]   ;;  %v3877_v26 = vld [vmem:[%s6075_s12 + $0x8] sm:$0xff]  }
 0x323   : > { %v1620_v59 = vadd.f32 1.0, %v1393_v19  ;;  %v5016_v52 = vmul.f32 %v5006_v43, %v1603_v34  ;;  %3777 = vmatprep.subr.bf16.mxu0 %v3876_v37 }
 0x324   : > { %3778 = vmatpush3.bf16.msra.mxu0 %v3876_v37  ;;  %v5120_v37 = vld [vmem:[%s6073_s10] ss:$0 sm:$0xff] }
 0x325   : > { %v5018_v47 = vmul.f32 %v1620_v59, %v1604_v28  ;;  %v1680_v8 = vsel %vm1637_vm2, %v5016_v52, 0.0  ;;  %v1716_v41 = vmul.f32 %v5016_v52, %v5016_v52  ;;  %3779 = vmatprep.subr.bf16.mxu0 %v3877_v26 }
 0x326   : > { %1758 = vadd.xlane.f32.xlu1 %v1757_v10  ;;  %1681 = vadd.xlane.f32.xlu0 %v1680_v8  ;;  %v3879_v10 = vld [vmem:[%s6075_s12 + $0x18] sm:$0xff]  }
 0x327   : > { %v1760_v27 = vsel %vm1637_vm2, %v1716_v41, 0.0  ;;  %v1683_v19 = vsel %vm1637_vm2, %v5018_v47, 0.0  ;;  %v1717_v34 = vmul.f32 %v5018_v47, %v5018_v47 }
 0x328   : > { %3780 = vmatpush3.bf16.msra.mxu0 %v3877_v26 }
 0x329   : > { %v1763_v28 = vsel %vm1637_vm2, %v1717_v34, 0.0  ;;  %3781 = vmatprep.subr.bf16.mxu0 %v3878_v22 }
 0x32a   : > { %1761 = vadd.xlane.f32.xlu0 %v1760_v27  ;;  %1684 = vadd.xlane.f32.xlu1 %v1683_v19 }
 0x32c   : > { %3782 = vmatpush3.bf16.msra.mxu0 %v3878_v22 }
 0x32d   : > { %3783 = vmatprep.subr.bf16.mxu0 %v3879_v10 }
 0x32e   : > { %1764 = vadd.xlane.f32.xlu1 %v1763_v28 }
 0x330   : > { %3784 = vmatpush3.bf16.msra.mxu0 %v3879_v10 }
 0x33f   : > { %2078 = vrot.lane.b32.xlu1 %v4721_v44, %s4314_s5 }
 0x340   : > { %2076 = vrot.lane.b32.xlu0 %v4717_v16, %s4314_s5 }
 0x343   : > { %2080 = vrot.lane.b32.xlu1 %v4725_v0, %s4314_s5 }
 0x344   : > { %2284 = vrot.lane.b32.xlu0 %v4799_v29, %s4314_s5 }
 0x347   : > { %2082 = vrot.lane.b32.xlu1 %v4729_v38, %s4314_s5 }
 0x348   : > { %2288 = vrot.lane.b32.xlu0 %v4825_v33, %s4314_s5 }
 0x34b   : > { %2286 = vrot.lane.b32.xlu1 %v4809_v17, %s4314_s5 }
 0x34c   : > { %2084 = vrot.lane.b32.xlu0 %v4733_v45, %s4314_s5 }
 0x34f   : > { %2290 = vrot.lane.b32.xlu1 %v4838_v6, %s4314_s5 }
 0x350   : > { %2088 = vrot.lane.b32.xlu0 %v4741_v48, %s4314_s5 }
 0x353   : > { %2086 = vrot.lane.b32.xlu1 %v4737_v46, %s4314_s5 }
 0x354   : > { %2292 = vrot.lane.b32.xlu0 %v4856_v49, %s4314_s5 }
 0x357   : > { %2090 = vrot.lane.b32.xlu1 %v4745_v2, %s4314_s5 }
 0x358   : > { %2296 = vrot.lane.b32.xlu0 %v4886_v53, %s4314_s5 }
 0x35b   : > { %2294 = vrot.lane.b32.xlu1 %v4865_v60, %s4314_s5 }
 0x35c   : > { %2092 = vrot.lane.b32.xlu0 %v4749_v35, %s4314_s5 }
 0x35f   : > { %2298 = vrot.lane.b32.xlu1 %v4895_v31, %s4314_s5 }
 0x360   : > { %2096 = vrot.lane.b32.xlu0 %v4757_v54, %s4314_s5 }
 0x363   : > { %2094 = vrot.lane.b32.xlu1 %v4753_v51, %s4314_s5 }
 0x364   : > { %2300 = vrot.lane.b32.xlu0 %v4916_v57, %s4314_s5 }
 0x367   : > { %2098 = vrot.lane.b32.xlu1 %v4761_v56, %s4314_s5 }
 0x368   : > { %2304 = vrot.lane.b32.xlu0 %v4946_v30, %s4314_s5 }
 0x36b   : > { %2302 = vrot.lane.b32.xlu1 %v4925_v23, %s4314_s5 }
 0x36c   : > { %2100 = vrot.lane.b32.xlu0 %v4765_v18, %s4314_s5 }
 0x36f   : > { %2306 = vrot.lane.b32.xlu1 %v4955_v40, %s4314_s5 }
 0x370   : > { %2104 = vrot.lane.b32.xlu0 %v4773_v42, %s4314_s5 }
 0x373   : > { %2102 = vrot.lane.b32.xlu1 %v4769_v20, %s4314_s5 }
 0x374   : > { %2308 = vrot.lane.b32.xlu0 %v4976_v63, %s4314_s5 }
 0x377   : > { %2106 = vrot.lane.b32.xlu1 %v4777_v62, %s4314_s5 }
 0x378   : > { %2312 = vrot.lane.b32.xlu0 %v5006_v43, %s4314_s5 }
 0x37b   : > { %v1640_v16 = vpop.xlane.xlu0 %1639  ;;  %2310 = vrot.lane.b32.xlu1 %v4985_v13, %s4314_s5 }
 0x37c   : > { %v1686_v38 = vmul.f32 0.015625, %v1640_v16 }
 0x37e   : > { %v1782_v35 = vmul.f32 %v1686_v38, %v1686_v38  ;;  %v1814_v26 = vsub.f32 %v4805_v5, %v1686_v38 }
 0x37f   : > { %v1723_v44 = vpop.xlane.xlu1 %1722  ;;  %v1643_v0 = vpop.xlane.xlu0 %1642  ;;  %2314 = vrot.lane.b32.xlu1 %v1620_v59, %s4314_s5 }
 0x380   : > { %v1687_v45 = vmul.f32 0.015625, %v1643_v0  ;;  %v1767_v46 = vmul.f32 0.015625, %v1723_v44  ;;  %v5126_v0 = vld [vmem:[%s6074_s11] ss:$0 sm:$0xff] }
 0x382   : > { %v1783_v48 = vmul.f32 %v1687_v45, %v1687_v45  ;;  %v1815_v19 = vsub.f32 %v4812_v32, %v1687_v45 }
 0x383   : > { %v1720_v2 = vpop.xlane.xlu0 %1719  ;;  %v1646_v30 = vpop.xlane.xlu1 %1645 }
 0x384   : > { %v1799_v51 = vsub.f32 %v1767_v46, %v1783_v48  ;;  %v1766_v54 = vmul.f32 0.015625, %v1720_v2  ;;  %v1688_v56 = vmul.f32 0.015625, %v1646_v30 }
 0x386   : > { %v1831_v57 = vadd.f32 1e-05, %v1799_v51  ;;  %v1798_v43 = vsub.f32 %v1766_v54, %v1782_v35  ;;  %v1784_v18 = vmul.f32 %v1688_v56, %v1688_v56  ;;  %v1816_v35 = vsub.f32 %v4834_v1, %v1688_v56 }
 0x387   : > { %v1726_v20 = vpop.xlane.xlu0 %1725  ;;  %v1649_v42 = vpop.xlane.xlu1 %1648 }
 0x388   : > { %4016 = vrsqrt.f32 %v1831_v57  ;;  %v1830_v62 = vadd.f32 1e-05, %v1798_v43  ;;  %v1768_v63 = vmul.f32 0.015625, %v1726_v20  ;;  %v5106_v29 = vmul.f32 0.015625, %v1649_v42 }
 0x38a   : > { %4018 = vrsqrt.f32 %v1830_v62  ;;  %v1800_v17 = vsub.f32 %v1768_v63, %v1784_v18  ;;  %v1785_v60 = vmul.f32 %v5106_v29, %v5106_v29 }
 0x38b   : > { %v1729_v33 = vpop.xlane.xlu1 %1728  ;;  %v1652_v6 = vpop.xlane.xlu0 %1651 }
 0x38c   : > { %v1832_v49 = vadd.f32 1e-05, %v1800_v17  ;;  %v1769_v53 = vmul.f32 0.015625, %v1729_v33  ;;  %v5110_v31 = vmul.f32 0.015625, %v1652_v6 }
 0x38e   : > { %4020 = vrsqrt.f32 %v1832_v49  ;;  %v1801_v23 = vsub.f32 %v1769_v53, %v1785_v60  ;;  %v1786_v8 = vmul.f32 %v5110_v31, %v5110_v31  ;;  %v1817_v49 = vsub.f32 %v4841_v7, %v5106_v29 }
 0x38f   : > { %v1732_v40 = vpop.xlane.xlu0 %1731  ;;  %v1655_v13 = vpop.xlane.xlu1 %1654 }
 0x390   : > { %v1833_v59 = vadd.f32 1e-05, %v1801_v23  ;;  %v1770_v41 = vmul.f32 0.015625, %v1732_v40  ;;  %v5114_v27 = vmul.f32 0.015625, %v1655_v13 }
 0x392   : > { %v4017_v34 = vpop.eup %4016  ;;  %4022 = vrsqrt.f32 %v1833_v59  ;;  %v1802_v28 = vsub.f32 %v1770_v41, %v1786_v8  ;;  %v1787_v45 = vmul.f32 %v5114_v27, %v5114_v27 }
 0x393   : > { %v1863_v22 = vmul.f32 %v4017_v34, %v1815_v19  ;;  %v1735_v10 = vpop.xlane.xlu1 %1734  ;;  %v1658_v16 = vpop.xlane.xlu0 %1657 }
 0x394   : > { %v4019_v44 = vpop.eup %4018  ;;  %v1834_v32 = vadd.f32 1e-05, %v1802_v28  ;;  %v1771_v46 = vmul.f32 0.015625, %v1735_v10  ;;  %v5130_v48 = vmul.f32 0.015625, %v1658_v16 }
 0x395   : > { %v1886_v2 = vmul.f32 %v5120_v37, %v1863_v22  ;;  %v1862_v30 = vmul.f32 %v4019_v44, %v1814_v26  ;;  %v1818_v22 = vsub.f32 %v4868_v3, %v5110_v31  ;;  %v1819_v31 = vsub.f32 %v4871_v11, %v5114_v27 }
 0x396   : > { %4024 = vrsqrt.f32 %v1834_v32  ;;  %v1803_v5 = vsub.f32 %v1771_v46, %v1787_v45  ;;  %v1788_v20 = vmul.f32 %v5130_v48, %v5130_v48  ;;  %v1820_v11 = vsub.f32 %v4898_v15, %v5130_v48 }
 0x397   : > { %v5134_v38 = vadd.f32 %v5126_v0, %v1886_v2  ;;  %v1738_v51 = vpop.xlane.xlu0 %1737  ;;  %v1661_v54 = vpop.xlane.xlu1 %1660  ;;  %v1885_v57 = vmul.f32 %v5120_v37, %v1862_v30 }
 0x398   : > { %v4021_v43 = vpop.eup %4020  ;;  %v1835_v18 = vadd.f32 1e-05, %v1803_v5  ;;  %v1772_v42 = vmul.f32 0.015625, %v1738_v51  ;;  %v5140_v62 = vmul.f32 0.015625, %v1661_v54 }
 0x399   : > { %v1925_v63 = vsub.f32 0.0, %v5134_v38  ;;  %v1864_v17 = vmul.f32 %v4021_v43, %v1816_v35  ;;  %v5144_v33 = vadd.f32 %v5126_v0, %v1885_v57 }
 0x39a   : > { %4026 = vrsqrt.f32 %v1835_v18  ;;  %v1804_v1 = vsub.f32 %v1772_v42, %v1788_v20  ;;  %v1789_v59 = vmul.f32 %v5140_v62, %v5140_v62 }
 0x39b   : > { %v1942_v56 = vmul.f32 1.442695, %v1925_v63  ;;  %v1887_v6 = vmul.f32 %v5120_v37, %v1864_v17  ;;  %v1741_v60 = vpop.xlane.xlu1 %1740  ;;  %v1664_v53 = vpop.xlane.xlu0 %1663  ;;  %v1924_v23 = vsub.f32 0.0, %v5144_v33 }
 0x39c   : > { %v4023_v40 = vpop.eup %4022  ;;  %v1836_v13 = vadd.f32 1e-05, %v1804_v1  ;;  %v1773_v8 = vmul.f32 0.015625, %v1741_v60  ;;  %v5152_v41 = vmul.f32 0.015625, %v1664_v53 }
 0x39d   : > { %4028 = vpow2.f32 %v1942_v56  ;;  %v5155_v19 = vadd.f32 %v5126_v0, %v1887_v6  ;;  %v1865_v34 = vmul.f32 %v4023_v40, %v1817_v49  ;;  %v1940_v28 = vmul.f32 1.442695, %v1924_v23 }
 0x39e   : > { %4030 = vrsqrt.f32 %v1836_v13  ;;  %v1805_v7 = vsub.f32 %v1773_v8, %v1789_v59  ;;  %v1790_v45 = vmul.f32 %v5152_v41, %v5152_v41 }
 0x39f   : > { %v1926_v29 = vsub.f32 0.0, %v5155_v19  ;;  %v1888_v26 = vmul.f32 %v5120_v37, %v1865_v34  ;;  %v1744_v10 = vpop.xlane.xlu0 %1743  ;;  %v1667_v16 = vpop.xlane.xlu1 %1666  ;;  %4032 = vpow2.f32 %v1940_v28 }
 0x3a0   : > { %v4025_v44 = vpop.eup %4024  ;;  %v1837_v32 = vadd.f32 1e-05, %v1805_v7  ;;  %v1774_v46 = vmul.f32 0.015625, %v1744_v10  ;;  %v5163_v2 = vmul.f32 0.015625, %v1667_v16 }
 0x3a1   : > { %v1944_v30 = vmul.f32 1.442695, %v1926_v29  ;;  %v5166_v5 = vadd.f32 %v5126_v0, %v1888_v26  ;;  %v1866_v35 = vmul.f32 %v4025_v44, %v1818_v22  ;;  %v1821_v22 = vsub.f32 %v4901_v21, %v5140_v62 }
 0x3a2   : > { %4034 = vrsqrt.f32 %v1837_v32  ;;  %v1806_v51 = vsub.f32 %v1774_v46, %v1790_v45  ;;  %v1791_v42 = vmul.f32 %v5163_v2, %v5163_v2 }
 0x3a3   : > { %4036 = vpow2.f32 %v1944_v30  ;;  %v1927_v3 = vsub.f32 0.0, %v5166_v5  ;;  %v1747_v54 = vpop.xlane.xlu1 %1746  ;;  %v1670_v57 = vpop.xlane.xlu0 %1669  ;;  %v1889_v43 = vmul.f32 %v5120_v37, %v1866_v35 }
 0x3a4   : > { %v4027_v18 = vpop.eup %4026  ;;  %v1838_v20 = vadd.f32 1e-05, %v1806_v51  ;;  %v1775_v63 = vmul.f32 0.015625, %v1747_v54  ;;  %v5174_v17 = vmul.f32 0.015625, %v1670_v57 }
 0x3a5   : > { %v1946_v1 = vmul.f32 1.442695, %v1927_v3  ;;  %v1867_v56 = vmul.f32 %v4027_v18, %v1819_v31  ;;  %v5177_v6 = vadd.f32 %v5126_v0, %v1889_v43 }
 0x3a6   : > { %4038 = vrsqrt.f32 %v1838_v20  ;;  %v1807_v27 = vsub.f32 %v1775_v63, %v1791_v42  ;;  %v1792_v60 = vmul.f32 %v5174_v17, %v5174_v17  ;;  %v1822_v20 = vsub.f32 %v4928_v39, %v5152_v41 }
 0x3a7   : > { %v4029_v49 = vpop.eup %4028  ;;  %4040 = vpow2.f32 %v1946_v1  ;;  %v1750_v53 = vpop.xlane.xlu0 %1749  ;;  %v1890_v40 = vmul.f32 %v5120_v37, %v1867_v56  ;;  %v1928_v13 = vsub.f32 0.0, %v5177_v6 }
 0x3a8   : > { %v1673_v23 = vpop.xlane.xlu1 %1672  ;;  %v4031_v59 = vpop.eup %4030  ;;  %v1973_v8 = vadd.f32 1.0, %v4029_v49  ;;  %v1839_v34 = vadd.f32 1e-05, %v1807_v27  ;;  %v1776_v28 = vmul.f32 0.015625, %v1750_v53 }
 0x3a9   : > { %v5185_v7 = vmul.f32 0.015625, %v1673_v23  ;;  %v4033_v15 = vpop.eup %4032  ;;  %v5188_v48 = vadd.f32 %v5126_v0, %v1890_v40  ;;  %v1948_v29 = vmul.f32 1.442695, %v1928_v13  ;;  %v1868_v26 = vmul.f32 %v4031_v59, %v1820_v11 }
 0x3aa   : > { %4042 = vrcp.f32 %v1973_v8  ;;  %v1808_v10 = vsub.f32 %v1776_v28, %v1792_v60  ;;  %v1972_v45 = vadd.f32 1.0, %v4033_v15 }
 0x3ab   : > { %v1793_v16 = vmul.f32 %v5185_v7, %v5185_v7  ;;  %4044 = vrsqrt.f32 %v1839_v34  ;;  %v1676_v32 = vpop.xlane.xlu0 %1675  ;;  %v1929_v46 = vsub.f32 0.0, %v5188_v48  ;;  %v1891_v30 = vmul.f32 %v5120_v37, %v1868_v26 }
 0x3ac   : > { %v1753_v44 = vpop.xlane.xlu1 %1752  ;;  %v4035_v35 = vpop.eup %4034  ;;  %v1840_v51 = vadd.f32 1e-05, %v1808_v10  ;;  %v5196_v31 = vmul.f32 0.015625, %v1676_v32  ;;  %4046 = vpow2.f32 %v1948_v29  ;;  %v1823_v32 = vsub.f32 %v4931_v61, %v5163_v2 }
 0x3ad   : > { %v1777_v3 = vmul.f32 0.015625, %v1753_v44  ;;  %v4037_v54 = vpop.eup %4036  ;;  %4048 = vrcp.f32 %v1972_v45  ;;  %v1950_v21 = vmul.f32 1.442695, %v1929_v46  ;;  %v1869_v62 = vmul.f32 %v4035_v35, %v1821_v22 }
 0x3ae   : > { %v5199_v57 = vadd.f32 %v5126_v0, %v1891_v30  ;;  %v1974_v43 = vadd.f32 1.0, %v4037_v54  ;;  %4050 = vrsqrt.f32 %v1840_v51  ;;  %v1794_v49 = vmul.f32 %v5196_v31, %v5196_v31 }
 0x3af   : > { %v1809_v18 = vsub.f32 %v1777_v3, %v1793_v16  ;;  %v1756_v42 = vpop.xlane.xlu0 %1755  ;;  %4052 = vpow2.f32 %v1950_v21  ;;  %v1892_v1 = vmul.f32 %v5120_v37, %v1869_v62  ;;  %v1824_v45 = vsub.f32 %v4958_v25, %v5174_v17 }
 0x3b0   : > { %v1679_v63 = vpop.xlane.xlu1 %1678  ;;  %v1930_v56 = vsub.f32 0.0, %v5199_v57  ;;  %v4039_v11 = vpop.eup %4038  ;;  %v1778_v60 = vmul.f32 0.015625, %v1756_v42  ;;  %4054 = vrcp.f32 %v1974_v43 }
 0x3b1   : > { %v1841_v27 = vadd.f32 1e-05, %v1809_v18  ;;  %v5207_v53 = vmul.f32 0.015625, %v1679_v63  ;;  %v4041_v23 = vpop.eup %4040  ;;  %v5210_v40 = vadd.f32 %v5126_v0, %v1892_v1  ;;  %v1870_v41 = vmul.f32 %v4039_v11, %v1822_v20 }
 0x3b2   : > { %v1952_v39 = vmul.f32 1.442695, %v1930_v56  ;;  %v1975_v13 = vadd.f32 1.0, %v4041_v23  ;;  %v1810_v59 = vsub.f32 %v1778_v60, %v1794_v49 }
 0x3b3   : > { %4056 = vrsqrt.f32 %v1841_v27  ;;  %v1795_v8 = vmul.f32 %v5207_v53, %v5207_v53  ;;  %v1682_v28 = vpop.xlane.xlu0 %1681  ;;  %v1931_v15 = vsub.f32 0.0, %v5210_v40  ;;  %v1893_v29 = vmul.f32 %v5120_v37, %v1870_v41 }
 0x3b4   : > { %v1759_v34 = vpop.xlane.xlu1 %1758  ;;  %4058 = vpow2.f32 %v1952_v39  ;;  %v4043_v26 = vpop.eup %4042  ;;  %v1842_v22 = vadd.f32 1e-05, %v1810_v59  ;;  %v5216_v16 = vmul.f32 0.015625, %v1682_v28  ;;  %v1825_v27 = vsub.f32 %v4961_v50, %v5185_v7 }
 0x3b5   : > { %4060 = vrcp.f32 %v1975_v13  ;;  %v1779_v10 = vmul.f32 0.015625, %v1759_v34  ;;  %v4045_v44 = vpop.eup %4044  ;;  %v1954_v46 = vmul.f32 1.442695, %v1931_v15  ;;  %v5223_v30 = vadd.f32 %v5126_v0, %v1893_v29 }
 0x3b6   : > { %v4047_v35 = vpop.eup %4046  ;;  %4062 = vrsqrt.f32 %v1842_v22  ;;  %v1796_v3 = vmul.f32 %v5216_v16, %v5216_v16  ;;  %v2005_v54 = vmul.f32 %v4043_v26, %v5134_v38  ;;  %v1871_v61 = vmul.f32 %v4045_v44, %v1823_v32 }
 0x3b7   : > { %v1811_v51 = vsub.f32 %v1779_v10, %v1795_v8  ;;  %v4049_v21 = vpop.eup %4048  ;;  %v1762_v62 = vpop.xlane.xlu0 %1761  ;;  %v1976_v18 = vadd.f32 1.0, %v4047_v35  ;;  %4064 = vpow2.f32 %v1954_v46  ;;  %v1932_v25 = vsub.f32 0.0, %v5223_v30 }
 0x3b8   : > { %v1685_v43 = vpop.xlane.xlu1 %1684  ;;  %v4051_v2 = vpop.eup %4050  ;;  %v1780_v20 = vmul.f32 0.015625, %v1762_v62  ;;  %v2004_v63 = vmul.f32 %v4049_v21, %v5144_v33  ;;  %v1894_v56 = vmul.f32 %v5120_v37, %v1871_v61  ;;  %v1826_v50 = vsub.f32 %v4988_v12, %v5196_v31 }
 0x3b9   : > { %v1843_v17 = vadd.f32 1e-05, %v1811_v51  ;;  %v5229_v42 = vmul.f32 0.015625, %v1685_v43  ;;  %v4053_v1 = vpop.eup %4052  ;;  %4066 = vrcp.f32 %v1976_v18  ;;  %v1956_v38 = vmul.f32 1.442695, %v1932_v25 }
 0x3ba   : > { %v1872_v11 = vmul.f32 %v4051_v2, %v1824_v45  ;;  %v1812_v49 = vsub.f32 %v1780_v20, %v1796_v3  ;;  %v4055_v60 = vpop.eup %4054  ;;  %v2020_v39 = vpack.c.bf16 %v2005_v54, %v2004_v63  ;;  %v1977_v13 = vadd.f32 1.0, %v4053_v1 }
 0x3bb   : > { %4068 = vrsqrt.f32 %v1843_v17  ;;  %v1797_v23 = vmul.f32 %v5229_v42, %v5229_v42  ;;  %v5238_v33 = vadd.f32 %v5126_v0, %v1894_v56  ;;  %v2006_v32 = vmul.f32 %v4055_v60, %v5155_v19 }
 0x3bc   : > { %v1765_v41 = vpop.xlane.xlu1 %1764  ;;  %v1844_v8 = vadd.f32 1e-05, %v1812_v49  ;;  %4070 = vpow2.f32 %v1956_v38  ;;  %v1895_v28 = vmul.f32 %v5120_v37, %v1872_v11  ;;  %3785 = vmatprep.mubr.msk.bf16.mxu0 %vm1637_vm2, %v2020_v39  ;;  %v1828_v38 = vsub.f32 %v5016_v52, %v5216_v16 }
 0x3bd   : > { %v4057_v59 = vpop.eup %4056  ;;  %v1781_v34 = vmul.f32 0.015625, %v1765_v41  ;;  %4072 = vrcp.f32 %v1977_v13  ;;  %v1933_v7 = vsub.f32 0.0, %v5238_v33  ;;  %v1829_v52 = vsub.f32 %v5018_v47, %v5229_v42 }
 0x3be   : > { %v4059_v15 = vpop.eup %4058  ;;  %v1873_v29 = vmul.f32 %v4057_v59, %v1825_v27  ;;  %4074 = vrsqrt.f32 %v1844_v8  ;;  %v5246_v44 = vadd.f32 %v5126_v0, %v1895_v28 }
 0x3bf   : > { %v4061_v26 = vpop.eup %4060  ;;  %v1813_v22 = vsub.f32 %v1781_v34, %v1797_v23  ;;  %v1978_v10 = vadd.f32 1.0, %v4059_v15  ;;  %v1958_v46 = vmul.f32 1.442695, %v1933_v7 }
 0x3c0   : > { %v2007_v45 = vmul.f32 %v4061_v26, %v5166_v5  ;;  %v1896_v12 = vmul.f32 %v5120_v37, %v1873_v29  ;;  %v4063_v31 = vpop.eup %4062  ;;  %v1934_v51 = vsub.f32 0.0, %v5246_v44  ;;  %v1827_v5 = vsub.f32 %v4991_v55, %v5207_v53 }
 0x3c1   : > { %v1845_v35 = vadd.f32 1e-05, %v1813_v22  ;;  %4076 = vrcp.f32 %v1978_v10  ;;  %v4065_v3 = vpop.eup %4064  ;;  %v1874_v62 = vmul.f32 %v4063_v31, %v1826_v50 }
 0x3c2   : > { %v2021_v54 = vpack.c.bf16 %v2007_v45, %v2006_v32  ;;  %4078 = vpow2.f32 %v1958_v46  ;;  %v5253_v21 = vadd.f32 %v5126_v0, %v1896_v12  ;;  %v1979_v43 = vadd.f32 1.0, %v4065_v3 }
 0x3c3   : > { %4080 = vrsqrt.f32 %v1845_v35  ;;  %v1960_v19 = vmul.f32 1.442695, %v1934_v51  ;;  %v4067_v18 = vpop.eup %4066  ;;  %v1897_v25 = vmul.f32 %v5120_v37, %v1874_v62 }
 0x3c4   : > { %3786 = vmatmul.mubr.msk.bf16.vlgmr.msra.gmra.mrb[40].mxu0 %vm1637_vm2, %v2021_v54  ;;  %v1935_v61 = vsub.f32 0.0, %v5253_v21  ;;  %4082 = vrcp.f32 %v1979_v43  ;;  %v2008_v27 = vmul.f32 %v4067_v18, %v5177_v6 }
 0x3c5   : > { %v4069_v2 = vpop.eup %4068  ;;  %4084 = vpow2.f32 %v1960_v19  ;;  %v5261_v63 = vadd.f32 %v5126_v0, %v1897_v25 }
 0x3c6   : > { %v1962_v17 = vmul.f32 1.442695, %v1935_v61  ;;  %v1875_v20 = vmul.f32 %v4069_v2, %v1827_v5  ;;  %v4071_v1 = vpop.eup %4070 }
 0x3c7   : > { %v4073_v56 = vpop.eup %4072  ;;  %v1936_v53 = vsub.f32 0.0, %v5261_v63  ;;  %v1980_v60 = vadd.f32 1.0, %v4071_v1 }
 0x3c8   : > { %4086 = vpow2.f32 %v1962_v17  ;;  %v1898_v55 = vmul.f32 %v5120_v37, %v1875_v20  ;;  %v4075_v11 = vpop.eup %4074  ;;  %v2009_v49 = vmul.f32 %v4073_v56, %v5188_v48 }
 0x3c9   : > { %v1876_v23 = vmul.f32 %v4075_v11, %v1828_v38  ;;  %v1964_v41 = vmul.f32 1.442695, %v1936_v53 }
 0x3ca   : > { %v5270_v39 = vadd.f32 %v5126_v0, %v1898_v55  ;;  %v2022_v59 = vpack.c.bf16 %v2009_v49, %v2008_v27 }
 0x3cb   : > { %v4077_v13 = vpop.eup %4076  ;;  %4088 = vpow2.f32 %v1964_v41  ;;  %v1899_v34 = vmul.f32 %v5120_v37, %v1876_v23  ;;  %v2077_v41 = vpop.permute.xlu0 %2076 }
 0x3cc   : > { %v4079_v8 = vpop.eup %4078  ;;  %v1937_v16 = vsub.f32 0.0, %v5270_v39  ;;  %3789 = vmatprep.mubr.msk.bf16.mxu0 %vm1637_vm2, %v2022_v59  ;;  %4090 = vrcp.f32 %v1980_v60  ;;  %v2010_v29 = vmul.f32 %v4077_v13, %v5199_v57  ;;  %v2079_v60 = vpop.permute.xlu1 %2078 }
 0x3cd   : > { %v4081_v6 = vpop.eup %4080  ;;  %v1981_v48 = vadd.f32 1.0, %v4079_v8  ;;  %v1922_v50 = vadd.f32 %v5126_v0, %v1899_v34 }
 0x3ce   : > { %v1877_v28 = vmul.f32 %v4081_v6, %v1829_v52  ;;  %v1966_v15 = vmul.f32 1.442695, %v1937_v16  ;;  %v4083_v7 = vpop.eup %4082 }
 0x3cf   : > { %4092 = vrcp.f32 %v1981_v48  ;;  %v4085_v26 = vpop.eup %4084  ;;  %v2011_v47 = vmul.f32 %v4083_v7, %v5210_v40  ;;  %v1938_v22 = vsub.f32 0.0, %v1922_v50  ;;  %v2285_v59 = vpop.permute.xlu0 %2284 }
 0x3d0   : > { %4094 = vpow2.f32 %v1966_v15  ;;  %v1900_v42 = vmul.f32 %v5120_v37, %v1877_v28  ;;  %v1982_v10 = vadd.f32 1.0, %v4085_v26  ;;  %v2081_v23 = vpop.permute.xlu1 %2080 }
 0x3d1   : > { %v2023_v45 = vpack.c.bf16 %v2011_v47, %v2010_v29  ;;  %v1968_v12 = vmul.f32 1.442695, %v1938_v22 }
 0x3d2   : > { %v4087_v32 = vpop.eup %4086  ;;  %v1923_v46 = vadd.f32 %v5126_v0, %v1900_v42  ;;  %4096 = vrcp.f32 %v1982_v10 }
 0x3d3   : > { %v1983_v31 = vadd.f32 1.0, %v4087_v32  ;;  %3790 = vmatmul.mubr.msk.bf16.gmra.mrb[44].mxu0 %vm1637_vm2, %v2023_v45  ;;  %4098 = vpow2.f32 %v1968_v12  ;;  %v2289_v52 = vpop.permute.xlu0 %2288 }
 0x3d4   : > { %v1939_v35 = vsub.f32 0.0, %v1923_v46  ;;  %v2083_v13 = vpop.permute.xlu1 %2082 }
 0x3d5   : > { %4100 = vrcp.f32 %v1983_v31  ;;  %v4089_v57 = vpop.eup %4088 }
 0x3d6   : > { %v1970_v51 = vmul.f32 1.442695, %v1939_v35  ;;  %v4091_v40 = vpop.eup %4090  ;;  %v1984_v3 = vadd.f32 1.0, %v4089_v57 }
 0x3d7   : > { %v2012_v62 = vmul.f32 %v4091_v40, %v5223_v30  ;;  %v2085_v16 = vpop.permute.xlu0 %2084 }
 0x3d8   : > { %4102 = vpow2.f32 %v1970_v51  ;;  %v2287_v8 = vpop.permute.xlu1 %2286 }
 0x3d9   : > { %v4093_v37 = vpop.eup %4092  ;;  %4104 = vrcp.f32 %v1984_v3 }
 0x3da   : > { %v4095_v54 = vpop.eup %4094  ;;  %v2013_v43 = vmul.f32 %v4093_v37, %v5238_v33 }
 0x3db   : > { %v1985_v0 = vadd.f32 1.0, %v4095_v54  ;;  %v2089_v34 = vpop.permute.xlu0 %2088 }
 0x3dc   : > { %v2024_v19 = vpack.c.bf16 %v2013_v43, %v2012_v62  ;;  %v4097_v18 = vpop.eup %4096 }
 0x3dd   : > { %4106 = vrcp.f32 %v1985_v0  ;;  %v4099_v5 = vpop.eup %4098  ;;  %v2014_v2 = vmul.f32 %v4097_v18, %v5246_v44 }
 0x3de   : > { %3793 = vmatprep.mubr.msk.bf16.mxu0 %vm1637_vm2, %v2024_v19  ;;  %v1986_v25 = vadd.f32 1.0, %v4099_v5 }
 0x3df   : > { %v4101_v61 = vpop.eup %4100  ;;  %v5293_v48 = vpop.permute.xlu0 %2292 }
 0x3e0   : > { %v2015_v17 = vmul.f32 %v4101_v61, %v5253_v21  ;;  %4108 = vrcp.f32 %v1986_v25 }
 0x3e2   : > { %v4103_v20 = vpop.eup %4102  ;;  %v2025_v1 = vpack.c.bf16 %v2015_v17, %v2014_v2 }
 0x3e3   : > { %v1987_v56 = vadd.f32 1.0, %v4103_v20  ;;  %v4105_v30 = vpop.eup %4104 }
 0x3e4   : > { %3794 = vmatmul.mubr.msk.bf16.gmra.mrb[48].mxu0 %vm1637_vm2, %v2025_v1  ;;  %v2016_v38 = vmul.f32 %v4105_v30, %v5261_v63  ;;  %v2291_v63 = vpop.permute.xlu1 %2290 }
 0x3e5   : > { %4110 = vrcp.f32 %v1987_v56 }
 0x3e7   : > { %v4107_v33 = vpop.eup %4106 }
 0x3e8   : > { %v2017_v55 = vmul.f32 %v4107_v33, %v5270_v39  ;;  %v2087_v39 = vpop.permute.xlu1 %2086 }
 0x3ea   : > { %v2026_v53 = vpack.c.bf16 %v2017_v55, %v2016_v38  ;;  %v4109_v11 = vpop.eup %4108 }
 0x3eb   : > { %v2018_v27 = vmul.f32 %v4109_v11, %v1922_v50  ;;  %v5298_v50 = vld [vmem:[%s6076_s13] ss:$0 sm:$0xff] }
 0x3ec   : > { %3797 = vmatprep.mubr.msk.bf16.mxu0 %vm1637_vm2, %v2026_v53  ;;  %v2091_v6 = vpop.permute.xlu1 %2090 }
 0x3ef   : > { %v4111_v44 = vpop.eup %4110 }
 0x3f0   : > { %v2019_v21 = vmul.f32 %v4111_v44, %v1923_v46  ;;  %v2295_v28 = vpop.permute.xlu1 %2294  ;;  %v2297_v46 = vpop.permute.xlu0 %2296 }
 0x3f2   : > { %v2027_v49 = vpack.c.bf16 %v2019_v21, %v2018_v27 }
 0x3f4   : > { %3798 = vmatmul.mubr.msk.bf16.gmra.mrb[52].mxu0 %vm1637_vm2, %v2027_v49  ;;  %v2299_v35 = vpop.permute.xlu1 %2298  ;;  %v5318_v43 = vpop.permute.xlu0 %2092 }
 0x3f8   : > { %v5322_v19 = vpop.permute.xlu1 %2094  ;;  %v2097_v17 = vpop.permute.xlu0 %2096 }
 0x3fc   : > { %v2099_v56 = vpop.permute.xlu1 %2098 }
 0x497   : > { %v3787_v15 = vpop.f32.mrb[40].mxu0 }
 0x498   : > { %v2191_v7 = vadd.f32 %v3787_v15, %v2081_v23  ;;  %v2182_v29 = vpop.f32.mrb[41].mxu0  ;;  %v2301_v23 = vpop.permute.xlu0 %2300 }
 0x499   : > { %v2183_v26 = vadd.f32 %v2182_v29, %v2077_v41  ;;  %v3788_v47 = vpop.f32.mrb[42].mxu0 }
 0x49a   : > { %v2254_v42 = vadd.f32 %v5298_v50, %v2191_v7  ;;  %v2194_v22 = vadd.f32 %v3788_v47, %v2083_v13  ;;  %v2185_v10 = vpop.f32.mrb[43].mxu0 }
 0x49b   : > { %v2252_v32 = vadd.f32 %v5298_v50, %v2183_v26  ;;  %v2186_v45 = vadd.f32 %v2185_v10, %v2079_v60 }
 0x49c   : > { %v5302_v12 = vmul.f32 %v2289_v52, %v2254_v42  ;;  %v2255_v31 = vadd.f32 %v5298_v50, %v2194_v22  ;;  %v2303_v52 = vpop.permute.xlu1 %2302 }
 0x49d   : > { %v2253_v57 = vadd.f32 %v5298_v50, %v2186_v45  ;;  %v5306_v51 = vmul.f32 %v2285_v59, %v2252_v32 }
 0x49e   : > { %v5308_v40 = vmul.f32 %v2291_v63, %v2255_v31  ;;  %v2354_v3 = vsel %vm1637_vm2, %v5302_v12, 0.0  ;;  %v2414_v25 = vmul.f32 %v5302_v12, %v5302_v12 }
 0x49f   : > { %v5312_v37 = vmul.f32 %v2287_v8, %v2253_v57  ;;  %2355 = vadd.xlane.f32.xlu0 %v2354_v3  ;;  %v2348_v0 = vsel %vm1637_vm2, %v5306_v51, 0.0  ;;  %v2412_v38 = vmul.f32 %v5306_v51, %v5306_v51 }
 0x4a0   : > { %v2415_v62 = vmul.f32 %v5308_v40, %v5308_v40  ;;  %v2357_v61 = vsel %vm1637_vm2, %v5308_v40, 0.0  ;;  %v2434_v27 = vsel %vm1637_vm2, %v2414_v25, 0.0  ;;  %v2307_v29 = vpop.permute.xlu1 %2306 }
 0x4a1   : > { %v2351_v54 = vsel %vm1637_vm2, %v5312_v37, 0.0  ;;  %v2413_v5 = vmul.f32 %v5312_v37, %v5312_v37  ;;  %v2428_v8 = vsel %vm1637_vm2, %v2412_v38, 0.0 }
 0x4a2   : > { %2352 = vadd.xlane.f32.xlu1 %v2351_v54  ;;  %v2437_v18 = vsel %vm1637_vm2, %v2415_v62, 0.0 }
 0x4a3   : > { %2349 = vadd.xlane.f32.xlu0 %v2348_v0  ;;  %v2431_v33 = vsel %vm1637_vm2, %v2413_v5, 0.0 }
 0x4a4   : > { %v2103_v0 = vpop.permute.xlu1 %2102 }
 0x4a6   : > { %2438 = vadd.xlane.f32.xlu1 %v2437_v18  ;;  %v3791_v2 = vpop.f32.mrb[44].mxu0 }
 0x4a7   : > { %2358 = vadd.xlane.f32.xlu0 %v2357_v61  ;;  %v2207_v20 = vadd.f32 %v3791_v2, %v2089_v34  ;;  %v2198_v1 = vpop.f32.mrb[45].mxu0 }
 0x4a8   : > { %v3792_v30 = vpop.f32.mrb[46].mxu0  ;;  %v2199_v53 = vadd.f32 %v2198_v1, %v2085_v16 }
 0x4a9   : > { %v2258_v55 = vadd.f32 %v5298_v50, %v2207_v20  ;;  %v2210_v11 = vadd.f32 %v3792_v30, %v2091_v6  ;;  %v2201_v44 = vpop.f32.mrb[47].mxu0  ;;  %v2305_v6 = vpop.permute.xlu0 %2304 }
 0x4aa   : > { %2432 = vadd.xlane.f32.xlu1 %v2431_v33  ;;  %v2202_v21 = vadd.f32 %v2201_v44, %v2087_v39  ;;  %v2256_v13 = vadd.f32 %v5298_v50, %v2199_v53  ;;  %v2107_v30 = vpop.permute.xlu1 %2106 }
 0x4ab   : > { %2435 = vadd.xlane.f32.xlu0 %v2434_v27  ;;  %v2259_v49 = vadd.f32 %v5298_v50, %v2210_v11  ;;  %v5338_v41 = vmul.f32 %v2297_v46, %v2258_v55 }
 0x4ac   : > { %v2257_v60 = vadd.f32 %v5298_v50, %v2202_v21  ;;  %v5349_v39 = vmul.f32 %v5293_v48, %v2256_v13 }
 0x4ad   : > { %v5341_v59 = vmul.f32 %v2299_v35, %v2259_v49  ;;  %v2366_v34 = vsel %vm1637_vm2, %v5338_v41, 0.0  ;;  %v2418_v26 = vmul.f32 %v5338_v41, %v5338_v41  ;;  %v2101_v31 = vpop.permute.xlu0 %2100 }
 0x4ae   : > { %v5344_v63 = vmul.f32 %v2295_v28, %v2257_v60  ;;  %v3880_v28 = vld [vmem:[%s6079_s16] sm:$0xff]   ;;  %v2360_v48 = vsel %vm1637_vm2, %v5349_v39, 0.0  ;;  %v2416_v46 = vmul.f32 %v5349_v39, %v5349_v39  ;;  %v2311_v21 = vpop.permute.xlu1 %2310 }
 0x4af   : > { %2429 = vadd.xlane.f32.xlu0 %v2428_v8  ;;  %v2369_v16 = vsel %vm1637_vm2, %v5341_v59, 0.0  ;;  %v2419_v7 = vmul.f32 %v5341_v59, %v5341_v59  ;;  %3801 = vmatprep.subr.bf16.mxu1 %v3880_v28  ;;  %v2446_v62 = vsel %vm1637_vm2, %v2418_v26, 0.0 }
 0x4b0   : > { %2370 = vadd.xlane.f32.xlu1 %v2369_v16  ;;  %v2363_v15 = vsel %vm1637_vm2, %v5344_v63, 0.0  ;;  %3802 = vmatpush3.bf16.msra.mxu1 %v3880_v28  ;;  %v2417_v32 = vmul.f32 %v5344_v63, %v5344_v63  ;;  %v2440_v20 = vsel %vm1637_vm2, %v2416_v46, 0.0 }
 0x4b1   : > { %v2449_v10 = vsel %vm1637_vm2, %v2419_v7, 0.0  ;;  %v2105_v1 = vpop.permute.xlu0 %2104 }
 0x4b2   : > { %v2443_v61 = vsel %vm1637_vm2, %v2417_v32, 0.0 }
 0x4b3   : > { %2367 = vadd.xlane.f32.xlu0 %v2366_v34 }
 0x4b4   : > { %2364 = vadd.xlane.f32.xlu1 %v2363_v15 }
 0x4b5   : > { %v2309_v11 = vpop.permute.xlu0 %2308 }
 0x4b7   : > { %v3795_v47 = vpop.f32.mrb[48].mxu0  ;;  %2361 = vadd.xlane.f32.xlu0 %v2360_v48 }
 0x4b8   : > { %v2223_v42 = vadd.f32 %v3795_v47, %v2097_v17  ;;  %v2214_v22 = vpop.f32.mrb[49].mxu0  ;;  %2450 = vadd.xlane.f32.xlu1 %v2449_v10 }
 0x4b9   : > { %v3796_v45 = vpop.f32.mrb[50].mxu0  ;;  %v2215_v57 = vadd.f32 %v2214_v22, %v5318_v43  ;;  %v2313_v47 = vpop.permute.xlu0 %2312 }
 0x4ba   : > { %v2262_v35 = vadd.f32 %v5298_v50, %v2223_v42  ;;  %v2226_v3 = vadd.f32 %v3796_v45, %v2099_v56  ;;  %v2217_v54 = vpop.f32.mrb[51].mxu0  ;;  %v2315_v42 = vpop.permute.xlu1 %2314 }
 0x4bb   : > { %v2218_v18 = vadd.f32 %v2217_v54, %v5322_v19  ;;  %2447 = vadd.xlane.f32.xlu0 %v2446_v62  ;;  %v2260_v17 = vadd.f32 %v5298_v50, %v2215_v57 }
 0x4bc   : > { %v2263_v5 = vadd.f32 %v5298_v50, %v2226_v3  ;;  %2444 = vadd.xlane.f32.xlu1 %v2443_v61  ;;  %v5376_v2 = vmul.f32 %v2305_v6, %v2262_v35 }
 0x4bd   : > { %v2261_v25 = vadd.f32 %v5298_v50, %v2218_v18  ;;  %v5386_v33 = vmul.f32 %v2301_v23, %v2260_v17 }
 0x4be   : > { %v5379_v43 = vmul.f32 %v2307_v29, %v2263_v5  ;;  %v2378_v38 = vsel %vm1637_vm2, %v5376_v2, 0.0  ;;  %v2422_v27 = vmul.f32 %v5376_v2, %v5376_v2 }
 0x4bf   : > { %2441 = vadd.xlane.f32.xlu0 %v2440_v20  ;;  %v5382_v56 = vmul.f32 %v2303_v52, %v2261_v25  ;;  %v2372_v44 = vsel %vm1637_vm2, %v5386_v33, 0.0  ;;  %v2420_v16 = vmul.f32 %v5386_v33, %v5386_v33 }
 0x4c0   : > { %v2381_v19 = vsel %vm1637_vm2, %v5379_v43, 0.0  ;;  %v2423_v53 = vmul.f32 %v5379_v43, %v5379_v43  ;;  %v2458_v28 = vsel %vm1637_vm2, %v2422_v27, 0.0 }
 0x4c1   : > { %2382 = vadd.xlane.f32.xlu1 %v2381_v19  ;;  %v2375_v55 = vsel %vm1637_vm2, %v5382_v56, 0.0  ;;  %v2421_v8 = vmul.f32 %v5382_v56, %v5382_v56  ;;  %v2452_v46 = vsel %vm1637_vm2, %v2420_v16, 0.0  ;;  %v3882_v19 = vld [vmem:[%s6079_s16 + $0x10] sm:$0xff]  }
 0x4c2   : > { %v2461_v13 = vsel %vm1637_vm2, %v2423_v53, 0.0 }
 0x4c3   : > { %2379 = vadd.xlane.f32.xlu0 %v2378_v38  ;;  %v2455_v26 = vsel %vm1637_vm2, %v2421_v8, 0.0 }
 0x4c5   : > { %2376 = vadd.xlane.f32.xlu1 %v2375_v55 }
 0x4c7   : > { %v3799_v49 = vpop.f32.mrb[52].mxu0  ;;  %2373 = vadd.xlane.f32.xlu0 %v2372_v44 }
 0x4c8   : > { %v2239_v60 = vadd.f32 %v3799_v49, %v2105_v1  ;;  %v2230_v23 = vpop.f32.mrb[53].mxu0  ;;  %v3881_v1 = vld [vmem:[%s6079_s16 + $0x8] sm:$0xff]  }
 0x4c9   : > { %v3800_v52 = vpop.f32.mrb[54].mxu0  ;;  %2462 = vadd.xlane.f32.xlu1 %v2461_v13  ;;  %v2231_v6 = vadd.f32 %v2230_v23, %v2101_v31  ;;  %3803 = vmatprep.subr.bf16.mxu1 %v3881_v1 }
 0x4ca   : > { %v2266_v34 = vadd.f32 %v5298_v50, %v2239_v60  ;;  %v2242_v15 = vadd.f32 %v3800_v52, %v2107_v30  ;;  %v2233_v7 = vpop.f32.mrb[55].mxu0  ;;  %3804 = vmatpush3.bf16.msra.mxu1 %v3881_v1  ;;  %v3883_v30 = vld [vmem:[%s6079_s16 + $0x18] sm:$0xff]   ;;  %v5462_v1 = vld [vmem:[%s6077_s14] ss:$0 sm:$0xff] }
 0x4cb   : > { %v2234_v29 = vadd.f32 %v2233_v7, %v2103_v0  ;;  %2459 = vadd.xlane.f32.xlu0 %v2458_v28  ;;  %v2264_v32 = vadd.f32 %v5298_v50, %v2231_v6  ;;  %3805 = vmatprep.subr.bf16.mxu1 %v3882_v19 }
 0x4cc   : > { %v2267_v48 = vadd.f32 %v5298_v50, %v2242_v15  ;;  %v5408_v10 = vmul.f32 %v2313_v47, %v2266_v34 }
 0x4cd   : > { %v2265_v22 = vadd.f32 %v5298_v50, %v2234_v29  ;;  %2456 = vadd.xlane.f32.xlu1 %v2455_v26  ;;  %v5418_v57 = vmul.f32 %v2309_v11, %v2264_v32 }
 0x4ce   : > { %v5411_v45 = vmul.f32 %v2315_v42, %v2267_v48  ;;  %v2390_v3 = vsel %vm1637_vm2, %v5408_v10, 0.0  ;;  %v2426_v25 = vmul.f32 %v5408_v10, %v5408_v10  ;;  %3806 = vmatpush3.bf16.msra.mxu1 %v3882_v19 }
 0x4cf   : > { %2453 = vadd.xlane.f32.xlu0 %v2452_v46  ;;  %v5414_v31 = vmul.f32 %v2311_v21, %v2265_v22  ;;  %v2384_v62 = vsel %vm1637_vm2, %v5418_v57, 0.0  ;;  %v2424_v0 = vmul.f32 %v5418_v57, %v5418_v57  ;;  %3807 = vmatprep.subr.bf16.mxu1 %v3883_v30 }
 0x4d0   : > { %v2393_v35 = vsel %vm1637_vm2, %v5411_v45, 0.0  ;;  %v2427_v5 = vmul.f32 %v5411_v45, %v5411_v45  ;;  %v2470_v20 = vsel %vm1637_vm2, %v2426_v25, 0.0 }
 0x4d1   : > { %2394 = vadd.xlane.f32.xlu1 %v2393_v35  ;;  %v2387_v50 = vsel %vm1637_vm2, %v5414_v31, 0.0  ;;  %v2425_v54 = vmul.f32 %v5414_v31, %v5414_v31  ;;  %v2464_v61 = vsel %vm1637_vm2, %v2424_v0, 0.0 }
 0x4d2   : > { %v2473_v17 = vsel %vm1637_vm2, %v2427_v5, 0.0  ;;  %3808 = vmatpush3.bf16.msra.mxu1 %v3883_v30 }
 0x4d3   : > { %2391 = vadd.xlane.f32.xlu0 %v2390_v3  ;;  %v2467_v18 = vsel %vm1637_vm2, %v2425_v54, 0.0 }
 0x4d5   : > { %2388 = vadd.xlane.f32.xlu1 %v2387_v50 }
 0x4d7   : > { %2385 = vadd.xlane.f32.xlu0 %v2384_v62 }
 0x4d9   : > { %2468 = vadd.xlane.f32.xlu1 %v2467_v18 }
 0x4db   : > { %2465 = vadd.xlane.f32.xlu0 %v2464_v61 }
 0x4dd   : > { %2474 = vadd.xlane.f32.xlu1 %v2473_v17 }
 0x4df   : > { %2471 = vadd.xlane.f32.xlu0 %v2470_v20 }
 0x52c   : > { %v2356_v38 = vpop.xlane.xlu0 %2355 }
 0x52d   : > { %v2398_v21 = vmul.f32 0.015625, %v2356_v38 }
 0x52f   : > { %v2353_v55 = vpop.xlane.xlu1 %2352  ;;  %v2494_v34 = vmul.f32 %v2398_v21, %v2398_v21 }
 0x530   : > { %v2350_v53 = vpop.xlane.xlu0 %2349  ;;  %v2397_v44 = vmul.f32 0.015625, %v2353_v55  ;;  %v2526_v55 = vsub.f32 %v5302_v12, %v2398_v21 }
 0x531   : > { %v5447_v6 = vmul.f32 0.015625, %v2350_v53 }
 0x532   : > { %v2493_v8 = vmul.f32 %v2397_v44, %v2397_v44  ;;  %v2525_v20 = vsub.f32 %v5312_v37, %v2397_v44  ;;  %v5472_v37 = vld [vmem:[%s6078_s15] ss:$0 sm:$0xff] }
 0x533   : > { %v2439_v11 = vpop.xlane.xlu1 %2438  ;;  %v2492_v42 = vmul.f32 %v5447_v6, %v5447_v6 }
 0x534   : > { %v2359_v27 = vpop.xlane.xlu0 %2358  ;;  %v2479_v60 = vmul.f32 0.015625, %v2439_v11 }
 0x535   : > { %v2399_v49 = vmul.f32 0.015625, %v2359_v27 }
 0x537   : > { %v2495_v23 = vmul.f32 %v2399_v49, %v2399_v49  ;;  %v2433_v13 = vpop.xlane.xlu1 %2432  ;;  %v2527_v5 = vsub.f32 %v5308_v40, %v2399_v49 }
 0x538   : > { %v2477_v52 = vmul.f32 0.015625, %v2433_v13  ;;  %v2436_v16 = vpop.xlane.xlu0 %2435 }
 0x539   : > { %v2511_v15 = vsub.f32 %v2479_v60, %v2495_v23  ;;  %v2478_v7 = vmul.f32 0.015625, %v2436_v16 }
 0x53a   : > { %v2509_v28 = vsub.f32 %v2477_v52, %v2493_v8 }
 0x53b   : > { %v2543_v29 = vadd.f32 1e-05, %v2511_v15  ;;  %v2510_v48 = vsub.f32 %v2478_v7, %v2494_v34  ;;  %v2524_v7 = vsub.f32 %v5306_v51, %v5447_v6 }
 0x53c   : > { %v2541_v26 = vadd.f32 1e-05, %v2509_v28  ;;  %v2430_v47 = vpop.xlane.xlu0 %2429 }
 0x53d   : > { %4112 = vrsqrt.f32 %v2543_v29  ;;  %v2542_v22 = vadd.f32 1e-05, %v2510_v48  ;;  %v2476_v32 = vmul.f32 0.015625, %v2430_v47  ;;  %v2371_v46 = vpop.xlane.xlu1 %2370 }
 0x53e   : > { %4114 = vrsqrt.f32 %v2541_v26  ;;  %v5451_v62 = vmul.f32 0.015625, %v2371_v46 }
 0x53f   : > { %4116 = vrsqrt.f32 %v2542_v22  ;;  %v2508_v35 = vsub.f32 %v2476_v32, %v2492_v42 }
 0x540   : > { %v2368_v3 = vpop.xlane.xlu0 %2367  ;;  %v2499_v19 = vmul.f32 %v5451_v62, %v5451_v62 }
 0x541   : > { %v2540_v50 = vadd.f32 1e-05, %v2508_v35  ;;  %v2365_v54 = vpop.xlane.xlu1 %2364  ;;  %v5453_v18 = vmul.f32 0.015625, %v2368_v3 }
 0x542   : > { %v5456_v61 = vmul.f32 0.015625, %v2365_v54 }
 0x543   : > { %4118 = vrsqrt.f32 %v2540_v50  ;;  %v2498_v49 = vmul.f32 %v5453_v18, %v5453_v18 }
 0x544   : > { %v2362_v0 = vpop.xlane.xlu0 %2361  ;;  %v2497_v12 = vmul.f32 %v5456_v61, %v5456_v61 }
 0x545   : > { %v2451_v25 = vpop.xlane.xlu1 %2450  ;;  %v5467_v40 = vmul.f32 0.015625, %v2362_v0 }
 0x546   : > { %v2483_v30 = vmul.f32 0.015625, %v2451_v25 }
 0x547   : > { %v4113_v17 = vpop.eup %4112  ;;  %v2496_v48 = vmul.f32 %v5467_v40, %v5467_v40 }
 0x548   : > { %v4115_v38 = vpop.eup %4114  ;;  %v2575_v53 = vmul.f32 %v4113_v17, %v2527_v5  ;;  %v2448_v11 = vpop.xlane.xlu0 %2447  ;;  %v2515_v60 = vsub.f32 %v2483_v30, %v2499_v19 }
 0x549   : > { %v4117_v27 = vpop.eup %4116  ;;  %v2573_v44 = vmul.f32 %v4115_v38, %v2525_v20  ;;  %v2482_v23 = vmul.f32 0.015625, %v2448_v11  ;;  %v2445_v21 = vpop.xlane.xlu1 %2444 }
 0x54a   : > { %v2598_v13 = vmul.f32 %v5462_v1, %v2575_v53  ;;  %v2574_v8 = vmul.f32 %v4117_v27, %v2526_v55  ;;  %v2547_v52 = vadd.f32 1e-05, %v2515_v60  ;;  %v2481_v34 = vmul.f32 0.015625, %v2445_v21 }
 0x54b   : > { %v2514_v16 = vsub.f32 %v2482_v23, %v2498_v49  ;;  %v2596_v15 = vmul.f32 %v5462_v1, %v2573_v44 }
 0x54c   : > { %v5483_v28 = vadd.f32 %v5472_v37, %v2598_v13  ;;  %v2597_v29 = vmul.f32 %v5462_v1, %v2574_v8  ;;  %v2442_v26 = vpop.xlane.xlu0 %2441  ;;  %4120 = vrsqrt.f32 %v2547_v52  ;;  %v2513_v22 = vsub.f32 %v2481_v34, %v2497_v12 }
 0x54d   : > { %v4119_v47 = vpop.eup %4118  ;;  %v2546_v42 = vadd.f32 1e-05, %v2514_v16  ;;  %v2480_v32 = vmul.f32 0.015625, %v2442_v26  ;;  %v5493_v3 = vadd.f32 %v5472_v37, %v2596_v15  ;;  %v2531_v8 = vsub.f32 %v5341_v59, %v5451_v62 }
 0x54e   : > { %v2637_v46 = vsub.f32 0.0, %v5483_v28  ;;  %v5490_v35 = vadd.f32 %v5472_v37, %v2597_v29  ;;  %v2572_v51 = vmul.f32 %v4119_v47, %v2524_v7  ;;  %v2383_v6 = vpop.xlane.xlu1 %2382  ;;  %v2545_v50 = vadd.f32 1e-05, %v2513_v22 }
 0x54f   : > { %4122 = vrsqrt.f32 %v2546_v42  ;;  %v2512_v54 = vsub.f32 %v2480_v32, %v2496_v48  ;;  %v2635_v20 = vsub.f32 0.0, %v5493_v3  ;;  %v5501_v53 = vmul.f32 0.015625, %v2383_v6 }
 0x550   : > { %v2656_v0 = vmul.f32 1.442695, %v2637_v46  ;;  %v2636_v5 = vsub.f32 0.0, %v5490_v35  ;;  %v2380_v25 = vpop.xlane.xlu0 %2379  ;;  %v2595_v17 = vmul.f32 %v5462_v1, %v2572_v51  ;;  %4124 = vrsqrt.f32 %v2545_v50 }
 0x551   : > { %v2544_v19 = vadd.f32 1e-05, %v2512_v54  ;;  %v2652_v11 = vmul.f32 1.442695, %v2635_v20  ;;  %v5504_v49 = vmul.f32 0.015625, %v2380_v25  ;;  %v2503_v12 = vmul.f32 %v5501_v53, %v5501_v53 }
 0x552   : > { %4126 = vpow2.f32 %v2656_v0  ;;  %v2654_v30 = vmul.f32 1.442695, %v2636_v5  ;;  %v2377_v38 = vpop.xlane.xlu1 %2376  ;;  %v5499_v55 = vadd.f32 %v5472_v37, %v2595_v17  ;;  %v2530_v16 = vsub.f32 %v5338_v41, %v5453_v18 }
 0x553   : > { %4128 = vrsqrt.f32 %v2544_v19  ;;  %v5510_v21 = vmul.f32 0.015625, %v2377_v38  ;;  %v2502_v29 = vmul.f32 %v5504_v49, %v5504_v49  ;;  %v2529_v59 = vsub.f32 %v5344_v63, %v5456_v61 }
 0x554   : > { %4130 = vpow2.f32 %v2654_v30  ;;  %v2374_v27 = vpop.xlane.xlu0 %2373  ;;  %v2634_v44 = vsub.f32 0.0, %v5499_v55  ;;  %v2528_v6 = vsub.f32 %v5349_v39, %v5467_v40 }
 0x555   : > { %4132 = vpow2.f32 %v2652_v11  ;;  %v5518_v47 = vmul.f32 0.015625, %v2374_v27  ;;  %v2501_v41 = vmul.f32 %v5510_v21, %v5510_v21 }
 0x556   : > { %v2463_v60 = vpop.xlane.xlu1 %2462  ;;  %v2650_v23 = vmul.f32 1.442695, %v2634_v44  ;;  %v4121_v13 = vpop.eup %4120 }
 0x557   : > { %v2487_v52 = vmul.f32 0.015625, %v2463_v60  ;;  %v2579_v7 = vmul.f32 %v4121_v13, %v2531_v8  ;;  %v2500_v19 = vmul.f32 %v5518_v47, %v5518_v47 }
 0x558   : > { %v2460_v34 = vpop.xlane.xlu0 %2459  ;;  %4134 = vpow2.f32 %v2650_v23 }
 0x559   : > { %v4123_v15 = vpop.eup %4122  ;;  %v2519_v48 = vsub.f32 %v2487_v52, %v2503_v12  ;;  %v2486_v26 = vmul.f32 0.015625, %v2460_v34  ;;  %v2602_v25 = vmul.f32 %v5462_v1, %v2579_v7 }
 0x55a   : > { %v2578_v62 = vmul.f32 %v4123_v15, %v2530_v16  ;;  %v2457_v42 = vpop.xlane.xlu1 %2456  ;;  %v4125_v22 = vpop.eup %4124 }
 0x55b   : > { %v2551_v18 = vadd.f32 1e-05, %v2519_v48  ;;  %v2518_v32 = vsub.f32 %v2486_v26, %v2502_v29  ;;  %v2485_v46 = vmul.f32 0.015625, %v2457_v42  ;;  %v2577_v50 = vmul.f32 %v4125_v22, %v2529_v59 }
 0x55c   : > { %v4127_v51 = vpop.eup %4126  ;;  %v2454_v54 = vpop.xlane.xlu0 %2453  ;;  %v2601_v0 = vmul.f32 %v5462_v1, %v2578_v62  ;;  %v5534_v52 = vadd.f32 %v5472_v37, %v2602_v25 }
 0x55d   : > { %v4129_v63 = vpop.eup %4128  ;;  %4136 = vrsqrt.f32 %v2551_v18  ;;  %v2550_v61 = vadd.f32 1e-05, %v2518_v32  ;;  %v2517_v5 = vsub.f32 %v2485_v46, %v2501_v41  ;;  %v2484_v30 = vmul.f32 0.015625, %v2454_v54 }
 0x55e   : > { %v4131_v17 = vpop.eup %4130  ;;  %v2576_v20 = vmul.f32 %v4129_v63, %v2528_v6  ;;  %v2395_v38 = vpop.xlane.xlu1 %2394  ;;  %v2600_v11 = vmul.f32 %v5462_v1, %v2577_v50  ;;  %v2685_v40 = vadd.f32 1.0, %v4127_v51  ;;  %v5531_v8 = vadd.f32 %v5472_v37, %v2601_v0 }
 0x55f   : > { %v4133_v39 = vpop.eup %4132  ;;  %v2684_v27 = vadd.f32 1.0, %v4131_v17  ;;  %v2549_v44 = vadd.f32 1e-05, %v2517_v5  ;;  %4138 = vrsqrt.f32 %v2550_v61  ;;  %v2516_v60 = vsub.f32 %v2484_v30, %v2500_v19 }
 0x560   : > { %v2392_v23 = vpop.xlane.xlu0 %2391  ;;  %v2599_v13 = vmul.f32 %v5462_v1, %v2576_v20  ;;  %v2683_v12 = vadd.f32 1.0, %v4133_v39  ;;  %v5540_v29 = vadd.f32 %v5472_v37, %v2600_v11  ;;  %v2640_v22 = vsub.f32 0.0, %v5531_v8 }
 0x561   : > { %4140 = vrcp.f32 %v2684_v27  ;;  %v2548_v34 = vadd.f32 1e-05, %v2516_v60  ;;  %v2535_v41 = vsub.f32 %v5379_v43, %v5501_v53  ;;  %v5549_v18 = vmul.f32 0.015625, %v2395_v38 }
 0x562   : > { %v4135_v16 = vpop.eup %4134  ;;  %4142 = vrsqrt.f32 %v2549_v44  ;;  %v2389_v15 = vpop.xlane.xlu1 %2388  ;;  %v5537_v7 = vadd.f32 %v5472_v37, %v2599_v13  ;;  %v2639_v42 = vsub.f32 0.0, %v5540_v29  ;;  %v2641_v50 = vsub.f32 0.0, %v5534_v52 }
 0x563   : > { %4144 = vrcp.f32 %v2685_v40  ;;  %v5542_v48 = vmul.f32 0.015625, %v2389_v15  ;;  %v2682_v26 = vadd.f32 1.0, %v4135_v16  ;;  %v2534_v0 = vsub.f32 %v5376_v2, %v5504_v49 }
 0x564   : > { %4146 = vrsqrt.f32 %v2548_v34  ;;  %v2386_v59 = vpop.xlane.xlu0 %2385  ;;  %v2638_v62 = vsub.f32 0.0, %v5537_v7  ;;  %v2660_v6 = vmul.f32 1.442695, %v2639_v42  ;;  %v2662_v43 = vmul.f32 1.442695, %v2640_v22 }
 0x565   : > { %v5551_v32 = vmul.f32 0.015625, %v2386_v59  ;;  %4148 = vrcp.f32 %v2682_v26  ;;  %v2505_v63 = vmul.f32 %v5542_v48, %v5542_v48  ;;  %v5558_v5 = vmul.f32 0.015625, %v2392_v23 }
 0x566   : > { %v2469_v46 = vpop.xlane.xlu1 %2468  ;;  %4150 = vrcp.f32 %v2683_v12  ;;  %v2658_v51 = vmul.f32 1.442695, %v2638_v62  ;;  %v2664_v17 = vmul.f32 1.442695, %v2641_v50  ;;  %v2533_v2 = vsub.f32 %v5382_v56, %v5510_v21 }
 0x567   : > { %v4137_v54 = vpop.eup %4136  ;;  %v2489_v61 = vmul.f32 0.015625, %v2469_v46  ;;  %v2504_v20 = vmul.f32 %v5551_v32, %v5551_v32  ;;  %v2507_v49 = vmul.f32 %v5549_v18, %v5549_v18  ;;  %v2532_v12 = vsub.f32 %v5386_v33, %v5518_v47 }
 0x568   : > { %v2583_v53 = vmul.f32 %v4137_v54, %v2535_v41  ;;  %v2466_v25 = vpop.xlane.xlu0 %2465  ;;  %4152 = vpow2.f32 %v2658_v51  ;;  %v2506_v16 = vmul.f32 %v5558_v5, %v5558_v5 }
 0x569   : > { %v2521_v19 = vsub.f32 %v2489_v61, %v2505_v63  ;;  %v2488_v30 = vmul.f32 0.015625, %v2466_v25  ;;  %4154 = vpow2.f32 %v2660_v6  ;;  %v4139_v38 = vpop.eup %4138 }
 0x56a   : > { %v2475_v11 = vpop.xlane.xlu1 %2474  ;;  %4156 = vpow2.f32 %v2662_v43  ;;  %v2606_v39 = vmul.f32 %v5462_v1, %v2583_v53  ;;  %v2582_v27 = vmul.f32 %v4139_v38, %v2534_v0 }
 0x56b   : > { %v4141_v40 = vpop.eup %4140  ;;  %v2553_v44 = vadd.f32 1e-05, %v2521_v19  ;;  %v2520_v60 = vsub.f32 %v2488_v30, %v2504_v20  ;;  %v2491_v23 = vmul.f32 0.015625, %v2475_v11  ;;  %4158 = vpow2.f32 %v2664_v17 }
 0x56c   : > { %v4143_v13 = vpop.eup %4142  ;;  %v2472_v56 = vpop.xlane.xlu0 %2471  ;;  %v5572_v21 = vadd.f32 %v5472_v37, %v2606_v39  ;;  %v2716_v22 = vmul.f32 %v4141_v40, %v5490_v35  ;;  %v2605_v41 = vmul.f32 %v5462_v1, %v2582_v27 }
 0x56d   : > { %v4145_v34 = vpop.eup %4144  ;;  %v2581_v15 = vmul.f32 %v4143_v13, %v2533_v2  ;;  %4160 = vrsqrt.f32 %v2553_v44  ;;  %v2552_v26 = vadd.f32 1e-05, %v2520_v60  ;;  %v2523_v59 = vsub.f32 %v2491_v23, %v2507_v49 }
 0x56e   : > { %v4147_v62 = vpop.eup %4146  ;;  %v2490_v42 = vmul.f32 0.015625, %v2472_v56  ;;  %v2645_v33 = vsub.f32 0.0, %v5572_v21  ;;  %v5580_v63 = vadd.f32 %v5472_v37, %v2605_v41  ;;  %v2717_v17 = vmul.f32 %v4145_v34, %v5483_v28 }
 0x56f   : > { %v4149_v47 = vpop.eup %4148  ;;  %v2580_v46 = vmul.f32 %v4147_v62, %v2532_v12  ;;  %4162 = vrsqrt.f32 %v2552_v26  ;;  %v2555_v51 = vadd.f32 1e-05, %v2523_v59  ;;  %v2604_v6 = vmul.f32 %v5462_v1, %v2581_v15 }
 0x570   : > { %v4151_v50 = vpop.eup %4150  ;;  %v2522_v54 = vsub.f32 %v2490_v42, %v2506_v16  ;;  %v2714_v0 = vmul.f32 %v4149_v47, %v5499_v55  ;;  %v2672_v61 = vmul.f32 1.442695, %v2645_v33  ;;  %v2644_v19 = vsub.f32 0.0, %v5580_v63 }
 0x571   : > { %4164 = vrsqrt.f32 %v2555_v51  ;;  %v2715_v35 = vmul.f32 %v4151_v50, %v5493_v3  ;;  %v2603_v43 = vmul.f32 %v5462_v1, %v2580_v46  ;;  %v5585_v53 = vadd.f32 %v5472_v37, %v2604_v6 }
 0x572   : > { %v4153_v25 = vpop.eup %4152  ;;  %v2554_v20 = vadd.f32 1e-05, %v2522_v54  ;;  %4166 = vpow2.f32 %v2672_v61  ;;  %v2731_v11 = vpack.c.bf16 %v2717_v17, %v2716_v22  ;;  %v2537_v60 = vsub.f32 %v5414_v31, %v5542_v48 }
 0x573   : > { %v4155_v55 = vpop.eup %4154  ;;  %v2730_v30 = vpack.c.bf16 %v2715_v35, %v2714_v0  ;;  %v2686_v38 = vadd.f32 1.0, %v4153_v25  ;;  %v5590_v2 = vadd.f32 %v5472_v37, %v2603_v43  ;;  %v2643_v3 = vsub.f32 0.0, %v5585_v53 }
 0x574   : > { %v4157_v49 = vpop.eup %4156  ;;  %4168 = vrsqrt.f32 %v2554_v20  ;;  %v2687_v39 = vadd.f32 1.0, %v4155_v55  ;;  %v2670_v16 = vmul.f32 1.442695, %v2644_v19  ;;  %v2536_v56 = vsub.f32 %v5418_v57, %v5551_v32 }
 0x575   : > { %3809 = vmatprep.mubr.msk.bf16.mxu1 %vm1637_vm2, %v2730_v30  ;;  %4170 = vrcp.f32 %v2686_v38  ;;  %v2688_v28 = vadd.f32 1.0, %v4157_v49  ;;  %v2642_v40 = vsub.f32 0.0, %v5590_v2  ;;  %v2668_v27 = vmul.f32 1.442695, %v2643_v3  ;;  %v4159_v44 = vpop.eup %4158 }
 0x576   : > { %3810 = vmatmul.mubr.msk.bf16.vlgmr.msra.gmra.mrb[56].mxu1 %vm1637_vm2, %v2731_v11  ;;  %4172 = vrcp.f32 %v2687_v39  ;;  %v2689_v13 = vadd.f32 1.0, %v4159_v44  ;;  %v2539_v26 = vsub.f32 %v5411_v45, %v5549_v18  ;;  %v2538_v57 = vsub.f32 %v5408_v10, %v5558_v5 }
 0x577   : > { %v4161_v23 = vpop.eup %4160  ;;  %4174 = vrcp.f32 %v2688_v28  ;;  %v2666_v12 = vmul.f32 1.442695, %v2642_v40 }
 0x578   : > { %v2585_v34 = vmul.f32 %v4161_v23, %v2537_v60  ;;  %4176 = vpow2.f32 %v2668_v27 }
 0x579   : > { %v4163_v15 = vpop.eup %4162  ;;  %4178 = vrcp.f32 %v2689_v13 }
 0x57a   : > { %v2584_v59 = vmul.f32 %v4163_v15, %v2536_v56  ;;  %4180 = vpow2.f32 %v2666_v12  ;;  %v2608_v31 = vmul.f32 %v5462_v1, %v2585_v34 }
 0x57b   : > { %v4165_v48 = vpop.eup %4164  ;;  %4182 = vpow2.f32 %v2670_v16 }
 0x57c   : > { %v4167_v62 = vpop.eup %4166  ;;  %v2587_v42 = vmul.f32 %v4165_v48, %v2539_v26  ;;  %v2607_v22 = vmul.f32 %v5462_v1, %v2584_v59  ;;  %v5605_v41 = vadd.f32 %v5472_v37, %v2608_v31 }
 0x57d   : > { %v2693_v51 = vadd.f32 1.0, %v4167_v62 }
 0x57e   : > { %v4169_v32 = vpop.eup %4168  ;;  %v5610_v33 = vadd.f32 %v5472_v37, %v2607_v22  ;;  %v2647_v45 = vsub.f32 0.0, %v5605_v41  ;;  %v2610_v18 = vmul.f32 %v5462_v1, %v2587_v42 }
 0x57f   : > { %v4171_v47 = vpop.eup %4170  ;;  %v2586_v46 = vmul.f32 %v4169_v32, %v2538_v57 }
 0x580   : > { %v4173_v6 = vpop.eup %4172  ;;  %v2718_v50 = vmul.f32 %v4171_v47, %v5537_v7  ;;  %v2646_v54 = vsub.f32 0.0, %v5610_v33  ;;  %v2676_v0 = vmul.f32 1.442695, %v2647_v45  ;;  %v5617_v61 = vadd.f32 %v5472_v37, %v2610_v18 }
 0x581   : > { %v4175_v10 = vpop.eup %4174  ;;  %v2719_v5 = vmul.f32 %v4173_v6, %v5540_v29  ;;  %v2609_v35 = vmul.f32 %v5462_v1, %v2586_v46  ;;  %v1236_v47 = vsub.s32 1, %v4781_v4  ;;  %v4304_v46 = vld [vmem:[%s6070_s7] sm:$0x3] }
 0x582   : > { %v4177_v43 = vpop.eup %4176  ;;  %v2720_v25 = vmul.f32 %v4175_v10, %v5531_v8  ;;  %v2674_v17 = vmul.f32 1.442695, %v2646_v54  ;;  %4184 = vpow2.f32 %v2676_v0  ;;  %v2649_v20 = vsub.f32 0.0, %v5617_v61 }
 0x583   : > { %v4179_v19 = vpop.eup %4178  ;;  %v2732_v7 = vpack.c.bf16 %v2719_v5, %v2718_v50  ;;  %v2691_v55 = vadd.f32 1.0, %v4177_v43  ;;  %4186 = vrcp.f32 %v2693_v51  ;;  %v2632_v30 = vadd.f32 %v5472_v37, %v2609_v35  ;;  %v5651_v50 = vld [vmem:[%s6080_s17] ss:$0 sm:$0xff] }
 0x584   : > { %v4181_v38 = vpop.eup %4180  ;;  %v2721_v3 = vmul.f32 %v4179_v19, %v5534_v52  ;;  %4188 = vpow2.f32 %v2674_v17  ;;  %v2680_v29 = vmul.f32 1.442695, %v2649_v20  ;;  %v6130_v5 = vld [vmem:[#allocation2_spill] sm:$0xff] }
 0x585   : > { %v4183_v49 = vpop.eup %4182  ;;  %3813 = vmatprep.mubr.msk.bf16.mxu1 %vm1637_vm2, %v2732_v7  ;;  %v2690_v1 = vadd.f32 1.0, %v4181_v38  ;;  %4190 = vrcp.f32 %v2691_v55  ;;  %v2648_v8 = vsub.f32 0.0, %v2632_v30  ;;  %v6132_v55 = vld [vmem:[#allocation3_spill] sm:$0xff] }
 0x586   : > { %v2733_v11 = vpack.c.bf16 %v2721_v3, %v2720_v25  ;;  %v2692_v39 = vadd.f32 1.0, %v4183_v49  ;;  %4192 = vpow2.f32 %v2680_v29  ;;  %v6131_v25 = vld [vmem:[#allocation4_spill] sm:$0xff] }
 0x587   : > { %4194 = vrcp.f32 %v2690_v1  ;;  %v2678_v28 = vmul.f32 1.442695, %v2648_v8 }
 0x588   : > { %3814 = vmatmul.mubr.msk.bf16.gmra.mrb[60].mxu1 %vm1637_vm2, %v2733_v11  ;;  %4196 = vrcp.f32 %v2692_v39 }
 0x589   : > { %4198 = vpow2.f32 %v2678_v28 }
 0x58c   : > { %v4185_v37 = vpop.eup %4184 }
 0x58d   : > { %v4187_v40 = vpop.eup %4186  ;;  %v2695_v52 = vadd.f32 1.0, %v4185_v37 }
 0x58e   : > { %v4189_v27 = vpop.eup %4188  ;;  %v2725_v59 = vmul.f32 %v4187_v40, %v5572_v21 }
 0x58f   : > { %v4191_v44 = vpop.eup %4190  ;;  %v2694_v60 = vadd.f32 1.0, %v4189_v27  ;;  %4200 = vrcp.f32 %v2695_v52 }
 0x590   : > { %v4193_v23 = vpop.eup %4192  ;;  %v2723_v34 = vmul.f32 %v4191_v44, %v5585_v53 }
 0x591   : > { %v4195_v13 = vpop.eup %4194  ;;  %4202 = vrcp.f32 %v2694_v60  ;;  %v2697_v12 = vadd.f32 1.0, %v4193_v23  ;;  %v6133_v60 = vld [vmem:[#allocation20_spill] sm:$0xff] }
 0x592   : > { %v4197_v16 = vpop.eup %4196  ;;  %v2722_v56 = vmul.f32 %v4195_v13, %v5590_v2 }
 0x593   : > { %v4199_v15 = vpop.eup %4198  ;;  %v2724_v26 = vmul.f32 %v4197_v16, %v5580_v63  ;;  %4204 = vrcp.f32 %v2697_v12  ;;  %v6134_v16 = vld [vmem:[#allocation18_spill] sm:$0xff] }
 0x594   : > { %v2734_v31 = vpack.c.bf16 %v2723_v34, %v2722_v56  ;;  %v2696_v48 = vadd.f32 1.0, %v4199_v15  ;;  %v6135_v15 = vld [vmem:[#allocation21_spill] sm:$0xff] }
 0x595   : > { %v2735_v62 = vpack.c.bf16 %v2725_v59, %v2724_v26  ;;  %v6136_v59 = vld [vmem:[#allocation7_spill] sm:$0xff] }
 0x596   : > { %3817 = vmatprep.mubr.msk.bf16.mxu1 %vm1637_vm2, %v2734_v31  ;;  %4206 = vrcp.f32 %v2696_v48 }
 0x597   : > { %3818 = vmatmul.mubr.msk.bf16.gmra.mrb[64].mxu1 %vm1637_vm2, %v2735_v62 }
 0x599   : > { %v4201_v42 = vpop.eup %4200 }
 0x59a   : > { %v2727_v53 = vmul.f32 %v4201_v42, %v5605_v41  ;;  %v6137_v42 = vld [vmem:[#allocation19_spill] sm:$0xff] }
 0x59b   : > { %v4203_v22 = vpop.eup %4202 }
 0x59c   : > { %v2726_v2 = vmul.f32 %v4203_v22, %v5610_v33  ;;  %v5642_v33 = vrot.slane %v4304_v46, %v1236_v47 }
 0x59d   : > { %v4205_v57 = vpop.eup %4204 }
 0x59e   : > { %v2736_v32 = vpack.c.bf16 %v2727_v53, %v2726_v2  ;;  %v2729_v45 = vmul.f32 %v4205_v57, %v5617_v61  ;;  %v1331_v41 = vadd.f32 %v4819_v24, %v5642_v33  ;;  %v1321_v51 = vadd.f32 %v4797_v14, %v5642_v33  ;;  %v6129_v61 = vld [vmem:[#allocation17_spill] sm:$0xff] }
 0x59f   : > { %v1335_v4 = vadd.f32 %v4828_v58, %v5642_v33  ;;  %v1325_v10 = vadd.f32 %v6129_v61, %v5642_v33  ;;  %v1351_v23 = vadd.f32 %v6133_v60, %v5642_v33  ;;  %v1341_v56 = vadd.f32 %v6134_v16, %v5642_v33  ;;  %v6138_v2 = vld [vmem:[#allocation5_spill] sm:$0xff] }
 0x5a0   : > { %v4207_v63 = vpop.eup %4206  ;;  %3821 = vmatprep.mubr.msk.bf16.mxu1 %vm1637_vm2, %v2736_v32  ;;  %v2916_v43 = vadd.f32 1.0, %v1331_v41  ;;  %v2914_v19 = vadd.f32 1.0, %v1321_v51  ;;  %v1355_v26 = vadd.f32 %v6135_v15, %v5642_v33  ;;  %v1345_v22 = vadd.f32 %v6137_v42, %v5642_v33  ;;  %v6140_v51 = vld [vmem:[#allocation6_spill] sm:$0xff] }
 0x5a1   : > { %v2728_v21 = vmul.f32 %v4207_v63, %v2632_v30  ;;  %v2917_v30 = vadd.f32 1.0, %v1335_v4  ;;  %v2915_v3 = vadd.f32 1.0, %v1325_v10  ;;  %v2920_v32 = vadd.f32 1.0, %v1351_v23 }
 0x5a2   : > { %v2918_v46 = vadd.f32 1.0, %v1341_v56  ;;  %v2921_v4 = vadd.f32 1.0, %v1355_v26  ;;  %v2919_v61 = vadd.f32 1.0, %v1345_v22 }
 0x5a3   : > { %v2737_v18 = vpack.c.bf16 %v2729_v45, %v2728_v21  ;;  %v6139_v21 = vld [vmem:[#allocation8_spill] sm:$0xff] }
 0x5a5   : > { %3822 = vmatmul.mubr.msk.bf16.gmra.mrb[68].mxu1 %vm1637_vm2, %v2737_v18 }
 0x649   : > { %v3811_v6 = vpop.f32.mrb[56].mxu1 }
 0x64a   : > { %v2837_v54 = vadd.f32 %v3811_v6, %v4727_v9  ;;  %v2828_v0 = vpop.f32.mrb[57].mxu1 }
 0x64b   : > { %v2829_v24 = vadd.f32 %v2828_v0, %v6130_v5  ;;  %v3812_v35 = vpop.f32.mrb[58].mxu1 }
 0x64c   : > { %v2900_v14 = vadd.f32 %v5651_v50, %v2837_v54  ;;  %v2840_v17 = vadd.f32 %v3812_v35, %v6131_v25  ;;  %v2831_v20 = vpop.f32.mrb[59].mxu1 }
 0x64d   : > { %v2898_v7 = vadd.f32 %v5651_v50, %v2829_v24  ;;  %v2832_v58 = vadd.f32 %v2831_v20, %v6132_v55 }
 0x64e   : > { %v5663_v9 = vmul.f32 %v2916_v43, %v2900_v14  ;;  %v2901_v38 = vadd.f32 %v5651_v50, %v2840_v17 }
 0x64f   : > { %v5666_v29 = vmul.f32 %v2914_v19, %v2898_v7  ;;  %v2899_v49 = vadd.f32 %v5651_v50, %v2832_v58  ;;  %v6141_v7 = vld [vmem:[#allocation24_spill] sm:$0xff]  ;;  %v6142_v58 = vld [vmem:[#allocation22_spill] sm:$0xff] }
 0x650   : > { %v5669_v1 = vmul.f32 %v2917_v30, %v2901_v38  ;;  %v2952_v8 = vsel %vm1637_vm2, %v5663_v9, 0.0  ;;  %v3012_v37 = vmul.f32 %v5663_v9, %v5663_v9  ;;  %v1371_v55 = vadd.f32 %v6141_v7, %v5642_v33  ;;  %v6152_v7 = vld [vmem:[#allocation27_spill] sm:$0xff] }
 0x651   : > { %v5673_v11 = vmul.f32 %v2915_v3, %v2899_v49  ;;  %2953 = vadd.xlane.f32.xlu0 %v2952_v8  ;;  %v2946_v28 = vsel %vm1637_vm2, %v5666_v29, 0.0  ;;  %v3010_v44 = vmul.f32 %v5666_v29, %v5666_v29  ;;  %v1361_v30 = vadd.f32 %v6142_v58, %v5642_v33  ;;  %v6143_v8 = vld [vmem:[#allocation25_spill] sm:$0xff] }
 0x652   : > { %v2955_v39 = vsel %vm1637_vm2, %v5669_v1, 0.0  ;;  %v3013_v52 = vmul.f32 %v5669_v1, %v5669_v1  ;;  %v3032_v27 = vsel %vm1637_vm2, %v3012_v37, 0.0  ;;  %v2924_v16 = vadd.f32 1.0, %v1371_v55  ;;  %v6153_v58 = vld [vmem:[#allocation13_spill] sm:$0xff] }
 0x653   : > { %2956 = vadd.xlane.f32.xlu1 %v2955_v39  ;;  %v2949_v40 = vsel %vm1637_vm2, %v5673_v11, 0.0  ;;  %v3011_v12 = vmul.f32 %v5673_v11, %v5673_v11  ;;  %v3026_v62 = vsel %vm1637_vm2, %v3010_v44, 0.0  ;;  %v1375_v39 = vadd.f32 %v6143_v8, %v5642_v33  ;;  %v6146_v44 = vld [vmem:[#allocation9_spill] sm:$0xff] }
 0x654   : > { %v3035_v13 = vsel %vm1637_vm2, %v3013_v52, 0.0  ;;  %v6145_v52 = vld [vmem:[#allocation23_spill] sm:$0xff]  ;;  %v1385_v55 = vadd.f32 %v6152_v7, %v5642_v33 }
 0x655   : > { %2947 = vadd.xlane.f32.xlu0 %v2946_v28  ;;  %v3029_v47 = vsel %vm1637_vm2, %v3011_v12, 0.0  ;;  %v6144_v28 = vld [vmem:[#allocation11_spill] sm:$0xff]  ;;  %v2925_v22 = vadd.f32 1.0, %v1375_v39 }
 0x657   : > { %2950 = vadd.xlane.f32.xlu1 %v2949_v40 }
 0x659   : > { %3033 = vadd.xlane.f32.xlu0 %v3032_v27  ;;  %v1365_v27 = vadd.f32 %v6145_v52, %v5642_v33 }
 0x65b   : > { %v3815_v34 = vpop.f32.mrb[60].mxu1  ;;  %3036 = vadd.xlane.f32.xlu1 %v3035_v13 }
 0x65c   : > { %v2853_v31 = vadd.f32 %v3815_v34, %v6136_v59  ;;  %v2844_v48 = vpop.f32.mrb[61].mxu1  ;;  %v6147_v34 = vld [vmem:[#allocation12_spill] sm:$0xff]  ;;  %v2922_v59 = vadd.f32 1.0, %v1361_v30 }
 0x65d   : > { %v2845_v53 = vadd.f32 %v2844_v48, %v6138_v2  ;;  %v3816_v57 = vpop.f32.mrb[62].mxu1  ;;  %3027 = vadd.xlane.f32.xlu0 %v3026_v62  ;;  %v6148_v48 = vld [vmem:[#allocation10_spill] sm:$0xff] }
 0x65e   : > { %v2904_v63 = vadd.f32 %v5651_v50, %v2853_v31  ;;  %v2856_v45 = vadd.f32 %v3816_v57, %v6139_v21  ;;  %v2847_v18 = vpop.f32.mrb[63].mxu1  ;;  %v2923_v57 = vadd.f32 1.0, %v1365_v27  ;;  %v6155_v27 = vld [vmem:[#allocation14_spill] sm:$0xff] }
 0x65f   : > { %v2902_v41 = vadd.f32 %v5651_v50, %v2845_v53  ;;  %v2848_v6 = vadd.f32 %v2847_v18, %v6140_v51  ;;  %3030 = vadd.xlane.f32.xlu1 %v3029_v47 }
 0x660   : > { %v5707_v54 = vmul.f32 %v2920_v32, %v2904_v63  ;;  %v2905_v0 = vadd.f32 %v5651_v50, %v2856_v45 }
 0x661   : > { %v5710_v10 = vmul.f32 %v2918_v46, %v2902_v41  ;;  %v2903_v5 = vadd.f32 %v5651_v50, %v2848_v6  ;;  %v6149_v6 = vld [vmem:[#allocation26_spill] sm:$0xff] }
 0x662   : > { %v5713_v24 = vmul.f32 %v2921_v4, %v2905_v0  ;;  %v2964_v35 = vsel %vm1637_vm2, %v5707_v54, 0.0  ;;  %v3016_v17 = vmul.f32 %v5707_v54, %v5707_v54  ;;  %v1381_v4 = vadd.f32 %v6149_v6, %v5642_v33  ;;  %v6150_v0 = vld [vmem:[#allocation28_spill] sm:$0xff]  ;;  %v3885_v6 = vld [vmem:[%s6083_s20 + $0x8] sm:$0xff]  }
 0x663   : > { %v5717_v43 = vmul.f32 %v2919_v61, %v2903_v5  ;;  %2965 = vadd.xlane.f32.xlu0 %v2964_v35  ;;  %v2958_v25 = vsel %vm1637_vm2, %v5710_v10, 0.0  ;;  %v3014_v49 = vmul.f32 %v5710_v10, %v5710_v10  ;;  %v1391_v61 = vadd.f32 %v6150_v0, %v5642_v33  ;;  %v3887_v0 = vld [vmem:[%s6083_s20 + $0x18] sm:$0xff]  }
 0x664   : > { %v2967_v14 = vsel %vm1637_vm2, %v5713_v24, 0.0  ;;  %v3017_v19 = vmul.f32 %v5713_v24, %v5713_v24  ;;  %v3044_v3 = vsel %vm1637_vm2, %v3016_v17, 0.0  ;;  %v6151_v17 = vld [vmem:[#allocation15_spill] sm:$0xff]  ;;  %v2926_v8 = vadd.f32 1.0, %v1381_v4  ;;  %v3886_v4 = vld [vmem:[%s6083_s20 + $0x10] sm:$0xff]  }
 0x665   : > { %2968 = vadd.xlane.f32.xlu1 %v2967_v14  ;;  %v2961_v20 = vsel %vm1637_vm2, %v5717_v43, 0.0  ;;  %v3015_v12 = vmul.f32 %v5717_v43, %v5717_v43  ;;  %v3038_v42 = vsel %vm1637_vm2, %v3014_v49, 0.0  ;;  %v2928_v39 = vadd.f32 1.0, %v1391_v61 }
 0x666   : > { %v3047_v13 = vsel %vm1637_vm2, %v3017_v19, 0.0 }
 0x667   : > { %2959 = vadd.xlane.f32.xlu0 %v2958_v25  ;;  %v3041_v21 = vsel %vm1637_vm2, %v3015_v12, 0.0  ;;  %v1395_v25 = vadd.f32 %v5009_v36, %v5642_v33  ;;  %v6154_v36 = vld [vmem:[#allocation16_spill] sm:$0xff] }
 0x669   : > { %2962 = vadd.xlane.f32.xlu1 %v2961_v20 }
 0x66a   : > { %v3819_v38 = vpop.f32.mrb[64].mxu1 }
 0x66b   : > { %v2869_v37 = vadd.f32 %v3819_v38, %v6144_v28  ;;  %3045 = vadd.xlane.f32.xlu0 %v3044_v3  ;;  %v2860_v40 = vpop.f32.mrb[65].mxu1 }
 0x66c   : > { %v2861_v60 = vadd.f32 %v2860_v40, %v6146_v44  ;;  %v3820_v23 = vpop.f32.mrb[66].mxu1 }
 0x66d   : > { %v2908_v56 = vadd.f32 %v5651_v50, %v2869_v37  ;;  %v2872_v15 = vadd.f32 %v3820_v23, %v6147_v34  ;;  %3048 = vadd.xlane.f32.xlu1 %v3047_v13  ;;  %v2863_v26 = vpop.f32.mrb[67].mxu1  ;;  %v2929_v23 = vadd.f32 1.0, %v1395_v25 }
 0x66e   : > { %v2906_v31 = vadd.f32 %v5651_v50, %v2861_v60  ;;  %v2864_v62 = vadd.f32 %v2863_v26, %v6148_v48 }
 0x66f   : > { %v5750_v2 = vmul.f32 %v2924_v16, %v2908_v56  ;;  %v2909_v53 = vadd.f32 %v5651_v50, %v2872_v15  ;;  %3039 = vadd.xlane.f32.xlu0 %v3038_v42  ;;  %v2927_v16 = vadd.f32 1.0, %v1385_v55 }
 0x670   : > { %v5753_v32 = vmul.f32 %v2922_v59, %v2906_v31  ;;  %v2907_v63 = vadd.f32 %v5651_v50, %v2864_v62 }
 0x671   : > { %v5757_v45 = vmul.f32 %v2925_v22, %v2909_v53  ;;  %3042 = vadd.xlane.f32.xlu1 %v3041_v21  ;;  %v2976_v18 = vsel %vm1637_vm2, %v5750_v2, 0.0  ;;  %v3020_v51 = vmul.f32 %v5750_v2, %v5750_v2 }
 0x672   : > { %v5761_v47 = vmul.f32 %v2923_v57, %v2907_v63  ;;  %v2970_v41 = vsel %vm1637_vm2, %v5753_v32, 0.0  ;;  %v3018_v49 = vmul.f32 %v5753_v32, %v5753_v32 }
 0x673   : > { %2977 = vadd.xlane.f32.xlu0 %v2976_v18  ;;  %v2979_v46 = vsel %vm1637_vm2, %v5757_v45, 0.0  ;;  %v3021_v14 = vmul.f32 %v5757_v45, %v5757_v45  ;;  %v3056_v38 = vsel %vm1637_vm2, %v3020_v51, 0.0  ;;  %v3884_v51 = vld [vmem:[%s6083_s20] sm:$0xff]  }
 0x674   : > { %v2973_v5 = vsel %vm1637_vm2, %v5761_v47, 0.0  ;;  %v3019_v60 = vmul.f32 %v5761_v47, %v5761_v47  ;;  %v3050_v15 = vsel %vm1637_vm2, %v3018_v49, 0.0  ;;  %3825 = vmatprep.subr.bf16.mxu0 %v3884_v51 }
 0x675   : > { %2980 = vadd.xlane.f32.xlu1 %v2979_v46  ;;  %v3059_v44 = vsel %vm1637_vm2, %v3021_v14, 0.0  ;;  %3826 = vmatpush3.bf16.msra.mxu0 %v3884_v51 }
 0x676   : > { %v3053_v31 = vsel %vm1637_vm2, %v3019_v60, 0.0  ;;  %3827 = vmatprep.subr.bf16.mxu0 %v3885_v6 }
 0x677   : > { %2971 = vadd.xlane.f32.xlu0 %v2970_v41 }
 0x678   : > { %v3823_v35 = vpop.f32.mrb[68].mxu1 }
 0x679   : > { %2974 = vadd.xlane.f32.xlu1 %v2973_v5  ;;  %v2885_v20 = vadd.f32 %v3823_v35, %v6151_v17  ;;  %v2876_v19 = vpop.f32.mrb[69].mxu1  ;;  %3828 = vmatpush3.bf16.msra.mxu0 %v3885_v6 }
 0x67a   : > { %v2877_v30 = vadd.f32 %v2876_v19, %v6153_v58  ;;  %v3824_v3 = vpop.f32.mrb[70].mxu1  ;;  %3829 = vmatprep.subr.bf16.mxu0 %v3886_v4 }
 0x67b   : > { %v2912_v28 = vadd.f32 %v5651_v50, %v2885_v20  ;;  %3057 = vadd.xlane.f32.xlu0 %v3056_v38  ;;  %v2888_v37 = vadd.f32 %v3824_v3, %v6154_v36  ;;  %v2879_v40 = vpop.f32.mrb[71].mxu1 }
 0x67c   : > { %v2910_v52 = vadd.f32 %v5651_v50, %v2877_v30  ;;  %v2880_v33 = vadd.f32 %v2879_v40, %v6155_v27 }
 0x67d   : > { %v5793_v13 = vmul.f32 %v2928_v39, %v2912_v28  ;;  %v2913_v12 = vadd.f32 %v5651_v50, %v2888_v37  ;;  %3060 = vadd.xlane.f32.xlu1 %v3059_v44  ;;  %3830 = vmatpush3.bf16.msra.mxu0 %v3886_v4 }
 0x67e   : > { %v5796_v56 = vmul.f32 %v2926_v8, %v2910_v52  ;;  %v2911_v34 = vadd.f32 %v5651_v50, %v2880_v33  ;;  %3831 = vmatprep.subr.bf16.mxu0 %v3887_v0 }
 0x67f   : > { %v5800_v26 = vmul.f32 %v2929_v23, %v2913_v12  ;;  %3051 = vadd.xlane.f32.xlu0 %v3050_v15  ;;  %v2988_v48 = vsel %vm1637_vm2, %v5793_v13, 0.0  ;;  %v3024_v63 = vmul.f32 %v5793_v13, %v5793_v13 }
 0x680   : > { %v5802_v59 = vmul.f32 %v2927_v16, %v2911_v34  ;;  %v2982_v50 = vsel %vm1637_vm2, %v5796_v56, 0.0  ;;  %v3022_v42 = vmul.f32 %v5796_v56, %v5796_v56 }
 0x681   : > { %3054 = vadd.xlane.f32.xlu1 %v3053_v31  ;;  %v2991_v62 = vsel %vm1637_vm2, %v5800_v26, 0.0  ;;  %v3025_v18 = vmul.f32 %v5800_v26, %v5800_v26  ;;  %v3068_v46 = vsel %vm1637_vm2, %v3024_v63, 0.0  ;;  %3832 = vmatpush3.bf16.msra.mxu0 %v3887_v0 }
 0x682   : > { %v2985_v22 = vsel %vm1637_vm2, %v5802_v59, 0.0  ;;  %v3023_v53 = vmul.f32 %v5802_v59, %v5802_v59  ;;  %v3062_v57 = vsel %vm1637_vm2, %v3022_v42, 0.0  ;;  %v5843_v42 = vld [vmem:[%s6081_s18] ss:$0 sm:$0xff] }
 0x683   : > { %2989 = vadd.xlane.f32.xlu0 %v2988_v48  ;;  %v3071_v41 = vsel %vm1637_vm2, %v3025_v18, 0.0 }
 0x684   : > { %v3065_v21 = vsel %vm1637_vm2, %v3023_v53, 0.0 }
 0x685   : > { %2992 = vadd.xlane.f32.xlu1 %v2991_v62 }
 0x687   : > { %2983 = vadd.xlane.f32.xlu0 %v2982_v50 }
 0x689   : > { %2986 = vadd.xlane.f32.xlu1 %v2985_v22 }
 0x68b   : > { %3063 = vadd.xlane.f32.xlu0 %v3062_v57 }
 0x68d   : > { %3066 = vadd.xlane.f32.xlu1 %v3065_v21 }
 0x68f   : > { %3069 = vadd.xlane.f32.xlu0 %v3068_v46 }
 0x691   : > { %3072 = vadd.xlane.f32.xlu1 %v3071_v41 }
 0x6de   : > { %v2954_v61 = vpop.xlane.xlu0 %2953 }
 0x6df   : > { %v2996_v14 = vmul.f32 0.015625, %v2954_v61 }
 0x6e0   : > { %v2957_v5 = vpop.xlane.xlu1 %2956 }
 0x6e1   : > { %v2997_v17 = vmul.f32 0.015625, %v2957_v5  ;;  %v3092_v19 = vmul.f32 %v2996_v14, %v2996_v14  ;;  %v3124_v48 = vsub.f32 %v5663_v9, %v2996_v14  ;;  %v5853_v9 = vld [vmem:[%s6082_s19] ss:$0 sm:$0xff] }
 0x6e2   : > { %v2948_v35 = vpop.xlane.xlu0 %2947 }
 0x6e3   : > { %v2994_v7 = vmul.f32 0.015625, %v2948_v35  ;;  %v3093_v38 = vmul.f32 %v2997_v17, %v2997_v17  ;;  %v3125_v53 = vsub.f32 %v5669_v1, %v2997_v17 }
 0x6e4   : > { %v2951_v25 = vpop.xlane.xlu1 %2950 }
 0x6e5   : > { %v2995_v58 = vmul.f32 0.015625, %v2951_v25  ;;  %v3090_v39 = vmul.f32 %v2994_v7, %v2994_v7  ;;  %v3122_v6 = vsub.f32 %v5666_v29, %v2994_v7 }
 0x6e6   : > { %v3034_v20 = vpop.xlane.xlu0 %3033 }
 0x6e7   : > { %v3076_v55 = vmul.f32 0.015625, %v3034_v20  ;;  %v3091_v40 = vmul.f32 %v2995_v58, %v2995_v58  ;;  %v3123_v5 = vsub.f32 %v5673_v11, %v2995_v58 }
 0x6e8   : > { %v3037_v30 = vpop.xlane.xlu1 %3036 }
 0x6e9   : > { %v3108_v3 = vsub.f32 %v3076_v55, %v3092_v19  ;;  %v3077_v49 = vmul.f32 0.015625, %v3037_v30 }
 0x6ea   : > { %v3028_v8 = vpop.xlane.xlu0 %3027 }
 0x6eb   : > { %v3140_v28 = vadd.f32 1e-05, %v3108_v3  ;;  %v3109_v36 = vsub.f32 %v3077_v49, %v3093_v38  ;;  %v3074_v37 = vmul.f32 0.015625, %v3028_v8 }
 0x6ec   : > { %v3031_v52 = vpop.xlane.xlu1 %3030 }
 0x6ed   : > { %4208 = vrsqrt.f32 %v3140_v28  ;;  %v3141_v27 = vadd.f32 1e-05, %v3109_v36  ;;  %v3106_v33 = vsub.f32 %v3074_v37, %v3090_v39  ;;  %v3075_v44 = vmul.f32 0.015625, %v3031_v52 }
 0x6ef   : > { %4210 = vrsqrt.f32 %v3141_v27  ;;  %v3138_v60 = vadd.f32 1e-05, %v3106_v33  ;;  %v3107_v23 = vsub.f32 %v3075_v44, %v3091_v40 }
 0x6f0   : > { %v2966_v12 = vpop.xlane.xlu0 %2965 }
 0x6f1   : > { %4212 = vrsqrt.f32 %v3138_v60  ;;  %v3139_v16 = vadd.f32 1e-05, %v3107_v23  ;;  %v5837_v31 = vmul.f32 0.015625, %v2966_v12 }
 0x6f2   : > { %v2969_v34 = vpop.xlane.xlu1 %2968 }
 0x6f3   : > { %4214 = vrsqrt.f32 %v3139_v16  ;;  %v5845_v22 = vmul.f32 0.015625, %v2969_v34  ;;  %v3096_v46 = vmul.f32 %v5837_v31, %v5837_v31 }
 0x6f4   : > { %v2960_v15 = vpop.xlane.xlu0 %2959 }
 0x6f5   : > { %v5848_v63 = vmul.f32 0.015625, %v2960_v15  ;;  %v3097_v35 = vmul.f32 %v5845_v22, %v5845_v22 }
 0x6f6   : > { %v2963_v62 = vpop.xlane.xlu1 %2962 }
 0x6f7   : > { %v4209_v50 = vpop.eup %4208  ;;  %v5857_v41 = vmul.f32 0.015625, %v2963_v62  ;;  %v3094_v29 = vmul.f32 %v5848_v63, %v5848_v63 }
 0x6f8   : > { %v3172_v57 = vmul.f32 %v4209_v50, %v3124_v48  ;;  %v3046_v21 = vpop.xlane.xlu0 %3045 }
 0x6f9   : > { %v4211_v18 = vpop.eup %4210  ;;  %v3080_v51 = vmul.f32 0.015625, %v3046_v21  ;;  %v3095_v30 = vmul.f32 %v5857_v41, %v5857_v41 }
 0x6fa   : > { %v3195_v1 = vmul.f32 %v5843_v42, %v3172_v57  ;;  %v3173_v4 = vmul.f32 %v4211_v18, %v3125_v53  ;;  %v3049_v0 = vpop.xlane.xlu1 %3048 }
 0x6fb   : > { %v4213_v61 = vpop.eup %4212  ;;  %v3112_v14 = vsub.f32 %v3080_v51, %v3096_v46  ;;  %v3081_v25 = vmul.f32 0.015625, %v3049_v0 }
 0x6fc   : > { %v5865_v17 = vadd.f32 %v5853_v9, %v3195_v1  ;;  %v3196_v20 = vmul.f32 %v5843_v42, %v3173_v4  ;;  %v3170_v19 = vmul.f32 %v4213_v61, %v3122_v6  ;;  %v3040_v7 = vpop.xlane.xlu0 %3039  ;;  %v3128_v6 = vsub.f32 %v5707_v54, %v5837_v31 }
 0x6fd   : > { %v4215_v55 = vpop.eup %4214  ;;  %v3144_v11 = vadd.f32 1e-05, %v3112_v14  ;;  %v3113_v58 = vsub.f32 %v3081_v25, %v3097_v35  ;;  %v3078_v38 = vmul.f32 0.015625, %v3040_v7  ;;  %v3129_v35 = vsub.f32 %v5713_v24, %v5845_v22 }
 0x6fe   : > { %v3234_v3 = vsub.f32 0.0, %v5865_v17  ;;  %v5874_v49 = vadd.f32 %v5853_v9, %v3196_v20  ;;  %v3171_v8 = vmul.f32 %v4215_v55, %v3123_v5  ;;  %v3043_v39 = vpop.xlane.xlu1 %3042  ;;  %v3193_v28 = vmul.f32 %v5843_v42, %v3170_v19 }
 0x6ff   : > { %4216 = vrsqrt.f32 %v3144_v11  ;;  %v3145_v36 = vadd.f32 1e-05, %v3113_v58  ;;  %v3110_v37 = vsub.f32 %v3078_v38, %v3094_v29  ;;  %v3079_v40 = vmul.f32 0.015625, %v3043_v39 }
 0x700   : > { %v3252_v52 = vmul.f32 1.442695, %v3234_v3  ;;  %v3235_v27 = vsub.f32 0.0, %v5874_v49  ;;  %v2978_v33 = vpop.xlane.xlu0 %2977  ;;  %v3194_v44 = vmul.f32 %v5843_v42, %v3171_v8  ;;  %v5880_v60 = vadd.f32 %v5853_v9, %v3193_v28 }
 0x701   : > { %4218 = vrsqrt.f32 %v3145_v36  ;;  %v3142_v23 = vadd.f32 1e-05, %v3110_v37  ;;  %v3111_v12 = vsub.f32 %v3079_v40, %v3095_v30  ;;  %v5887_v21 = vmul.f32 0.015625, %v2978_v33 }
 0x702   : > { %4220 = vpow2.f32 %v3252_v52  ;;  %v3254_v16 = vmul.f32 1.442695, %v3235_v27  ;;  %v2981_v34 = vpop.xlane.xlu1 %2980  ;;  %v5883_v15 = vadd.f32 %v5853_v9, %v3194_v44  ;;  %v3232_v48 = vsub.f32 0.0, %v5880_v60 }
 0x703   : > { %4222 = vrsqrt.f32 %v3142_v23  ;;  %v3143_v62 = vadd.f32 1e-05, %v3111_v12  ;;  %v5889_v51 = vmul.f32 0.015625, %v2981_v34  ;;  %v3100_v61 = vmul.f32 %v5887_v21, %v5887_v21 }
 0x704   : > { %4224 = vpow2.f32 %v3254_v16  ;;  %v2972_v50 = vpop.xlane.xlu0 %2971  ;;  %v3233_v53 = vsub.f32 0.0, %v5883_v15  ;;  %v3248_v57 = vmul.f32 1.442695, %v3232_v48  ;;  %v3126_v55 = vsub.f32 %v5710_v10, %v5848_v63 }
 0x705   : > { %4226 = vrsqrt.f32 %v3143_v62  ;;  %v5893_v1 = vmul.f32 0.015625, %v2972_v50  ;;  %v3101_v54 = vmul.f32 %v5889_v51, %v5889_v51  ;;  %v3127_v36 = vsub.f32 %v5717_v43, %v5857_v41 }
 0x706   : > { %v2975_v18 = vpop.xlane.xlu1 %2974  ;;  %4228 = vpow2.f32 %v3248_v57  ;;  %v3250_v46 = vmul.f32 1.442695, %v3233_v53 }
 0x707   : > { %v5899_v25 = vmul.f32 0.015625, %v2975_v18  ;;  %v3098_v11 = vmul.f32 %v5893_v1, %v5893_v1 }
 0x708   : > { %v3058_v4 = vpop.xlane.xlu0 %3057  ;;  %4230 = vpow2.f32 %v3250_v46 }
 0x709   : > { %v4217_v0 = vpop.eup %4216  ;;  %v3084_v5 = vmul.f32 0.015625, %v3058_v4  ;;  %v3099_v10 = vmul.f32 %v5899_v25, %v5899_v25 }
 0x70a   : > { %v3176_v14 = vmul.f32 %v4217_v0, %v3128_v6  ;;  %v3061_v20 = vpop.xlane.xlu1 %3060 }
 0x70b   : > { %v4219_v19 = vpop.eup %4218  ;;  %v3116_v31 = vsub.f32 %v3084_v5, %v3100_v61  ;;  %v3085_v29 = vmul.f32 0.015625, %v3061_v20  ;;  %v3132_v5 = vsub.f32 %v5750_v2, %v5887_v21 }
 0x70c   : > { %v4221_v7 = vpop.eup %4220  ;;  %v3177_v30 = vmul.f32 %v4219_v19, %v3129_v35  ;;  %v3052_v58 = vpop.xlane.xlu0 %3051  ;;  %v3199_v24 = vmul.f32 %v5843_v42, %v3176_v14 }
 0x70d   : > { %v4223_v22 = vpop.eup %4222  ;;  %v3282_v38 = vadd.f32 1.0, %v4221_v7  ;;  %v3148_v3 = vadd.f32 1e-05, %v3116_v31  ;;  %v3117_v8 = vsub.f32 %v3085_v29, %v3101_v54  ;;  %v3082_v39 = vmul.f32 0.015625, %v3052_v58 }
 0x70e   : > { %v4225_v28 = vpop.eup %4224  ;;  %v3174_v37 = vmul.f32 %v4223_v22, %v3126_v55  ;;  %v3055_v63 = vpop.xlane.xlu1 %3054  ;;  %v3200_v40 = vmul.f32 %v5843_v42, %v3177_v30  ;;  %v5915_v62 = vadd.f32 %v5853_v9, %v3199_v24  ;;  %v3133_v29 = vsub.f32 %v5757_v45, %v5889_v51 }
 0x70f   : > { %v4227_v52 = vpop.eup %4226  ;;  %4232 = vrcp.f32 %v3282_v38  ;;  %v3283_v27 = vadd.f32 1.0, %v4225_v28  ;;  %v3149_v33 = vadd.f32 1e-05, %v3117_v8  ;;  %v3114_v44 = vsub.f32 %v3082_v39, %v3098_v11 }
 0x710   : > { %v4229_v23 = vpop.eup %4228  ;;  %v3175_v12 = vmul.f32 %v4227_v52, %v3127_v36  ;;  %4234 = vrsqrt.f32 %v3148_v3  ;;  %v3083_v16 = vmul.f32 0.015625, %v3055_v63  ;;  %v2990_v34 = vpop.xlane.xlu0 %2989  ;;  %v3197_v48 = vmul.f32 %v5843_v42, %v3174_v37 }
 0x711   : > { %4236 = vrcp.f32 %v3283_v27  ;;  %v3146_v43 = vadd.f32 1e-05, %v3114_v44  ;;  %v3280_v41 = vadd.f32 1.0, %v4229_v23  ;;  %v5931_v54 = vadd.f32 %v5853_v9, %v3200_v40 }
 0x712   : > { %v4231_v50 = vpop.eup %4230  ;;  %4238 = vrsqrt.f32 %v3149_v33  ;;  %v3115_v53 = vsub.f32 %v3083_v16, %v3099_v10  ;;  %v2993_v57 = vpop.xlane.xlu1 %2992  ;;  %v3198_v18 = vmul.f32 %v5843_v42, %v3175_v12  ;;  %v5919_v46 = vadd.f32 %v5853_v9, %v3197_v48 }
 0x713   : > { %4240 = vrsqrt.f32 %v3146_v43  ;;  %v3281_v0 = vadd.f32 1.0, %v4231_v50  ;;  %v3238_v31 = vsub.f32 0.0, %v5915_v62  ;;  %v5936_v7 = vmul.f32 0.015625, %v2990_v34 }
 0x714   : > { %v3147_v6 = vadd.f32 1e-05, %v3115_v53  ;;  %v2984_v4 = vpop.xlane.xlu0 %2983  ;;  %4242 = vrcp.f32 %v3280_v41  ;;  %v5922_v61 = vadd.f32 %v5853_v9, %v3198_v18  ;;  %v3236_v14 = vsub.f32 0.0, %v5919_v46 }
 0x715   : > { %v5926_v35 = vmul.f32 0.015625, %v2984_v4  ;;  %v5940_v2 = vmul.f32 0.015625, %v2993_v57  ;;  %v3239_v58 = vsub.f32 0.0, %v5931_v54  ;;  %v3130_v22 = vsub.f32 %v5753_v32, %v5893_v1 }
 0x716   : > { %4244 = vrsqrt.f32 %v3147_v6  ;;  %v2987_v20 = vpop.xlane.xlu1 %2986  ;;  %v3237_v19 = vsub.f32 0.0, %v5922_v61  ;;  %v3256_v30 = vmul.f32 1.442695, %v3236_v14  ;;  %v3260_v51 = vmul.f32 1.442695, %v3238_v31 }
 0x717   : > { %v5938_v55 = vmul.f32 0.015625, %v2987_v20  ;;  %4246 = vrcp.f32 %v3281_v0  ;;  %v3102_v38 = vmul.f32 %v5926_v35, %v5926_v35  ;;  %v3131_v8 = vsub.f32 %v5761_v47, %v5899_v25 }
 0x718   : > { %v3064_v21 = vpop.xlane.xlu0 %3063  ;;  %v3258_v11 = vmul.f32 1.442695, %v3237_v19  ;;  %4248 = vpow2.f32 %v3256_v30  ;;  %v3262_v36 = vmul.f32 1.442695, %v3239_v58  ;;  %v3104_v1 = vmul.f32 %v5936_v7, %v5936_v7 }
 0x719   : > { %v4233_v24 = vpop.eup %4232  ;;  %v3086_v45 = vmul.f32 0.015625, %v3064_v21  ;;  %v3103_v39 = vmul.f32 %v5938_v55, %v5938_v55  ;;  %v3105_v52 = vmul.f32 %v5940_v2, %v5940_v2 }
 0x71a   : > { %v4235_v3 = vpop.eup %4234  ;;  %v3067_v28 = vpop.xlane.xlu1 %3066  ;;  %4250 = vpow2.f32 %v3258_v11  ;;  %v3314_v47 = vmul.f32 %v4233_v24, %v5865_v17 }
 0x71b   : > { %v4237_v37 = vpop.eup %4236  ;;  %v3180_v10 = vmul.f32 %v4235_v3, %v3132_v5  ;;  %v3118_v63 = vsub.f32 %v3086_v45, %v3102_v38  ;;  %v3087_v40 = vmul.f32 0.015625, %v3067_v28  ;;  %4252 = vpow2.f32 %v3260_v51 }
 0x71c   : > { %v4239_v32 = vpop.eup %4238  ;;  %v3070_v27 = vpop.xlane.xlu0 %3069  ;;  %v3315_v43 = vmul.f32 %v4237_v37, %v5874_v49  ;;  %4254 = vpow2.f32 %v3262_v36 }
 0x71d   : > { %v4241_v25 = vpop.eup %4240  ;;  %v3181_v33 = vmul.f32 %v4239_v32, %v3133_v29  ;;  %v3150_v44 = vadd.f32 1e-05, %v3118_v63  ;;  %v3119_v23 = vsub.f32 %v3087_v40, %v3103_v39  ;;  %v3088_v12 = vmul.f32 0.015625, %v3070_v27 }
 0x71e   : > { %v4243_v16 = vpop.eup %4242  ;;  %v3178_v34 = vmul.f32 %v4241_v25, %v3130_v22  ;;  %v3073_v48 = vpop.xlane.xlu1 %3072  ;;  %v3203_v41 = vmul.f32 %v5843_v42, %v3180_v10  ;;  %v3329_v24 = vpack.c.bf16 %v3315_v43, %v3314_v47  ;;  %v3134_v63 = vsub.f32 %v5796_v56, %v5926_v35 }
 0x71f   : > { %4256 = vrsqrt.f32 %v3150_v44  ;;  %v3151_v50 = vadd.f32 1e-05, %v3119_v23  ;;  %v3120_v53 = vsub.f32 %v3088_v12, %v3104_v1  ;;  %v3089_v57 = vmul.f32 0.015625, %v3073_v48 }
 0x720   : > { %v4245_v18 = vpop.eup %4244  ;;  %v3312_v17 = vmul.f32 %v4243_v16, %v5880_v60  ;;  %v3201_v6 = vmul.f32 %v5843_v42, %v3178_v34  ;;  %v3204_v4 = vmul.f32 %v5843_v42, %v3181_v33  ;;  %v5962_v0 = vadd.f32 %v5853_v9, %v3203_v41 }
 0x721   : > { %v4247_v5 = vpop.eup %4246  ;;  %v3179_v14 = vmul.f32 %v4245_v18, %v3131_v8  ;;  %4258 = vrsqrt.f32 %v3151_v50  ;;  %v3152_v49 = vadd.f32 1e-05, %v3120_v53  ;;  %v3121_v20 = vsub.f32 %v3089_v57, %v3105_v52 }
 0x722   : > { %v3313_v19 = vmul.f32 %v4247_v5, %v5883_v15  ;;  %v5966_v31 = vadd.f32 %v5853_v9, %v3201_v6  ;;  %v5969_v29 = vadd.f32 %v5853_v9, %v3204_v4  ;;  %v3242_v60 = vsub.f32 0.0, %v5962_v0  ;;  %v4249_v11 = vpop.eup %4248 }
 0x723   : > { %4260 = vrsqrt.f32 %v3152_v49  ;;  %v3153_v21 = vadd.f32 1e-05, %v3121_v20  ;;  %v3202_v30 = vmul.f32 %v5843_v42, %v3179_v14  ;;  %v3284_v15 = vadd.f32 1.0, %v4249_v11 }
 0x724   : > { %v3328_v58 = vpack.c.bf16 %v3313_v19, %v3312_v17  ;;  %v3240_v22 = vsub.f32 0.0, %v5966_v31  ;;  %v3268_v38 = vmul.f32 1.442695, %v3242_v60  ;;  %v4251_v45 = vpop.eup %4250  ;;  %v3243_v3 = vsub.f32 0.0, %v5969_v29 }
 0x725   : > { %4262 = vrsqrt.f32 %v3153_v21  ;;  %v5975_v51 = vadd.f32 %v5853_v9, %v3202_v30  ;;  %v4253_v8 = vpop.eup %4252  ;;  %v3285_v39 = vadd.f32 1.0, %v4251_v45  ;;  %v3135_v27 = vsub.f32 %v5802_v59, %v5938_v55 }
 0x726   : > { %3833 = vmatprep.mubr.msk.bf16.mxu0 %vm1637_vm2, %v3328_v58  ;;  %v3264_v28 = vmul.f32 1.442695, %v3240_v22  ;;  %4264 = vpow2.f32 %v3268_v38  ;;  %v3286_v36 = vadd.f32 1.0, %v4253_v8  ;;  %v4255_v10 = vpop.eup %4254  ;;  %v3270_v52 = vmul.f32 1.442695, %v3243_v3 }
 0x727   : > { %3834 = vmatmul.mubr.msk.bf16.vlgmr.msra.gmra.mrb[56].mxu0 %vm1637_vm2, %v3329_v24  ;;  %4266 = vrcp.f32 %v3284_v15  ;;  %v3241_v37 = vsub.f32 0.0, %v5975_v51  ;;  %v3287_v32 = vadd.f32 1.0, %v4255_v10  ;;  %v3136_v33 = vsub.f32 %v5793_v13, %v5936_v7 }
 0x728   : > { %4268 = vrcp.f32 %v3285_v39  ;;  %v3137_v23 = vsub.f32 %v5800_v26, %v5940_v2 }
 0x729   : > { %v4257_v40 = vpop.eup %4256  ;;  %4270 = vrcp.f32 %v3286_v36  ;;  %v3266_v1 = vmul.f32 1.442695, %v3241_v37 }
 0x72a   : > { %v3182_v47 = vmul.f32 %v4257_v40, %v3134_v63  ;;  %4272 = vpow2.f32 %v3264_v28 }
 0x72b   : > { %v4259_v25 = vpop.eup %4258  ;;  %4274 = vrcp.f32 %v3287_v32 }
 0x72c   : > { %v3183_v44 = vmul.f32 %v4259_v25, %v3135_v27  ;;  %4276 = vpow2.f32 %v3266_v1  ;;  %v3205_v56 = vmul.f32 %v5843_v42, %v3182_v47 }
 0x72d   : > { %v4261_v35 = vpop.eup %4260  ;;  %4278 = vpow2.f32 %v3270_v52 }
 0x72e   : > { %v3184_v12 = vmul.f32 %v4261_v35, %v3136_v33  ;;  %v3206_v16 = vmul.f32 %v5843_v42, %v3183_v44  ;;  %v5992_v59 = vadd.f32 %v5853_v9, %v3205_v56 }
 0x72f   : > { %v4263_v55 = vpop.eup %4262 }
 0x730   : > { %v4265_v34 = vpop.eup %4264  ;;  %v3185_v48 = vmul.f32 %v4263_v55, %v3137_v23  ;;  %v5995_v13 = vadd.f32 %v5853_v9, %v3206_v16  ;;  %v3244_v7 = vsub.f32 0.0, %v5992_v59  ;;  %v3207_v43 = vmul.f32 %v5843_v42, %v3184_v12  ;;  %v3669_v12 = vld [vmem:[%s6084_s21] ss:$0 sm:$0xff] }
 0x731   : > { %v4267_v41 = vpop.eup %4266  ;;  %v3290_v5 = vadd.f32 1.0, %v4265_v34 }
 0x732   : > { %v4269_v50 = vpop.eup %4268  ;;  %v3245_v26 = vsub.f32 0.0, %v5995_v13  ;;  %v3272_v2 = vmul.f32 1.442695, %v3244_v7  ;;  %v3208_v53 = vmul.f32 %v5843_v42, %v3185_v48  ;;  %v3316_v18 = vmul.f32 %v4267_v41, %v5919_v46 }
 0x733   : > { %v4271_v57 = vpop.eup %4270  ;;  %v3317_v17 = vmul.f32 %v4269_v50, %v5922_v61  ;;  %v3230_v6 = vadd.f32 %v5853_v9, %v3207_v43 }
 0x734   : > { %v4273_v4 = vpop.eup %4272  ;;  %4280 = vpow2.f32 %v3272_v2  ;;  %v3274_v14 = vmul.f32 1.442695, %v3245_v26  ;;  %v3231_v49 = vadd.f32 %v5853_v9, %v3208_v53  ;;  %v3318_v42 = vmul.f32 %v4271_v57, %v5915_v62 }
 0x735   : > { %v4275_v20 = vpop.eup %4274  ;;  %v3330_v19 = vpack.c.bf16 %v3317_v17, %v3316_v18  ;;  %v3288_v60 = vadd.f32 1.0, %v4273_v4  ;;  %v3246_v21 = vsub.f32 0.0, %v3230_v6 }
 0x736   : > { %v4277_v30 = vpop.eup %4276  ;;  %v3319_v11 = vmul.f32 %v4275_v20, %v5931_v54  ;;  %4282 = vpow2.f32 %v3274_v14  ;;  %v3247_v46 = vsub.f32 0.0, %v3231_v49 }
 0x737   : > { %v4279_v61 = vpop.eup %4278  ;;  %3837 = vmatprep.mubr.msk.bf16.mxu0 %vm1637_vm2, %v3330_v19  ;;  %v3289_v58 = vadd.f32 1.0, %v4277_v30  ;;  %4284 = vrcp.f32 %v3288_v60  ;;  %v3276_v24 = vmul.f32 1.442695, %v3246_v21 }
 0x738   : > { %v3331_v22 = vpack.c.bf16 %v3319_v11, %v3318_v42  ;;  %v3291_v38 = vadd.f32 1.0, %v4279_v61  ;;  %4286 = vrcp.f32 %v3290_v5  ;;  %v3278_v9 = vmul.f32 1.442695, %v3247_v46 }
 0x739   : > { %4288 = vrcp.f32 %v3289_v58 }
 0x73a   : > { %3838 = vmatmul.mubr.msk.bf16.gmra.mrb[60].mxu0 %vm1637_vm2, %v3331_v22  ;;  %4290 = vrcp.f32 %v3291_v38 }
 0x73b   : > { %4292 = vpow2.f32 %v3276_v24 }
 0x73c   : > { %4294 = vpow2.f32 %v3278_v9 }
 0x73e   : > { %v4281_v62 = vpop.eup %4280 }
 0x73f   : > { %v3292_v54 = vadd.f32 1.0, %v4281_v62 }
 0x740   : > { %v4283_v45 = vpop.eup %4282 }
 0x741   : > { %v4285_v15 = vpop.eup %4284  ;;  %v3293_v3 = vadd.f32 1.0, %v4283_v45  ;;  %4296 = vrcp.f32 %v3292_v54 }
 0x742   : > { %v4287_v8 = vpop.eup %4286  ;;  %v3320_v36 = vmul.f32 %v4285_v15, %v5966_v31 }
 0x743   : > { %v4289_v39 = vpop.eup %4288  ;;  %4298 = vrcp.f32 %v3293_v3  ;;  %v3322_v63 = vmul.f32 %v4287_v8, %v5962_v0 }
 0x744   : > { %v4291_v28 = vpop.eup %4290  ;;  %v3321_v37 = vmul.f32 %v4289_v39, %v5975_v51 }
 0x745   : > { %v4293_v10 = vpop.eup %4292  ;;  %v3323_v40 = vmul.f32 %v4291_v28, %v5969_v29 }
 0x746   : > { %v4295_v32 = vpop.eup %4294  ;;  %v3332_v1 = vpack.c.bf16 %v3321_v37, %v3320_v36  ;;  %v3294_v52 = vadd.f32 1.0, %v4293_v10 }
 0x747   : > { %v3333_v27 = vpack.c.bf16 %v3323_v40, %v3322_v63  ;;  %v3295_v47 = vadd.f32 1.0, %v4295_v32 }
 0x748   : > { %3841 = vmatprep.mubr.msk.bf16.mxu0 %vm1637_vm2, %v3332_v1  ;;  %4300 = vrcp.f32 %v3294_v52 }
 0x749   : > { %3842 = vmatmul.mubr.msk.bf16.gmra.mrb[64].mxu0 %vm1637_vm2, %v3333_v27  ;;  %4302 = vrcp.f32 %v3295_v47 }
 0x74b   : > { %v4297_v31 = vpop.eup %4296 }
 0x74c   : > { %v3324_v51 = vmul.f32 %v4297_v31, %v5992_v59 }
 0x74d   : > { %v4299_v25 = vpop.eup %4298 }
 0x74e   : > { %v3325_v0 = vmul.f32 %v4299_v25, %v5995_v13 }
 0x750   : > { %v3334_v33 = vpack.c.bf16 %v3325_v0, %v3324_v51 }
 0x752   : > { %v4301_v29 = vpop.eup %4300  ;;  %3845 = vmatprep.mubr.msk.bf16.mxu0 %vm1637_vm2, %v3334_v33 }
 0x753   : > { %v4303_v44 = vpop.eup %4302  ;;  %v3326_v56 = vmul.f32 %v4301_v29, %v3230_v6 }
 0x754   : > { %v3327_v35 = vmul.f32 %v4303_v44, %v3231_v49 }
 0x756   : > { %v3335_v23 = vpack.c.bf16 %v3327_v35, %v3326_v56 }
 0x758   : > { %3846 = vmatmul.mubr.msk.bf16.gmra.mrb[68].mxu0 %vm1637_vm2, %v3335_v23 }
 0x7fa   : > { %v3835_v16 = vpop.f32.mrb[56].mxu0 }
 0x7fb   : > { %v3442_v59 = vadd.f32 %v3835_v16, %v3669_v12  ;;  %v3433_v55 = vpop.f32.mrb[57].mxu0 }
 0x7fc   : > { %v3434_v34 = vadd.f32 %v3669_v12, %v3433_v55  ;;  %v3836_v48 = vpop.f32.mrb[58].mxu0 }
 0x7fd   : > { %3498 = vst.msk [vmem:[%s6026_s29 + $0x10] sm:$0xff] %vm998_vm1, %v3442_v59  ;;  %v3445_v13 = vadd.f32 %v3836_v48, %v3669_v12  ;;  %v3436_v7 = vpop.f32.mrb[59].mxu0 }
 0x7fe   : > { %3496 = vst.msk [vmem:[%s6026_s29] sm:$0xff] %vm998_vm1, %v3434_v34  ;;  %v3437_v43 = vadd.f32 %v3669_v12, %v3436_v7 }
 0x7ff   : > { %3499 = vst.msk [vmem:[%s6026_s29 + $0x18] sm:$0xff] %vm998_vm1, %v3445_v13 }
 0x800   : > { %3497 = vst.msk [vmem:[%s6026_s29 + $0x8] sm:$0xff] %vm998_vm1, %v3437_v43 }
 0x80d   : > { %v3839_v41 = vpop.f32.mrb[60].mxu0 }
 0x80e   : > { %v3458_v50 = vadd.f32 %v3839_v41, %v3669_v12  ;;  %v3449_v26 = vpop.f32.mrb[61].mxu0 }
 0x80f   : > { %v3450_v2 = vadd.f32 %v3669_v12, %v3449_v26  ;;  %v3840_v53 = vpop.f32.mrb[62].mxu0 }
 0x810   : > { %3502 = vst.msk [vmem:[%s6026_s29 + $0x30] sm:$0xff] %vm998_vm1, %v3458_v50  ;;  %v3461_v57 = vadd.f32 %v3840_v53, %v3669_v12  ;;  %v3452_v18 = vpop.f32.mrb[63].mxu0 }
 0x811   : > { %3500 = vst.msk [vmem:[%s6026_s29 + $0x20] sm:$0xff] %vm998_vm1, %v3450_v2  ;;  %v3453_v17 = vadd.f32 %v3669_v12, %v3452_v18 }
 0x812   : > { %3503 = vst.msk [vmem:[%s6026_s29 + $0x38] sm:$0xff] %vm998_vm1, %v3461_v57 }
 0x813   : > { %3501 = vst.msk [vmem:[%s6026_s29 + $0x28] sm:$0xff] %vm998_vm1, %v3453_v17 }
 0x81c   : > { %v3843_v6 = vpop.f32.mrb[64].mxu0 }
 0x81d   : > { %v3474_v4 = vadd.f32 %v3843_v6, %v3669_v12  ;;  %v3465_v5 = vpop.f32.mrb[65].mxu0 }
 0x81e   : > { %v3466_v14 = vadd.f32 %v3669_v12, %v3465_v5  ;;  %v3844_v49 = vpop.f32.mrb[66].mxu0 }
 0x81f   : > { %3506 = vst.msk [vmem:[%s6026_s29 + $0x50] sm:$0xff] %vm998_vm1, %v3474_v4  ;;  %v3477_v20 = vadd.f32 %v3844_v49, %v3669_v12  ;;  %v3468_v19 = vpop.f32.mrb[67].mxu0 }
 0x820   : > { %3504 = vst.msk [vmem:[%s6026_s29 + $0x40] sm:$0xff] %vm998_vm1, %v3466_v14  ;;  %v3469_v60 = vadd.f32 %v3669_v12, %v3468_v19 }
 0x821   : > { %3507 = vst.msk [vmem:[%s6026_s29 + $0x58] sm:$0xff] %vm998_vm1, %v3477_v20 }
 0x822   : > { %3505 = vst.msk [vmem:[%s6026_s29 + $0x48] sm:$0xff] %vm998_vm1, %v3469_v60 }
 0x82b   : > { %v3847_v21 = vpop.f32.mrb[68].mxu0 }
 0x82c   : > { %v3490_v30 = vadd.f32 %v3847_v21, %v3669_v12  ;;  %v3481_v42 = vpop.f32.mrb[69].mxu0 }
 0x82d   : > { %v3482_v11 = vadd.f32 %v3669_v12, %v3481_v42  ;;  %v3848_v46 = vpop.f32.mrb[70].mxu0 }
 0x82e   : > { %3510 = vst.msk [vmem:[%s6026_s29 + $0x70] sm:$0xff] %vm998_vm1, %v3490_v30  ;;  %v3493_v61 = vadd.f32 %v3848_v46, %v3669_v12  ;;  %v3484_v58 = vpop.f32.mrb[71].mxu0 }
 0x82f   : > { %3508 = vst.msk [vmem:[%s6026_s29 + $0x60] sm:$0xff] %vm998_vm1, %v3482_v11  ;;  %v3485_v24 = vadd.f32 %v3669_v12, %v3484_v58 }
 0x830   : > { %3511 = vst.msk [vmem:[%s6026_s29 + $0x78] sm:$0xff] %vm998_vm1, %v3493_v61 }
 0x831   : > { %3509 = vst.msk [vmem:[%s6026_s29 + $0x68] sm:$0xff] %vm998_vm1, %v3485_v24 }
 0x832 PF: > { %s32_s3 = sadd.s32 1, %s4311_s3  }
 0x833   : > { %p29_p4 = scmp.ge.s32.totalorder %s32_s3, 4  }
 0x835   :  { %31 = sbr.rel (!%p29_p4) target bundleno = 8 (0x8), region = 141 }

</bundles_post_ra>
